<compile_context>
chip_gen: v7x
topology: tpu7x:2x2x1
jax: 0.10.0
libtpu: 0.0.40
codegen_flags: <defaults>
</compile_context>

<pallas_src>
import functools

import jax
import jax.numpy as jnp
from jax import lax
from jax.experimental import pallas as pl
from jax.experimental.pallas import tpu as pltpu

SPLATTING_TYPES = ["summation", "average", "linear", "softmax"]


def _round_up(x, m):
    return (x + m - 1) // m * m


# --------------------------------------------------------------------------
# Pallas kernel: one (batch, q-tile, p-tile) step.
# --------------------------------------------------------------------------
def _splat_kernel(bounds_ref, frame_ref, tgt_ref, wgt_ref, out_ref, acc_ref,
                  *, tq):
    # bounds_ref : SMEM (N * n_p * 2,) int32  -- [min, max] valid target per p-tile
    # frame_ref  : VMEM (C, TP)
    # tgt_ref    : VMEM (TP, 4) int32   corner flat targets (-1 if invalid)
    # wgt_ref    : VMEM (TP, 4) f32     validity-masked bilinear weights
    # out_ref    : VMEM (C, TQ)
    # acc_ref    : VMEM (C, TQ) f32     scratch accumulator (resident over p)
    n = pl.program_id(0)
    qj = pl.program_id(1)
    pk = pl.program_id(2)
    n_p = pl.num_programs(2)

    @pl.when(pk == 0)
    def _init():
        acc_ref[...] = jnp.zeros_like(acc_ref)

    q0 = qj * tq
    base = 2 * (n * n_p + pk)
    mn = bounds_ref[base]
    mx = bounds_ref[base + 1]

    # Skip (p-tile, q-tile) pairs whose valid target range cannot overlap.
    @pl.when((mn < q0 + tq) & (mx >= q0))
    def _compute():
        tp = tgt_ref.shape[0]
        q = lax.broadcasted_iota(jnp.int32, (tp, tq), 1) + q0
        tgts = tgt_ref[...]                       # (TP, 4) int32
        wgts = wgt_ref[...]                       # (TP, 4) f32
        # One select per corner (weights already masked for OOB corners).
        scatter = jnp.where(q == tgts[:, 0:1], wgts[:, 0:1], 0.0)
        for c in range(1, 4):
            scatter = scatter + jnp.where(q == tgts[:, c:c + 1],
                                          wgts[:, c:c + 1], 0.0)
        acc_ref[...] += jnp.dot(frame_ref[...].astype(jnp.float32), scatter,
                                preferred_element_type=jnp.float32)

    @pl.when(pk == n_p - 1)
    def _writeback():
        out_ref[...] = acc_ref[...].astype(out_ref.dtype)


# --------------------------------------------------------------------------
# Wrapper: equivalent of SummationSplattingFunction.forward (NCHW -> NCHW).
# --------------------------------------------------------------------------
def summation_splat(frame, flow, *, tq=512, tp=512):
    N, C, H, W = frame.shape
    assert flow.shape == (N, 2, H, W)
    assert frame.dtype == flow.dtype
    P = H * W

    # ---- per-pixel corner targets + validity-masked weights (fused XLA) ----
    x = jnp.arange(W, dtype=jnp.float32)[None, None, :]
    y = jnp.arange(H, dtype=jnp.float32)[None, :, None]
    ox = x + flow[:, 0].astype(jnp.float32)           # (N, H, W)
    oy = y + flow[:, 1].astype(jnp.float32)
    fx = jnp.floor(ox)
    fy = jnp.floor(oy)
    dx = ox - fx
    dy = oy - fy
    ix0 = fx.astype(jnp.int32)
    iy0 = fy.astype(jnp.int32)
    ix1 = ix0 + 1
    iy1 = iy0 + 1
    vx0 = (ix0 >= 0) & (ix0 < W)
    vx1 = (ix1 >= 0) & (ix1 < W)
    vy0 = (iy0 >= 0) & (iy0 < H)
    vy1 = (iy1 >= 0) & (iy1 < H)
    wx0 = jnp.where(vx0, 1.0 - dx, 0.0)
    wx1 = jnp.where(vx1, dx, 0.0)
    wy0 = jnp.where(vy0, 1.0 - dy, 0.0)
    wy1 = jnp.where(vy1, dy, 0.0)

    def _tgt(iy, ix, valid):
        return jnp.where(valid, iy * W + ix, -1)

    tgts = jnp.stack([_tgt(iy0, ix0, vy0 & vx0),
                      _tgt(iy0, ix1, vy0 & vx1),
                      _tgt(iy1, ix0, vy1 & vx0),
                      _tgt(iy1, ix1, vy1 & vx1)],
                     axis=-1).reshape(N, P, 4).astype(jnp.int32)
    wgts = jnp.stack([wy0 * wx0, wy0 * wx1, wy1 * wx0, wy1 * wx1],
                     axis=-1).reshape(N, P, 4).astype(jnp.float32)

    # ---- tile sizes (multiples of 128; ~a few MiB VMEM -> safe on v7x too) --
    tq = min(tq, _round_up(P, 128))
    tp = min(tp, _round_up(P, 128))
    Pp = _round_up(P, max(tq, tp))
    n_q = Pp // tq
    n_p = Pp // tp

    frame_flat = frame.reshape(N, C, P)
    if Pp != P:
        frame_flat = jnp.pad(frame_flat, ((0, 0), (0, 0), (0, Pp - P)))
        tgts = jnp.pad(tgts, ((0, 0), (0, Pp - P), (0, 0)),
                       constant_values=-1)
        wgts = jnp.pad(wgts, ((0, 0), (0, Pp - P), (0, 0)))

    # ---- per (batch, p-tile) valid-target bounds for tile skipping ----------
    tgt_tiles = tgts.reshape(N, n_p, tp * 4)
    mn = jnp.where(tgt_tiles >= 0, tgt_tiles, Pp).min(axis=-1)
    mx = tgt_tiles.max(axis=-1)
    bounds = jnp.stack([mn, mx], axis=-1).reshape(-1).astype(jnp.int32)

    grid_spec = pltpu.PrefetchScalarGridSpec(
        num_scalar_prefetch=1,
        grid=(N, n_q, n_p),
        in_specs=[
            pl.BlockSpec((None, C, tp), lambda n, qj, pk, b: (n, 0, pk)),
            pl.BlockSpec((None, tp, 4), lambda n, qj, pk, b: (n, pk, 0)),
            pl.BlockSpec((None, tp, 4), lambda n, qj, pk, b: (n, pk, 0)),
        ],
        out_specs=pl.BlockSpec((None, C, tq), lambda n, qj, pk, b: (n, 0, qj)),
        scratch_shapes=[pltpu.VMEM((C, tq), jnp.float32)],
    )

    bytes_io = int((frame_flat.size + tgts.size + wgts.size) * 4 * n_q
                   + N * C * Pp * 4)
    cost = pl.CostEstimate(flops=int(2 * N * C * Pp * Pp),
                           transcendentals=0,
                           bytes_accessed=bytes_io)

    out_flat = pl.pallas_call(
        functools.partial(_splat_kernel, tq=tq),
        out_shape=jax.ShapeDtypeStruct((N, C, Pp), frame.dtype),
        grid_spec=grid_spec,
        compiler_params=pltpu.CompilerParams(
            dimension_semantics=("parallel", "parallel", "arbitrary")),
        cost_estimate=cost,
    )(bounds, frame_flat, tgts, wgts)

    return out_flat[:, :, :P].reshape(N, C, H, W)


# --------------------------------------------------------------------------
# splatting_function / Splatting (forward semantics of the PyTorch module).
# --------------------------------------------------------------------------
def splatting_function(splatting_type, frame, flow, importance_metric=None,
                       eps=1e-7):
    if splatting_type == "summation":
        assert importance_metric is None
    elif splatting_type == "average":
        assert importance_metric is None
        importance_metric = jnp.ones(
            (frame.shape[0], 1, frame.shape[2], frame.shape[3]), frame.dtype)
        frame = jnp.concatenate([frame, importance_metric], axis=1)
    elif splatting_type == "linear":
        assert importance_metric is not None
        assert importance_metric.shape == (frame.shape[0], 1, frame.shape[2],
                                           frame.shape[3])
        frame = jnp.concatenate([frame * importance_metric, importance_metric],
                                axis=1)
    elif splatting_type == "softmax":
        assert importance_metric is not None
        assert importance_metric.shape == (frame.shape[0], 1, frame.shape[2],
                                           frame.shape[3])
        importance_metric = jnp.exp(importance_metric)
        frame = jnp.concatenate([frame * importance_metric, importance_metric],
                                axis=1)
    else:
        raise NotImplementedError(
            "splatting_type has to be one of {}, not '{}'".format(
                SPLATTING_TYPES, splatting_type))

    output = summation_splat(frame, flow)
    if splatting_type != "summation":
        output = output[:, :-1, :, :] / (output[:, -1:, :, :] + eps)
    return output


class Splatting:
    """JAX/Pallas counterpart of the PyTorch nn.Module (forward only)."""

    def __init__(self, splatting_type, eps=1e-7):
        if splatting_type not in SPLATTING_TYPES:
            raise NotImplementedError(
                "splatting_type has to be one of {}, not '{}'".format(
                    SPLATTING_TYPES, splatting_type))
        self.splatting_type = splatting_type
        self.eps = eps

    def __call__(self, frame, flow, importance_metric=None):
        return splatting_function(self.splatting_type, frame, flow,
                                  importance_metric, self.eps)


# ---------------- pure-JAX reference (scatter-add) for validation -----------
def _splat_reference(frame, flow):
    N, C, H, W = frame.shape
    x = jnp.arange(W, dtype=jnp.float32)[None, None, :]
    y = jnp.arange(H, dtype=jnp.float32)[None, :, None]
    ox = x + flow[:, 0]
    oy = y + flow[:, 1]
    fx = jnp.floor(ox)
    fy = jnp.floor(oy)
    dx = ox - fx
    dy = oy - fy
    ix0 = fx.astype(jnp.int32)
    iy0 = fy.astype(jnp.int32)

    out = jnp.zeros((N, C, H * W), frame.dtype)
    n_idx = jnp.arange(N)[:, None, None, None]
    c_idx = jnp.arange(C)[None, :, None, None]
    corners = [
        (ix0,     iy0,     (1 - dx) * (1 - dy)),
        (ix0 + 1, iy0,     dx * (1 - dy)),
        (ix0,     iy0 + 1, (1 - dx) * dy),
        (ix0 + 1, iy0 + 1, dx * dy),
    ]
    for ix, iy, w in corners:
        valid = (ix >= 0) & (ix < W) & (iy >= 0) & (iy < H)
        wv = jnp.where(valid, w, 0.0)
        tgt = jnp.clip(iy, 0, H - 1) * W + jnp.clip(ix, 0, W - 1)
        out = out.at[n_idx, c_idx, tgt[:, None]].add(frame * wv[:, None])
    return out.reshape(N, C, H, W)


def _reference(splatting_type, frame, flow, metric, eps=1e-7):
    if splatting_type == "summation":
        return _splat_reference(frame, flow)
    if splatting_type == "average":
        metric = jnp.ones((frame.shape[0], 1) + frame.shape[2:], frame.dtype)
    elif splatting_type == "softmax":
        metric = jnp.exp(metric)
    out = _splat_reference(
        jnp.concatenate([frame * metric, metric], axis=1), flow)
    return out[:, :-1] / (out[:, -1:] + eps)


if __name__ == "__main__":
    key = jax.random.PRNGKey(0)
    k1, k2, k3 = jax.random.split(key, 3)

    N, C, H, W = 2, 4, 16, 16
    frame = jax.random.normal(k1, (N, C, H, W), dtype=jnp.float32)
    flow = 3.0 * jax.random.normal(k2, (N, 2, H, W), dtype=jnp.float32)
    metric = jax.random.normal(k3, (N, 1, H, W), dtype=jnp.float32)

    # summation path
    out_sum = jax.block_until_ready(Splatting("summation")(frame, flow))
    ref_sum = _reference("summation", frame, flow, None)
    assert jnp.allclose(out_sum, ref_sum, atol=1e-4, rtol=1e-4)

    # softmax path (exercises importance-metric concat + normalization)
    out_soft = jax.block_until_ready(Splatting("softmax")(frame, flow, metric))
    ref_soft = _reference("softmax", frame, flow, metric)
    assert jnp.allclose(out_soft, ref_soft, atol=1e-4, rtol=1e-4)

    print("KERNEL_OK")
</pallas_src>

<mosaic_0001>
module attributes {stable_mosaic.version = 11 : i64} {
  func.func @_splat_kernel(%arg0: i32, %arg1: i32, %arg2: i32, %arg3: memref<4xi32, #tpu.memory_space<smem>>, %arg4: memref<1x4x256xf32, #tpu.memory_space<vmem>>, %arg5: memref<1x256x4xi32, #tpu.memory_space<vmem>>, %arg6: memref<1x256x4xf32, #tpu.memory_space<vmem>>, %arg7: memref<1x4x256xf32, #tpu.memory_space<vmem>>, %arg8: memref<4x256xf32, #tpu.memory_space<vmem>>) attributes {dimension_semantics = [#tpu.dimension_semantics<parallel>, #tpu.dimension_semantics<parallel>, #tpu.dimension_semantics<arbitrary>], iteration_bounds = array<i64: 2, 1, 1>, scalar_prefetch = 1 : i64, scratch_operands = 1 : i64, tpu.core_type = #tpu.core_type<tc>, window_params = [{transform_indices = @transform_0, window_bounds = array<i64: 1, 4, 256>}, {transform_indices = @transform_1, window_bounds = array<i64: 1, 256, 4>}, {transform_indices = @transform_2, window_bounds = array<i64: 1, 256, 4>}, {transform_indices = @transform_3, window_bounds = array<i64: 1, 4, 256>}]} {
    %c0_i32 = arith.constant 0 : i32
    %0 = arith.cmpi eq, %arg2, %c0_i32 : i32
    %1 = arith.extui %0 : i1 to i32
    %c0_i32_0 = arith.constant 0 : i32
    %2 = arith.cmpi ne, %1, %c0_i32_0 : i32
    scf.if %2 {
      %cst = arith.constant 0.000000e+00 : f32
      %21 = vector.broadcast %cst : f32 to vector<4x256xf32>
      %c0 = arith.constant 0 : index
      %c0_6 = arith.constant 0 : index
      %22 = vector.load %arg8[%c0, %c0_6] : memref<4x256xf32, #tpu.memory_space<vmem>>, vector<4x256xf32>
      tpu.vector_store %arg8[%c0, %c0_6], %21 {strides = array<i32>} : memref<4x256xf32, #tpu.memory_space<vmem>>, vector<4x256xf32>,
    } else {
    }
    %c256_i32 = arith.constant 256 : i32
    %3 = arith.muli %arg1, %c256_i32 : i32
    %c1_i32 = arith.constant 1 : i32
    %4 = arith.muli %arg0, %c1_i32 : i32
    %5 = arith.addi %4, %arg2 : i32
    %c2_i32 = arith.constant 2 : i32
    %6 = arith.muli %c2_i32, %5 : i32
    %7 = arith.index_cast %6 : i32 to index
    %8 = memref.load %arg3[%7] : memref<4xi32, #tpu.memory_space<smem>>
    %c1_i32_1 = arith.constant 1 : i32
    %9 = arith.addi %6, %c1_i32_1 : i32
    %10 = arith.index_cast %9 : i32 to index
    %11 = memref.load %arg3[%10] : memref<4xi32, #tpu.memory_space<smem>>
    %c256_i32_2 = arith.constant 256 : i32
    %12 = arith.addi %3, %c256_i32_2 : i32
    %13 = arith.cmpi slt, %8, %12 : i32
    %14 = arith.cmpi sge, %11, %3 : i32
    %15 = arith.andi %13, %14 : i1
    %16 = arith.extui %15 : i1 to i32
    %c0_i32_3 = arith.constant 0 : i32
    %17 = arith.cmpi ne, %16, %c0_i32_3 : i32
    scf.if %17 {
      %21 = tpu.iota {dimensions = array<i32: 1>} : vector<256x256xi32>
      %22 = vector.broadcast %3 : i32 to vector<256x256xi32>
      %23 = arith.addi %21, %22 : vector<256x256xi32>
      %c0 = arith.constant 0 : index
      %c0_6 = arith.constant 0 : index
      %c0_7 = arith.constant 0 : index
      %24 = vector.load %arg5[%c0, %c0_6, %c0_7] : memref<1x256x4xi32, #tpu.memory_space<vmem>>, vector<1x256x4xi32>
      %25 = vector.shape_cast %24 : vector<1x256x4xi32> to vector<256x4xi32>
      %c0_8 = arith.constant 0 : index
      %c0_9 = arith.constant 0 : index
      %c0_10 = arith.constant 0 : index
      %26 = vector.load %arg6[%c0_8, %c0_9, %c0_10] : memref<1x256x4xf32, #tpu.memory_space<vmem>>, vector<1x256x4xf32>
      %27 = vector.shape_cast %26 : vector<1x256x4xf32> to vector<256x4xf32>
      %28 = vector.extract_strided_slice %25 {offsets = [0, 0], sizes = [256, 1], strides = [1, 1]} : vector<256x4xi32> to vector<256x1xi32>
      %29 = vector.broadcast %28 : vector<256x1xi32> to vector<256x256xi32>
      %30 = arith.cmpi eq, %23, %29 : vector<256x256xi32>
      %31 = vector.extract_strided_slice %27 {offsets = [0, 0], sizes = [256, 1], strides = [1, 1]} : vector<256x4xf32> to vector<256x1xf32>
      %cst = arith.constant 0.000000e+00 : f32
      %32 = vector.shape_cast %31 : vector<256x1xf32> to vector<256x1xf32>
      %33 = vector.broadcast %32 : vector<256x1xf32> to vector<256x256xf32>
      %34 = vector.broadcast %cst : f32 to vector<256x256xf32>
      %35 = arith.select %30, %33, %34 : vector<256x256xi1>, vector<256x256xf32>
      %36 = vector.extract_strided_slice %25 {offsets = [0, 1], sizes = [256, 1], strides = [1, 1]} : vector<256x4xi32> to vector<256x1xi32>
      %37 = vector.broadcast %36 : vector<256x1xi32> to vector<256x256xi32>
      %38 = arith.cmpi eq, %23, %37 : vector<256x256xi32>
      %39 = vector.extract_strided_slice %27 {offsets = [0, 1], sizes = [256, 1], strides = [1, 1]} : vector<256x4xf32> to vector<256x1xf32>
      %cst_11 = arith.constant 0.000000e+00 : f32
      %40 = vector.shape_cast %39 : vector<256x1xf32> to vector<256x1xf32>
      %41 = vector.broadcast %40 : vector<256x1xf32> to vector<256x256xf32>
      %42 = vector.broadcast %cst_11 : f32 to vector<256x256xf32>
      %43 = arith.select %38, %41, %42 : vector<256x256xi1>, vector<256x256xf32>
      %44 = arith.addf %35, %43 : vector<256x256xf32>
      %45 = vector.extract_strided_slice %25 {offsets = [0, 2], sizes = [256, 1], strides = [1, 1]} : vector<256x4xi32> to vector<256x1xi32>
      %46 = vector.broadcast %45 : vector<256x1xi32> to vector<256x256xi32>
      %47 = arith.cmpi eq, %23, %46 : vector<256x256xi32>
      %48 = vector.extract_strided_slice %27 {offsets = [0, 2], sizes = [256, 1], strides = [1, 1]} : vector<256x4xf32> to vector<256x1xf32>
      %cst_12 = arith.constant 0.000000e+00 : f32
      %49 = vector.shape_cast %48 : vector<256x1xf32> to vector<256x1xf32>
      %50 = vector.broadcast %49 : vector<256x1xf32> to vector<256x256xf32>
      %51 = vector.broadcast %cst_12 : f32 to vector<256x256xf32>
      %52 = arith.select %47, %50, %51 : vector<256x256xi1>, vector<256x256xf32>
      %53 = arith.addf %44, %52 : vector<256x256xf32>
      %54 = vector.extract_strided_slice %25 {offsets = [0, 3], sizes = [256, 1], strides = [1, 1]} : vector<256x4xi32> to vector<256x1xi32>
      %55 = vector.broadcast %54 : vector<256x1xi32> to vector<256x256xi32>
      %56 = arith.cmpi eq, %23, %55 : vector<256x256xi32>
      %57 = vector.extract_strided_slice %27 {offsets = [0, 3], sizes = [256, 1], strides = [1, 1]} : vector<256x4xf32> to vector<256x1xf32>
      %cst_13 = arith.constant 0.000000e+00 : f32
      %58 = vector.shape_cast %57 : vector<256x1xf32> to vector<256x1xf32>
      %59 = vector.broadcast %58 : vector<256x1xf32> to vector<256x256xf32>
      %60 = vector.broadcast %cst_13 : f32 to vector<256x256xf32>
      %61 = arith.select %56, %59, %60 : vector<256x256xi1>, vector<256x256xf32>
      %62 = arith.addf %53, %61 : vector<256x256xf32>
      %c0_14 = arith.constant 0 : index
      %c0_15 = arith.constant 0 : index
      %63 = vector.load %arg8[%c0_14, %c0_15] : memref<4x256xf32, #tpu.memory_space<vmem>>, vector<4x256xf32>
      %c0_16 = arith.constant 0 : index
      %c0_17 = arith.constant 0 : index
      %c0_18 = arith.constant 0 : index
      %64 = vector.load %arg4[%c0_16, %c0_17, %c0_18] : memref<1x4x256xf32, #tpu.memory_space<vmem>>, vector<1x4x256xf32>
      %65 = vector.shape_cast %64 : vector<1x4x256xf32> to vector<4x256xf32>
      %cst_19 = arith.constant dense<0.000000e+00> : vector<4x256xf32>
      %66 = tpu.matmul %65, %62, %cst_19 {dimension_numbers = #tpu.dot_dimension_numbers<[1], [0], [0], [1], [0, 0, 1, 1], [], []>} : vector<4x256xf32>, vector<256x256xf32>, vector<4x256xf32> -> vector<4x256xf32>
      %67 = arith.addf %63, %66 : vector<4x256xf32>
      %c0_20 = arith.constant 0 : index
      %c0_21 = arith.constant 0 : index
      %68 = vector.load %arg8[%c0_20, %c0_21] : memref<4x256xf32, #tpu.memory_space<vmem>>, vector<4x256xf32>
      tpu.vector_store %arg8[%c0_20, %c0_21], %67 {strides = array<i32>} : memref<4x256xf32, #tpu.memory_space<vmem>>, vector<4x256xf32>,
    } else {
    }
    %c0_i32_4 = arith.constant 0 : i32
    %18 = arith.cmpi eq, %arg2, %c0_i32_4 : i32
    %19 = arith.extui %18 : i1 to i32
    %c0_i32_5 = arith.constant 0 : i32
    %20 = arith.cmpi ne, %19, %c0_i32_5 : i32
    scf.if %20 {
      %c0 = arith.constant 0 : index
      %c0_6 = arith.constant 0 : index
      %21 = vector.load %arg8[%c0, %c0_6] : memref<4x256xf32, #tpu.memory_space<vmem>>, vector<4x256xf32>
      %c0_7 = arith.constant 0 : index
      %c0_8 = arith.constant 0 : index
      %c0_9 = arith.constant 0 : index
      %22 = vector.load %arg7[%c0_7, %c0_8, %c0_9] : memref<1x4x256xf32, #tpu.memory_space<vmem>>, vector<1x4x256xf32>
      %23 = vector.shape_cast %22 : vector<1x4x256xf32> to vector<4x256xf32>
      %24 = vector.shape_cast %21 : vector<4x256xf32> to vector<1x4x256xf32>
      tpu.vector_store %arg7[%c0_7, %c0_8, %c0_9], %24 {strides = array<i32>} : memref<1x4x256xf32, #tpu.memory_space<vmem>>, vector<1x4x256xf32>,
    } else {
    }
    return
  }
  func.func @transform_0(%arg0: i32, %arg1: i32, %arg2: i32, %arg3: memref<4xi32, #tpu.memory_space<smem>>) -> (i32, i32, i32) {
    %c0_i32 = arith.constant 0 : i32
    %c0_i32_0 = arith.constant 0 : i32
    return %arg0, %c0_i32, %arg2 : i32, i32, i32
  }
  func.func @transform_1(%arg0: i32, %arg1: i32, %arg2: i32, %arg3: memref<4xi32, #tpu.memory_space<smem>>) -> (i32, i32, i32) {
    %c0_i32 = arith.constant 0 : i32
    %c0_i32_0 = arith.constant 0 : i32
    return %arg0, %arg2, %c0_i32 : i32, i32, i32
  }
  func.func @transform_2(%arg0: i32, %arg1: i32, %arg2: i32, %arg3: memref<4xi32, #tpu.memory_space<smem>>) -> (i32, i32, i32) {
    %c0_i32 = arith.constant 0 : i32
    %c0_i32_0 = arith.constant 0 : i32
    return %arg0, %arg2, %c0_i32 : i32, i32, i32
  }
  func.func @transform_3(%arg0: i32, %arg1: i32, %arg2: i32, %arg3: memref<4xi32, #tpu.memory_space<smem>>) -> (i32, i32, i32) {
    %c0_i32 = arith.constant 0 : i32
    %c0_i32_0 = arith.constant 0 : i32
    return %arg0, %c0_i32, %arg1 : i32, i32, i32
  }
}

</mosaic_0001>

<bundles_post_ra>
// kernel: tpu_custom_call.1
= control target key start
LH: loop header
LB: loop body
LE: loop exit
PB: predicated region body
PF: predicated region fallthrough
CT: control target
= control target key end

     0   :  { %s4630_s0 = inlined_call_operand.vmem [shape: s32[4], index: 0, kind: input, shape index: {}]   ;;  %s4631_s1 = inlined_call_operand.vmem [shape: f32[2,4,256], index: 1, kind: input, shape index: {}]   ;;  %s4632_s2 = inlined_call_operand.vmem [shape: s32[2,256,4], index: 2, kind: input, shape index: {}]   ;;  %s4633_s3 = inlined_call_operand.vmem [shape: f32[2,256,4], index: 3, kind: input, shape index: {}]   ;;  %s4634_s4 = inlined_call_operand.hbm [shape: f32[2,4,256], index: 4, kind: output, shape index: {}]  }
   0x1   :  { %s9_s17 = sshll.u32 %s4630_s0, 4  ;;  %s10_s17 = int_to_ptr.vmem [resolvable:$true] %s9_s17 }
   0x2   :  { %s2425_s18 = scalar_lea.vmem %s10_s17, 16  ;;  %p2430_p1 = scmp.lt.s32.totalorder %s10_s17, %s10_s17 }
   0x3   :  { %p2426_p0 = scmp.ne.s32.totalorder %s10_s17, %s2425_s18  ;;  %p2431_p2 = scmp.lt.s32.totalorder %s2425_s18, %s2425_s18 }
   0x5   :  { %p2432_p3 = por %p2431_p2, %p2430_p1 }
   0x7   :  { %p2433_p4 = pnand %p2432_p3, %p2426_p0 }
   0x9   :  { %2436 = shalt.err (!%p2433_p4)  }
   0xa   :  { %s2519_s19 = smov [#allocation4]  }
   0xb   :  { %12 = dma.vmem_to_smem %s10_s17, 16, %s2519_s19, [#allocation3] }
   0xc   :  { %2489 = dma.done.wait [#allocation3], 16 }
   0xd   :  { %2490 = vsyncadd [#allocation3], 4294967280 }
   0xe   :  { %14 = sfence }
   0xf   :  { %15 = vsyncpa [#allocation6], 0 }
  0x10   :  { %17 = vsyncpa [#allocation6 + $0x1], 0  ;;  %s2554_s20 = smov 0   ;;  %s2556_s21 = smov 0  }
  0x11   :  { %s2558_s0 = smov 0   ;;  %s2560_s22 = smov 0  }
  0x12   :  { %s2562_s23 = smov 0   ;;  %s2564_s24 = smov 0  }
  0x13 LB: > { %s2225_s25 = sadd.s32 4294967295, %s2517_s24   ;;  %s2226_s26 = sadd.s32 4294967294, %s2517_s24   ;;  %s2517_s24 = sphi %s2564_s24, %s23_s24   ;;  %s2513_s23 = sphi %s2562_s23, %s5226_s23   ;;  %s2509_s22 = sphi %s2560_s22, %s5225_s22   ;;  %s2505_s0 = sphi %s2558_s0, %s5224_s0   ;;  %s2501_s21 = sphi %s2556_s21, %s5223_s21   ;;  %s2497_s20 = sphi %s2554_s20, %s5222_s20  }
  0x14   : > { %s42_s27 = sadd.s32 1, %s2513_s23  ;;  %s135_s28 = sadd.s32 1, %s2505_s0 }
  0x15   : > { %p44_p5 = scmp.ge.s32.totalorder %s42_s27, 2  ;;  %p145_p6 = scmp.ne.s32.totalorder %s2505_s0, %s2501_s21 }
  0x16   : > { %p146_p7 = scmp.eq.s32.totalorder %s2225_s25, 1  ;;  %p151_p8 = scmp.ne.s32.totalorder %s2501_s21, %s2497_s20 }
  0x17   : > { %s5228_s27 = smov (%p44_p5, %s42_s27), 0  ;;  %p152_p10 = scmp.eq.s32.totalorder %s2226_s26, 1 }
  0x18   : > { %p2594_p9 = por %p146_p7, %p145_p6  ;;  %s130_s30 = ssub.s32 %s2513_s23, %s5228_s27 }
  0x19   : > { %p2229_p11 = scmp.ge.s32.totalorder %s2517_s24, 1  ;;  %p133_p12 = scmp.eq.s32.totalorder %s130_s30, 0 }
  0x1a   : > { %p2601_p13 = por %p152_p10, %p151_p8  ;;  %p209_p0 = scmp.lt.s32.totalorder %s2517_s24, 3 }
  0x1b   : > { %s2607_s6 = scalar_select %p133_p12, %s2505_s0, %s135_s28  }
  0x1c   : > { %p210_p1 = pnand %p2229_p11, %p209_p0 }
  0x1d   : > { %s4635_s7 = sand.u32 (!%p210_p1), 1, %s2501_s21   ;;  %p256_p2 = scmp.lt.s32.totalorder (!%p210_p1), %s2509_s22, 1  ;;  %v2520_v0 = vmov (!%p210_p1), 0.0  }
  0x1e   : > { %213 = sbr.rel (%p210_p1) target bundleno = 1022 (0x3fe), region = 32  ;;  %s2613_s8 = sshll.u32 (!%p210_p1), %s4635_s7, 3  ;;  %290 = vst [vmem:[#allocation2] sm:$0xff] (!%p210_p1), %v2520_v0 }
  0x1f   : > { %s2237_s9 = sshll.u32 (!%p210_p1), %s2509_s22, 1 }
  0x20   : > { %s294_s10 = sld [smem:[#allocation4 + %s2237_s9]] (!%p210_p1)  ;;  %s295_s12 = sadd.s32 (!%p210_p1), 1, %s2237_s9 }
  0x21   : > { %s296_s7 = sld [smem:[#allocation4 + %s295_s12]] (!%p210_p1)  ;;  %s254_s9 = scalar_lea.vmem (!%p210_p1), [#allocation5], %s2613_s8 }
  0x25   : > { %s257_s11 = scalar_select %p256_p2, %s2509_s22, 1 }
  0x26   : > { %p298_p3 = scmp.lt.s32.totalorder %s294_s10, 256 }
  0x27   : > { %s2243_s13 = sshll.u32 %s257_s11, 3  ;;  %s2244_s14 = sshll.u32 %s257_s11, 8 }
  0x28   : > { %s2620_s17 = scalar_lea.vmem %s4631_s1, %s2243_s13  ;;  %s2625_s25 = scalar_lea.vmem %s4632_s2, %s2244_s14 }
  0x29   : > { %s2630_s30 = scalar_lea.vmem %s4633_s3, %s2244_s14  ;;  %p299_p4 = scmp.ge.s32.totalorder %s296_s7, 0 }
  0x2b   : > { %p300_p5 = pnand %p299_p4, %p298_p3 }
  0x2d   : > { %303 = sbr.rel (%p300_p5) target bundleno = 997 (0x3e5), region = 40 }
  0x34   : > { %v2634_v1 = vld [vmem:[%s2625_s25 + $0x10] sm:$0xff]  ;;  %v2637_v2 = vld [vmem:[%s2625_s25] sm:$0xff]  ;;  %v2521_v3 = vmov 0   ;;  %v2642_v4 = vld [vmem:[%s2625_s25 + $0x18] sm:$0xff] }
  0x35   : > { %2373 = vset.pattern.permute.xlu1 %v2521_v3  ;;  %2372 = vset.pattern.permute.xlu0 %v2521_v3  ;;  %v2645_v5 = vld [vmem:[%s2625_s25 + $0x8] sm:$0xff]  ;;  %v2653_v7 = vld [vmem:[%s2625_s25 + $0x20] sm:$0xff]  ;;  %v2658_v8 = vld [vmem:[%s2625_s25 + $0x38] sm:$0xff] }
  0x36   : > { %381 = vperm.xlu1 %2373, %v2634_v1   ;;  %375 = vperm.xlu0 %2372, %v2637_v2   ;;  %v2650_v6 = vld [vmem:[%s2625_s25 + $0x28] sm:$0xff]  ;;  %v2661_v9 = vld [vmem:[%s2625_s25 + $0x30] sm:$0xff]  ;;  %v2669_v11 = vld [vmem:[%s2625_s25 + $0x40] sm:$0xff] }
  0x37   : > { %v2666_v10 = vld [vmem:[%s2625_s25 + $0x48] sm:$0xff]  ;;  %v2674_v12 = vld [vmem:[%s2625_s25 + $0x58] sm:$0xff]  ;;  %v2677_v13 = vld [vmem:[%s2625_s25 + $0x50] sm:$0xff] }
  0x38   : > { %v2682_v14 = vld [vmem:[%s2625_s25 + $0x68] sm:$0xff]  ;;  %v2685_v15 = vld [vmem:[%s2625_s25 + $0x60] sm:$0xff]  ;;  %v2690_v16 = vld [vmem:[%s2625_s25 + $0x78] sm:$0xff] }
  0x39   : > { %v2693_v17 = vld [vmem:[%s2625_s25 + $0x70] sm:$0xff]  ;;  %v2698_v18 = vld [vmem:[%s2625_s25 + $0x88] sm:$0xff]  ;;  %v2701_v19 = vld [vmem:[%s2625_s25 + $0x80] sm:$0xff] }
  0x3a   : > { %384 = vperm.xlu1 %2373, %v2642_v4   ;;  %378 = vperm.xlu0 %2372, %v2645_v5   ;;  %v2706_v20 = vld [vmem:[%s2625_s25 + $0x98] sm:$0xff]  ;;  %v2709_v21 = vld [vmem:[%s2625_s25 + $0x90] sm:$0xff]  ;;  %v2714_v22 = vld [vmem:[%s2625_s25 + $0xa8] sm:$0xff] }
  0x3b   : > { %v2717_v23 = vld [vmem:[%s2625_s25 + $0xa0] sm:$0xff]  ;;  %v2722_v24 = vld [vmem:[%s2625_s25 + $0xb8] sm:$0xff]  ;;  %v2725_v25 = vld [vmem:[%s2625_s25 + $0xb0] sm:$0xff] }
  0x3c   : > { %v2730_v26 = vld [vmem:[%s2625_s25 + $0xc8] sm:$0xff]  ;;  %v2733_v27 = vld [vmem:[%s2625_s25 + $0xc0] sm:$0xff]  ;;  %v2738_v28 = vld [vmem:[%s2625_s25 + $0xd8] sm:$0xff] }
  0x3d   : > { %v2741_v29 = vld [vmem:[%s2625_s25 + $0xd0] sm:$0xff]  ;;  %v2746_v30 = vld [vmem:[%s2625_s25 + $0xe8] sm:$0xff]  ;;  %v2749_v31 = vld [vmem:[%s2625_s25 + $0xe0] sm:$0xff] }
  0x3e   : > { %390 = vperm.xlu1 %2373, %v2650_v6   ;;  %387 = vperm.xlu0 %2372, %v2653_v7   ;;  %v2754_v32 = vld [vmem:[%s2625_s25 + $0xf8] sm:$0xff]  ;;  %v2757_v33 = vld [vmem:[%s2625_s25 + $0xf0] sm:$0xff]  ;;  %v2762_v34 = vld [vmem:[%s2630_s30 + $0x8] sm:$0xff] }
  0x3f   : > { %v2765_v35 = vld [vmem:[%s2630_s30] sm:$0xff]  ;;  %v2770_v36 = vld [vmem:[%s2630_s30 + $0x18] sm:$0xff]  ;;  %v2773_v37 = vld [vmem:[%s2630_s30 + $0x10] sm:$0xff] }
  0x40   : > { %v2778_v38 = vld [vmem:[%s2630_s30 + $0x28] sm:$0xff]  ;;  %v2781_v39 = vld [vmem:[%s2630_s30 + $0x20] sm:$0xff]  ;;  %v2786_v40 = vld [vmem:[%s2630_s30 + $0x38] sm:$0xff] }
  0x41   : > { %v2789_v41 = vld [vmem:[%s2630_s30 + $0x30] sm:$0xff]  ;;  %v2794_v42 = vld [vmem:[%s2630_s30 + $0x48] sm:$0xff]  ;;  %v2797_v43 = vld [vmem:[%s2630_s30 + $0x40] sm:$0xff] }
  0x42   : > { %396 = vperm.xlu1 %2373, %v2658_v8   ;;  %393 = vperm.xlu0 %2372, %v2661_v9   ;;  %v2802_v44 = vld [vmem:[%s2630_s30 + $0x58] sm:$0xff]  ;;  %v2805_v45 = vld [vmem:[%s2630_s30 + $0x50] sm:$0xff]  ;;  %v2810_v46 = vld [vmem:[%s2630_s30 + $0x68] sm:$0xff] }
  0x43   : > { %v2813_v47 = vld [vmem:[%s2630_s30 + $0x60] sm:$0xff]  ;;  %v2818_v48 = vld [vmem:[%s2630_s30 + $0x78] sm:$0xff]  ;;  %v2821_v49 = vld [vmem:[%s2630_s30 + $0x70] sm:$0xff] }
  0x44   : > { %4832 = vst [vmem:[#allocation9_spill] sm:$0xff] %v2821_v49  ;;  %v2826_v50 = vld [vmem:[%s2630_s30 + $0x88] sm:$0xff]  ;;  %v2829_v51 = vld [vmem:[%s2630_s30 + $0x80] sm:$0xff]  ;;  %v2834_v52 = vld [vmem:[%s2630_s30 + $0x98] sm:$0xff] }
  0x45   : > { %4833 = vst [vmem:[#allocation10_spill] sm:$0xff] %v2829_v51  ;;  %v2837_v53 = vld [vmem:[%s2630_s30 + $0x90] sm:$0xff]  ;;  %v2842_v54 = vld [vmem:[%s2630_s30 + $0xa8] sm:$0xff]  ;;  %v2845_v55 = vld [vmem:[%s2630_s30 + $0xa0] sm:$0xff] }
  0x46   : > { %402 = vperm.xlu1 %2373, %v2666_v10   ;;  %399 = vperm.xlu0 %2372, %v2669_v11   ;;  %4834 = vst [vmem:[#allocation11_spill] sm:$0xff] %v2837_v53  ;;  %4835 = vst [vmem:[#allocation12_spill] sm:$0xff] %v2845_v55  ;;  %v2850_v56 = vld [vmem:[%s2630_s30 + $0xb8] sm:$0xff]  ;;  %v2853_v57 = vld [vmem:[%s2630_s30 + $0xb0] sm:$0xff] }
  0x47   : > { %4836 = vst [vmem:[#allocation13_spill] sm:$0xff] %v2853_v57  ;;  %v2858_v58 = vld [vmem:[%s2630_s30 + $0xc8] sm:$0xff]  ;;  %v2861_v59 = vld [vmem:[%s2630_s30 + $0xc0] sm:$0xff]  ;;  %v2866_v60 = vld [vmem:[%s2630_s30 + $0xd8] sm:$0xff] }
  0x48   : > { %4837 = vst [vmem:[#allocation14_spill] sm:$0xff] %v2858_v58  ;;  %4838 = vst [vmem:[#allocation15_spill] sm:$0xff] %v2861_v59  ;;  %v2869_v61 = vld [vmem:[%s2630_s30 + $0xd0] sm:$0xff]  ;;  %v2874_v62 = vld [vmem:[%s2630_s30 + $0xe8] sm:$0xff] }
  0x49   : > { %4839 = vst [vmem:[#allocation16_spill] sm:$0xff] %v2866_v60  ;;  %4840 = vst [vmem:[#allocation17_spill] sm:$0xff] %v2869_v61  ;;  %v2877_v63 = vld [vmem:[%s2630_s30 + $0xe0] sm:$0xff]  ;;  %v2882_v0 = vld [vmem:[%s2630_s30 + $0xf8] sm:$0xff] }
  0x4a   : > { %408 = vperm.xlu1 %2373, %v2674_v12   ;;  %405 = vperm.xlu0 %2372, %v2677_v13   ;;  %4841 = vst [vmem:[#allocation18_spill] sm:$0xff] %v2874_v62  ;;  %4842 = vst [vmem:[#allocation19_spill] sm:$0xff] %v2877_v63  ;;  %v2885_v3 = vld [vmem:[%s2630_s30 + $0xf0] sm:$0xff] }
  0x4b   : > { %4843 = vst [vmem:[#allocation20_spill] sm:$0xff] %v2882_v0 }
  0x4e   : > { %414 = vperm.xlu1 %2373, %v2682_v14   ;;  %411 = vperm.xlu0 %2372, %v2685_v15  }
  0x52   : > { %420 = vperm.xlu1 %2373, %v2690_v16   ;;  %417 = vperm.xlu0 %2372, %v2693_v17  }
  0x56   : > { %426 = vperm.xlu1 %2373, %v2698_v18   ;;  %423 = vperm.xlu0 %2372, %v2701_v19  }
  0x5a   : > { %432 = vperm.xlu1 %2373, %v2706_v20   ;;  %429 = vperm.xlu0 %2372, %v2709_v21  }
  0x5e   : > { %438 = vperm.xlu1 %2373, %v2714_v22   ;;  %435 = vperm.xlu0 %2372, %v2717_v23  }
  0x62   : > { %444 = vperm.xlu1 %2373, %v2722_v24   ;;  %441 = vperm.xlu0 %2372, %v2725_v25  }
  0x66   : > { %450 = vperm.xlu1 %2373, %v2730_v26   ;;  %447 = vperm.xlu0 %2372, %v2733_v27  }
  0x6a   : > { %456 = vperm.xlu1 %2373, %v2738_v28   ;;  %453 = vperm.xlu0 %2372, %v2741_v29  }
  0x6e   : > { %462 = vperm.xlu1 %2373, %v2746_v30   ;;  %459 = vperm.xlu0 %2372, %v2749_v31  }
  0x72   : > { %468 = vperm.xlu1 %2373, %v2754_v32   ;;  %465 = vperm.xlu0 %2372, %v2757_v33  }
  0x76   : > { %541 = vperm.xlu1 %2373, %v2762_v34   ;;  %536 = vperm.xlu0 %2372, %v2765_v35  }
  0x7a   : > { %551 = vperm.xlu1 %2373, %v2770_v36   ;;  %546 = vperm.xlu0 %2372, %v2773_v37  }
  0x7e   : > { %561 = vperm.xlu1 %2373, %v2778_v38   ;;  %556 = vperm.xlu0 %2372, %v2781_v39  }
  0x82   : > { %571 = vperm.xlu1 %2373, %v2786_v40   ;;  %566 = vperm.xlu0 %2372, %v2789_v41  }
  0x86   : > { %581 = vperm.xlu1 %2373, %v2794_v42   ;;  %576 = vperm.xlu0 %2372, %v2797_v43  }
  0x8a   : > { %591 = vperm.xlu1 %2373, %v2802_v44   ;;  %586 = vperm.xlu0 %2372, %v2805_v45  }
  0x8e   : > { %601 = vperm.xlu1 %2373, %v2810_v46   ;;  %596 = vperm.xlu0 %2372, %v2813_v47  }
  0x92   : > { %611 = vperm.xlu1 %2373, %v2818_v48   ;;  %606 = vperm.xlu0 %2372, %v2821_v49  }
  0x96   : > { %621 = vperm.xlu1 %2373, %v2826_v50   ;;  %616 = vperm.xlu0 %2372, %v2829_v51  }
  0x9a   : > { %631 = vperm.xlu1 %2373, %v2834_v52   ;;  %626 = vperm.xlu0 %2372, %v2837_v53  }
  0x9e   : > { %641 = vperm.xlu1 %2373, %v2842_v54   ;;  %636 = vperm.xlu0 %2372, %v2845_v55  }
  0xa2   : > { %651 = vperm.xlu1 %2373, %v2850_v56   ;;  %646 = vperm.xlu0 %2372, %v2853_v57  }
  0xa6   : > { %661 = vperm.xlu1 %2373, %v2858_v58   ;;  %656 = vperm.xlu0 %2372, %v2861_v59  }
  0xaa   : > { %671 = vperm.xlu1 %2373, %v2866_v60   ;;  %666 = vperm.xlu0 %2372, %v2869_v61   ;;  %v2522_v61 = vmov 1  }
  0xae   : > { %681 = vperm.xlu1 %2373, %v2874_v62   ;;  %676 = vperm.xlu0 %2372, %v2877_v63  }
  0xb2   : > { %691 = vperm.xlu1 %2373, %v2882_v0   ;;  %686 = vperm.xlu0 %2372, %v2885_v3  }
  0xb5   : > { %v2889_v58 = vpop.permute.xlu1 %381  ;;  %v2891_v60 = vpop.permute.xlu0 %375 }
  0xb6   : > { %4844 = vst [vmem:[#allocation21_spill] sm:$0xff] %v2889_v58  ;;  %4845 = vst [vmem:[#allocation22_spill] sm:$0xff] %v2891_v60  ;;  %2375 = vset.pattern.permute.xlu1 %v2522_v61  ;;  %2374 = vset.pattern.permute.xlu0 %v2522_v61 }
  0xb7   : > { %762 = vperm.xlu1 %2375, %v2645_v5   ;;  %759 = vperm.xlu0 %2374, %v2637_v2  }
  0xb9   : > { %v2895_v62 = vpop.permute.xlu1 %384  ;;  %v2897_v63 = vpop.permute.xlu0 %378 }
  0xba   : > { %4846 = vst [vmem:[#allocation23_spill] sm:$0xff] %v2895_v62  ;;  %4847 = vst [vmem:[#allocation24_spill] sm:$0xff] %v2897_v63 }
  0xbb   : > { %765 = vperm.xlu1 %2375, %v2634_v1   ;;  %768 = vperm.xlu0 %2374, %v2642_v4  }
  0xbd   : > { %v2901_v0 = vpop.permute.xlu1 %390  ;;  %v2903_v58 = vpop.permute.xlu0 %387 }
  0xbe   : > { %4848 = vst [vmem:[#allocation25_spill] sm:$0xff] %v2901_v0  ;;  %4849 = vst [vmem:[#allocation26_spill] sm:$0xff] %v2903_v58 }
  0xbf   : > { %771 = vperm.xlu1 %2375, %v2653_v7   ;;  %774 = vperm.xlu0 %2374, %v2650_v6  }
  0xc1   : > { %v2907_v61 = vpop.permute.xlu1 %396  ;;  %v2909_v60 = vpop.permute.xlu0 %393 }
  0xc2   : > { %4850 = vst [vmem:[#allocation27_spill] sm:$0xff] %v2907_v61  ;;  %4851 = vst [vmem:[#allocation28_spill] sm:$0xff] %v2909_v60 }
  0xc3   : > { %777 = vperm.xlu1 %2375, %v2661_v9   ;;  %780 = vperm.xlu0 %2374, %v2658_v8  }
  0xc5   : > { %v2913_v63 = vpop.permute.xlu1 %402  ;;  %v2915_v62 = vpop.permute.xlu0 %399 }
  0xc6   : > { %4852 = vst [vmem:[#allocation29_spill] sm:$0xff] %v2913_v63  ;;  %4853 = vst [vmem:[#allocation30_spill] sm:$0xff] %v2915_v62 }
  0xc7   : > { %783 = vperm.xlu1 %2375, %v2669_v11   ;;  %786 = vperm.xlu0 %2374, %v2666_v10  }
  0xc9   : > { %v2919_v58 = vpop.permute.xlu1 %408  ;;  %v2921_v0 = vpop.permute.xlu0 %405 }
  0xca   : > { %4854 = vst [vmem:[#allocation31_spill] sm:$0xff] %v2919_v58  ;;  %4855 = vst [vmem:[#allocation32_spill] sm:$0xff] %v2921_v0 }
  0xcb   : > { %789 = vperm.xlu1 %2375, %v2677_v13   ;;  %792 = vperm.xlu0 %2374, %v2674_v12  }
  0xcd   : > { %v2925_v60 = vpop.permute.xlu1 %414  ;;  %v2927_v61 = vpop.permute.xlu0 %411 }
  0xce   : > { %4856 = vst [vmem:[#allocation33_spill] sm:$0xff] %v2925_v60  ;;  %4857 = vst [vmem:[#allocation34_spill] sm:$0xff] %v2927_v61 }
  0xcf   : > { %795 = vperm.xlu1 %2375, %v2685_v15   ;;  %798 = vperm.xlu0 %2374, %v2682_v14  }
  0xd1   : > { %v2931_v62 = vpop.permute.xlu1 %420  ;;  %v2933_v63 = vpop.permute.xlu0 %417 }
  0xd2   : > { %4858 = vst [vmem:[#allocation35_spill] sm:$0xff] %v2931_v62  ;;  %4859 = vst [vmem:[#allocation36_spill] sm:$0xff] %v2933_v63 }
  0xd3   : > { %801 = vperm.xlu1 %2375, %v2693_v17   ;;  %804 = vperm.xlu0 %2374, %v2690_v16  }
  0xd5   : > { %v2937_v0 = vpop.permute.xlu1 %426  ;;  %v2939_v58 = vpop.permute.xlu0 %423 }
  0xd6   : > { %4860 = vst [vmem:[#allocation37_spill] sm:$0xff] %v2937_v0  ;;  %4861 = vst [vmem:[#allocation38_spill] sm:$0xff] %v2939_v58 }
  0xd7   : > { %807 = vperm.xlu1 %2375, %v2701_v19   ;;  %810 = vperm.xlu0 %2374, %v2698_v18  }
  0xd9   : > { %v2943_v61 = vpop.permute.xlu1 %432  ;;  %v2945_v60 = vpop.permute.xlu0 %429 }
  0xda   : > { %4862 = vst [vmem:[#allocation39_spill] sm:$0xff] %v2943_v61  ;;  %4863 = vst [vmem:[#allocation40_spill] sm:$0xff] %v2945_v60 }
  0xdb   : > { %813 = vperm.xlu1 %2375, %v2709_v21   ;;  %816 = vperm.xlu0 %2374, %v2706_v20  }
  0xdd   : > { %v2949_v62 = vpop.permute.xlu1 %438  ;;  %v2951_v63 = vpop.permute.xlu0 %435 }
  0xde   : > { %4864 = vst [vmem:[#allocation41_spill] sm:$0xff] %v2949_v62  ;;  %4865 = vst [vmem:[#allocation42_spill] sm:$0xff] %v2951_v63 }
  0xdf   : > { %819 = vperm.xlu1 %2375, %v2717_v23   ;;  %822 = vperm.xlu0 %2374, %v2714_v22  }
  0xe1   : > { %v2955_v0 = vpop.permute.xlu1 %444  ;;  %v2957_v58 = vpop.permute.xlu0 %441 }
  0xe2   : > { %4866 = vst [vmem:[#allocation43_spill] sm:$0xff] %v2955_v0  ;;  %4867 = vst [vmem:[#allocation44_spill] sm:$0xff] %v2957_v58 }
  0xe3   : > { %825 = vperm.xlu1 %2375, %v2725_v25   ;;  %828 = vperm.xlu0 %2374, %v2722_v24  }
  0xe5   : > { %v2961_v61 = vpop.permute.xlu1 %450  ;;  %v2963_v60 = vpop.permute.xlu0 %447 }
  0xe6   : > { %4868 = vst [vmem:[#allocation45_spill] sm:$0xff] %v2961_v61  ;;  %4869 = vst [vmem:[#allocation46_spill] sm:$0xff] %v2963_v60 }
  0xe7   : > { %831 = vperm.xlu1 %2375, %v2733_v27   ;;  %834 = vperm.xlu0 %2374, %v2730_v26  }
  0xe9   : > { %v2967_v62 = vpop.permute.xlu1 %456  ;;  %v2969_v63 = vpop.permute.xlu0 %453 }
  0xea   : > { %4870 = vst [vmem:[#allocation47_spill] sm:$0xff] %v2967_v62  ;;  %4871 = vst [vmem:[#allocation48_spill] sm:$0xff] %v2969_v63 }
  0xeb   : > { %837 = vperm.xlu1 %2375, %v2741_v29   ;;  %840 = vperm.xlu0 %2374, %v2738_v28  }
  0xed   : > { %v2973_v0 = vpop.permute.xlu1 %462  ;;  %v2975_v58 = vpop.permute.xlu0 %459 }
  0xee   : > { %4872 = vst [vmem:[#allocation49_spill] sm:$0xff] %v2973_v0  ;;  %4873 = vst [vmem:[#allocation50_spill] sm:$0xff] %v2975_v58 }
  0xef   : > { %843 = vperm.xlu1 %2375, %v2749_v31   ;;  %846 = vperm.xlu0 %2374, %v2746_v30  }
  0xf1   : > { %v2979_v61 = vpop.permute.xlu1 %468  ;;  %v2981_v60 = vpop.permute.xlu0 %465 }
  0xf2   : > { %4874 = vst [vmem:[#allocation51_spill] sm:$0xff] %v2979_v61  ;;  %4875 = vst [vmem:[#allocation52_spill] sm:$0xff] %v2981_v60 }
  0xf3   : > { %849 = vperm.xlu1 %2375, %v2757_v33   ;;  %852 = vperm.xlu0 %2374, %v2754_v32  }
  0xf5   : > { %v2985_v62 = vpop.permute.xlu1 %541  ;;  %v2987_v63 = vpop.permute.xlu0 %536 }
  0xf6   : > { %4876 = vst [vmem:[#allocation53_spill] sm:$0xff] %v2985_v62  ;;  %4877 = vst [vmem:[#allocation54_spill] sm:$0xff] %v2987_v63 }
  0xf7   : > { %919 = vperm.xlu1 %2375, %v2765_v35   ;;  %923 = vperm.xlu0 %2374, %v2762_v34  }
  0xf9   : > { %v2991_v0 = vpop.permute.xlu1 %551  ;;  %v2993_v58 = vpop.permute.xlu0 %546 }
  0xfa   : > { %4878 = vst [vmem:[#allocation55_spill] sm:$0xff] %v2991_v0  ;;  %4879 = vst [vmem:[#allocation56_spill] sm:$0xff] %v2993_v58 }
  0xfb   : > { %927 = vperm.xlu1 %2375, %v2773_v37   ;;  %931 = vperm.xlu0 %2374, %v2770_v36  }
  0xfd   : > { %v2997_v61 = vpop.permute.xlu1 %561  ;;  %v2999_v60 = vpop.permute.xlu0 %556 }
  0xfe   : > { %4880 = vst [vmem:[#allocation57_spill] sm:$0xff] %v2997_v61  ;;  %4881 = vst [vmem:[#allocation58_spill] sm:$0xff] %v2999_v60 }
  0xff   : > { %935 = vperm.xlu1 %2375, %v2781_v39   ;;  %939 = vperm.xlu0 %2374, %v2778_v38  }
 0x101   : > { %v3003_v63 = vpop.permute.xlu1 %571  ;;  %v3005_v62 = vpop.permute.xlu0 %566 }
 0x102   : > { %4882 = vst [vmem:[#allocation59_spill] sm:$0xff] %v3003_v63  ;;  %4883 = vst [vmem:[#allocation60_spill] sm:$0xff] %v3005_v62 }
 0x103   : > { %943 = vperm.xlu1 %2375, %v2789_v41   ;;  %947 = vperm.xlu0 %2374, %v2786_v40  }
 0x105   : > { %v3009_v58 = vpop.permute.xlu1 %581  ;;  %v3011_v0 = vpop.permute.xlu0 %576 }
 0x106   : > { %4884 = vst [vmem:[#allocation61_spill] sm:$0xff] %v3009_v58  ;;  %4885 = vst [vmem:[#allocation62_spill] sm:$0xff] %v3011_v0 }
 0x107   : > { %951 = vperm.xlu1 %2375, %v2797_v43   ;;  %955 = vperm.xlu0 %2374, %v2794_v42  }
 0x109   : > { %v3015_v60 = vpop.permute.xlu1 %591  ;;  %v3017_v61 = vpop.permute.xlu0 %586 }
 0x10a   : > { %4886 = vst [vmem:[#allocation63_spill] sm:$0xff] %v3015_v60  ;;  %4887 = vst [vmem:[#allocation64_spill] sm:$0xff] %v3017_v61 }
 0x10b   : > { %959 = vperm.xlu1 %2375, %v2805_v45   ;;  %963 = vperm.xlu0 %2374, %v2802_v44  }
 0x10d   : > { %v3021_v62 = vpop.permute.xlu1 %601  ;;  %v3023_v63 = vpop.permute.xlu0 %596 }
 0x10e   : > { %4888 = vst [vmem:[#allocation65_spill] sm:$0xff] %v3021_v62  ;;  %4889 = vst [vmem:[#allocation66_spill] sm:$0xff] %v3023_v63 }
 0x10f   : > { %967 = vperm.xlu1 %2375, %v2813_v47   ;;  %971 = vperm.xlu0 %2374, %v2810_v46  }
 0x111   : > { %v3027_v0 = vpop.permute.xlu1 %611  ;;  %v3029_v58 = vpop.permute.xlu0 %606 }
 0x112   : > { %4890 = vst [vmem:[#allocation67_spill] sm:$0xff] %v3027_v0  ;;  %4891 = vst [vmem:[#allocation68_spill] sm:$0xff] %v3029_v58 }
 0x113   : > { %975 = vperm.xlu1 %2375, %v2821_v49   ;;  %979 = vperm.xlu0 %2374, %v2818_v48   ;;  %v4723_v49 = vmov 2  }
 0x115   : > { %v3033_v61 = vpop.permute.xlu1 %621  ;;  %v3035_v60 = vpop.permute.xlu0 %616 }
 0x116   : > { %4892 = vst [vmem:[#allocation69_spill] sm:$0xff] %v3033_v61  ;;  %4893 = vst [vmem:[#allocation70_spill] sm:$0xff] %v3035_v60 }
 0x117   : > { %983 = vperm.xlu1 %2375, %v2829_v51   ;;  %987 = vperm.xlu0 %2374, %v2826_v50   ;;  %v4909_v51 = vld [vmem:[#allocation19_spill] sm:$0xff] }
 0x119   : > { %v3039_v63 = vpop.permute.xlu1 %631  ;;  %v3041_v62 = vpop.permute.xlu0 %626 }
 0x11a   : > { %4894 = vst [vmem:[#allocation71_spill] sm:$0xff] %v3039_v63  ;;  %4895 = vst [vmem:[#allocation72_spill] sm:$0xff] %v3041_v62 }
 0x11b   : > { %991 = vperm.xlu1 %2375, %v2837_v53   ;;  %995 = vperm.xlu0 %2374, %v2834_v52   ;;  %v4905_v53 = vld [vmem:[#allocation17_spill] sm:$0xff] }
 0x11d   : > { %v3045_v58 = vpop.permute.xlu1 %641  ;;  %v3047_v0 = vpop.permute.xlu0 %636 }
 0x11e   : > { %4896 = vst [vmem:[#allocation73_spill] sm:$0xff] %v3045_v58  ;;  %4897 = vst [vmem:[#allocation74_spill] sm:$0xff] %v3047_v0  ;;  %v4902_v58 = vld [vmem:[#allocation14_spill] sm:$0xff] }
 0x11f   : > { %999 = vperm.xlu1 %2375, %v2845_v55   ;;  %1003 = vperm.xlu0 %2374, %v2842_v54  }
 0x121   : > { %v3051_v60 = vpop.permute.xlu1 %651  ;;  %v3053_v61 = vpop.permute.xlu0 %646 }
 0x122   : > { %4898 = vst [vmem:[#allocation75_spill] sm:$0xff] %v3051_v60  ;;  %4899 = vst [vmem:[#allocation76_spill] sm:$0xff] %v3053_v61  ;;  %v4906_v60 = vld [vmem:[#allocation16_spill] sm:$0xff] }
 0x123   : > { %1007 = vperm.xlu1 %2375, %v2853_v57   ;;  %1011 = vperm.xlu0 %2374, %v2850_v56  }
 0x125   : > { %v3057_v62 = vpop.permute.xlu1 %661  ;;  %v3059_v63 = vpop.permute.xlu0 %656 }
 0x126   : > { %4900 = vst [vmem:[#allocation77_spill] sm:$0xff] %v3057_v62  ;;  %4901 = vst [vmem:[#allocation78_spill] sm:$0xff] %v3059_v63  ;;  %v4910_v62 = vld [vmem:[#allocation18_spill] sm:$0xff] }
 0x127   : > { %1015 = vperm.xlu1 %2375, %v2861_v59   ;;  %1019 = vperm.xlu0 %2374, %v4902_v58  }
 0x129   : > { %v3063_v0 = vpop.permute.xlu1 %671  ;;  %v3065_v55 = vpop.permute.xlu0 %666 }
 0x12a   : > { %4903 = vst [vmem:[#allocation14_spill] sm:$0xff] %v3063_v0  ;;  %4904 = vst [vmem:[#allocation79_spill] sm:$0xff] %v3065_v55  ;;  %v4913_v0 = vld [vmem:[#allocation20_spill] sm:$0xff] }
 0x12b   : > { %1023 = vperm.xlu1 %2375, %v4905_v53   ;;  %1027 = vperm.xlu0 %2374, %v4906_v60  }
 0x12d   : > { %v3069_v61 = vpop.permute.xlu1 %681  ;;  %v3071_v57 = vpop.permute.xlu0 %676 }
 0x12e   : > { %4907 = vst [vmem:[#allocation16_spill] sm:$0xff] %v3069_v61  ;;  %4908 = vst [vmem:[#allocation80_spill] sm:$0xff] %v3071_v57 }
 0x12f   : > { %1031 = vperm.xlu1 %2375, %v4909_v51   ;;  %1035 = vperm.xlu0 %2374, %v4910_v62  }
 0x131   : > { %v3075_v63 = vpop.permute.xlu1 %691  ;;  %v3077_v59 = vpop.permute.xlu0 %686 }
 0x132   : > { %4911 = vst [vmem:[#allocation19_spill] sm:$0xff] %v3075_v63  ;;  %4912 = vst [vmem:[#allocation18_spill] sm:$0xff] %v3077_v59 }
 0x133   : > { %1039 = vperm.xlu1 %2375, %v2885_v3   ;;  %1043 = vperm.xlu0 %2374, %v4913_v0  }
 0x136   : > { %v3081_v55 = vpop.permute.xlu1 %762  ;;  %v3083_v53 = vpop.permute.xlu0 %759 }
 0x137   : > { %4914 = vst [vmem:[#allocation20_spill] sm:$0xff] %v3083_v53  ;;  %2376 = vset.pattern.permute.xlu1 %v4723_v49  ;;  %2377 = vset.pattern.permute.xlu0 %v4723_v49 }
 0x138   : > { %1175 = vperm.xlu1 %2376, %v2637_v2   ;;  %1178 = vperm.xlu0 %2377, %v2645_v5  }
 0x13a   : > { %v3089_v63 = vpop.permute.xlu1 %765  ;;  %v3091_v59 = vpop.permute.xlu0 %768 }
 0x13b   : > { %4915 = vst [vmem:[#allocation81_spill] sm:$0xff] %v3089_v63  ;;  %4916 = vst [vmem:[#allocation82_spill] sm:$0xff] %v3091_v59 }
 0x13c   : > { %1181 = vperm.xlu1 %2376, %v2634_v1   ;;  %1187 = vperm.xlu0 %2377, %v2653_v7  }
 0x13e   : > { %v3095_v57 = vpop.permute.xlu1 %771  ;;  %v3097_v61 = vpop.permute.xlu0 %774 }
 0x13f   : > { %4917 = vst [vmem:[#allocation83_spill] sm:$0xff] %v3095_v57  ;;  %4918 = vst [vmem:[#allocation84_spill] sm:$0xff] %v3097_v61 }
 0x140   : > { %1184 = vperm.xlu1 %2376, %v2642_v4   ;;  %1193 = vperm.xlu0 %2377, %v2661_v9  }
 0x142   : > { %v3101_v49 = vpop.permute.xlu1 %777  ;;  %v3103_v53 = vpop.permute.xlu0 %780 }
 0x143   : > { %4919 = vst [vmem:[#allocation85_spill] sm:$0xff] %v3101_v49  ;;  %4920 = vst [vmem:[#allocation86_spill] sm:$0xff] %v3103_v53 }
 0x144   : > { %1190 = vperm.xlu1 %2376, %v2650_v6   ;;  %1199 = vperm.xlu0 %2377, %v2669_v11  }
 0x146   : > { %v3107_v59 = vpop.permute.xlu1 %783  ;;  %v3109_v63 = vpop.permute.xlu0 %786 }
 0x147   : > { %4921 = vst [vmem:[#allocation87_spill] sm:$0xff] %v3107_v59  ;;  %4922 = vst [vmem:[#allocation88_spill] sm:$0xff] %v3109_v63 }
 0x148   : > { %1196 = vperm.xlu1 %2376, %v2658_v8   ;;  %1205 = vperm.xlu0 %2377, %v2677_v13  }
 0x14a   : > { %v3113_v61 = vpop.permute.xlu1 %789  ;;  %v3115_v57 = vpop.permute.xlu0 %792 }
 0x14b   : > { %4923 = vst [vmem:[#allocation89_spill] sm:$0xff] %v3113_v61  ;;  %4924 = vst [vmem:[#allocation90_spill] sm:$0xff] %v3115_v57 }
 0x14c   : > { %1202 = vperm.xlu1 %2376, %v2666_v10   ;;  %1211 = vperm.xlu0 %2377, %v2685_v15  }
 0x14e   : > { %v3119_v53 = vpop.permute.xlu1 %795  ;;  %v3121_v49 = vpop.permute.xlu0 %798 }
 0x14f   : > { %4925 = vst [vmem:[#allocation91_spill] sm:$0xff] %v3119_v53  ;;  %4926 = vst [vmem:[#allocation92_spill] sm:$0xff] %v3121_v49 }
 0x150   : > { %1208 = vperm.xlu1 %2376, %v2674_v12   ;;  %1217 = vperm.xlu0 %2377, %v2693_v17  }
 0x152   : > { %v3125_v63 = vpop.permute.xlu1 %801  ;;  %v3127_v59 = vpop.permute.xlu0 %804 }
 0x153   : > { %4927 = vst [vmem:[#allocation93_spill] sm:$0xff] %v3125_v63  ;;  %4928 = vst [vmem:[#allocation94_spill] sm:$0xff] %v3127_v59 }
 0x154   : > { %1214 = vperm.xlu1 %2376, %v2682_v14   ;;  %1223 = vperm.xlu0 %2377, %v2701_v19  }
 0x156   : > { %v3131_v57 = vpop.permute.xlu1 %807  ;;  %v3133_v61 = vpop.permute.xlu0 %810 }
 0x157   : > { %4929 = vst [vmem:[#allocation95_spill] sm:$0xff] %v3131_v57  ;;  %4930 = vst [vmem:[#allocation96_spill] sm:$0xff] %v3133_v61 }
 0x158   : > { %1220 = vperm.xlu1 %2376, %v2690_v16   ;;  %1229 = vperm.xlu0 %2377, %v2709_v21  }
 0x15a   : > { %v3137_v49 = vpop.permute.xlu1 %813  ;;  %v3139_v53 = vpop.permute.xlu0 %816 }
 0x15b   : > { %4931 = vst [vmem:[#allocation97_spill] sm:$0xff] %v3137_v49  ;;  %4932 = vst [vmem:[#allocation98_spill] sm:$0xff] %v3139_v53 }
 0x15c   : > { %1226 = vperm.xlu1 %2376, %v2698_v18   ;;  %1235 = vperm.xlu0 %2377, %v2717_v23  }
 0x15e   : > { %v3143_v63 = vpop.permute.xlu1 %819  ;;  %v3145_v59 = vpop.permute.xlu0 %822 }
 0x15f   : > { %4933 = vst [vmem:[#allocation99_spill] sm:$0xff] %v3143_v63  ;;  %4934 = vst [vmem:[#allocation100_spill] sm:$0xff] %v3145_v59 }
 0x160   : > { %1232 = vperm.xlu1 %2376, %v2706_v20   ;;  %1241 = vperm.xlu0 %2377, %v2725_v25  }
 0x162   : > { %v3149_v57 = vpop.permute.xlu1 %825  ;;  %v3151_v61 = vpop.permute.xlu0 %828 }
 0x163   : > { %4935 = vst [vmem:[#allocation101_spill] sm:$0xff] %v3149_v57  ;;  %4936 = vst [vmem:[#allocation102_spill] sm:$0xff] %v3151_v61 }
 0x164   : > { %1238 = vperm.xlu1 %2376, %v2714_v22   ;;  %1247 = vperm.xlu0 %2377, %v2733_v27  }
 0x166   : > { %v3155_v49 = vpop.permute.xlu1 %831  ;;  %v3157_v53 = vpop.permute.xlu0 %834 }
 0x167   : > { %4937 = vst [vmem:[#allocation103_spill] sm:$0xff] %v3155_v49  ;;  %4938 = vst [vmem:[#allocation104_spill] sm:$0xff] %v3157_v53 }
 0x168   : > { %1244 = vperm.xlu1 %2376, %v2722_v24   ;;  %1253 = vperm.xlu0 %2377, %v2741_v29  }
 0x16a   : > { %v3161_v63 = vpop.permute.xlu1 %837  ;;  %v3163_v59 = vpop.permute.xlu0 %840 }
 0x16b   : > { %4939 = vst [vmem:[#allocation105_spill] sm:$0xff] %v3161_v63  ;;  %4940 = vst [vmem:[#allocation106_spill] sm:$0xff] %v3163_v59  ;;  %v4756_v59 = vmov 3  }
 0x16c   : > { %1250 = vperm.xlu1 %2376, %v2730_v26   ;;  %1259 = vperm.xlu0 %2377, %v2749_v31  }
 0x16e   : > { %v3167_v25 = vpop.permute.xlu1 %843  ;;  %v3169_v22 = vpop.permute.xlu0 %846 }
 0x16f   : > { %4941 = vst [vmem:[#allocation107_spill] sm:$0xff] %v3167_v25  ;;  %4942 = vst [vmem:[#allocation108_spill] sm:$0xff] %v3169_v22 }
 0x170   : > { %1256 = vperm.xlu1 %2376, %v2738_v28   ;;  %1265 = vperm.xlu0 %2377, %v2757_v33  }
 0x172   : > { %v3173_v27 = vpop.permute.xlu1 %849  ;;  %v3175_v24 = vpop.permute.xlu0 %852 }
 0x173   : > { %4943 = vst [vmem:[#allocation109_spill] sm:$0xff] %v3173_v27  ;;  %4944 = vst [vmem:[#allocation110_spill] sm:$0xff] %v3175_v24 }
 0x174   : > { %1262 = vperm.xlu1 %2376, %v2746_v30   ;;  %1335 = vperm.xlu0 %2377, %v2765_v35  }
 0x176   : > { %v3179_v29 = vpop.permute.xlu1 %919  ;;  %v3181_v26 = vpop.permute.xlu0 %923 }
 0x178   : > { %1268 = vperm.xlu1 %2376, %v2754_v32   ;;  %1343 = vperm.xlu0 %2377, %v2773_v37  }
 0x17a   : > { %v3185_v31 = vpop.permute.xlu1 %927  ;;  %v3187_v28 = vpop.permute.xlu0 %931 }
 0x17c   : > { %1339 = vperm.xlu1 %2376, %v2762_v34   ;;  %1351 = vperm.xlu0 %2377, %v2781_v39  }
 0x17e   : > { %v3191_v33 = vpop.permute.xlu1 %935  ;;  %v3193_v30 = vpop.permute.xlu0 %939 }
 0x180   : > { %1347 = vperm.xlu1 %2376, %v2770_v36   ;;  %1359 = vperm.xlu0 %2377, %v2789_v41  }
 0x182   : > { %v3197_v27 = vpop.permute.xlu1 %943  ;;  %v3199_v32 = vpop.permute.xlu0 %947 }
 0x184   : > { %1355 = vperm.xlu1 %2376, %v2778_v38   ;;  %1371 = vperm.xlu0 %2377, %v2794_v42  }
 0x186   : > { %v3203_v24 = vpop.permute.xlu1 %951  ;;  %v3205_v25 = vpop.permute.xlu0 %955 }
 0x188   : > { %1363 = vperm.xlu1 %2376, %v2786_v40   ;;  %1379 = vperm.xlu0 %2377, %v2802_v44  }
 0x18a   : > { %v3209_v22 = vpop.permute.xlu1 %959  ;;  %v3211_v63 = vpop.permute.xlu0 %963 }
 0x18b   : > { %4945 = vst [vmem:[#allocation111_spill] sm:$0xff] %v3211_v63 }
 0x18c   : > { %2378 = vset.pattern.permute.xlu1 %v4756_v59  ;;  %1387 = vperm.xlu0 %2377, %v2810_v46  }
 0x18d   : > { %1594 = vperm.xlu1 %2378, %v2645_v5  }
 0x18e   : > { %v3216_v49 = vpop.permute.xlu1 %967  ;;  %v3218_v53 = vpop.permute.xlu0 %971 }
 0x18f   : > { %4946 = vst [vmem:[#allocation112_spill] sm:$0xff] %v3218_v53 }
 0x190   : > { %1395 = vperm.xlu0 %2377, %v2818_v48  }
 0x191   : > { %1751 = vperm.xlu1 %2378, %v2765_v35  }
 0x192   : > { %v3222_v57 = vpop.permute.xlu1 %975  ;;  %v3224_v61 = vpop.permute.xlu0 %979 }
 0x193   : > { %4947 = vst [vmem:[#allocation113_spill] sm:$0xff] %v3222_v57  ;;  %4948 = vst [vmem:[#allocation114_spill] sm:$0xff] %v3224_v61  ;;  %v5033_v57 = vld [vmem:[#allocation34_spill] sm:$0xff] }
 0x194   : > { %1403 = vperm.xlu0 %2377, %v2826_v50  }
 0x195   : > { %1597 = vperm.xlu1 %2378, %v2634_v1  }
 0x196   : > { %v3228_v59 = vpop.permute.xlu1 %983  ;;  %v3230_v63 = vpop.permute.xlu0 %987 }
 0x197   : > { %4949 = vst [vmem:[#allocation115_spill] sm:$0xff] %v3228_v59  ;;  %4950 = vst [vmem:[#allocation116_spill] sm:$0xff] %v3230_v63 }
 0x198   : > { %1411 = vperm.xlu0 %2377, %v2834_v52  }
 0x199   : > { %1759 = vperm.xlu1 %2378, %v2773_v37  }
 0x19a   : > { %v3234_v5 = vpop.permute.xlu1 %991  ;;  %v3236_v53 = vpop.permute.xlu0 %995 }
 0x19b   : > { %4951 = vst [vmem:[#allocation117_spill] sm:$0xff] %v3234_v5  ;;  %4952 = vst [vmem:[#allocation118_spill] sm:$0xff] %v3236_v53  ;;  %v5023_v5 = vld [vmem:[#allocation26_spill] sm:$0xff] }
 0x19c   : > { %1419 = vperm.xlu0 %2377, %v2842_v54  }
 0x19d   : > { %1603 = vperm.xlu1 %2378, %v2653_v7  }
 0x19e   : > { %v3240_v35 = vpop.permute.xlu1 %999  ;;  %v3242_v61 = vpop.permute.xlu0 %1003 }
 0x19f   : > { %4953 = vst [vmem:[#allocation119_spill] sm:$0xff] %v3240_v35  ;;  %4954 = vst [vmem:[#allocation120_spill] sm:$0xff] %v3242_v61  ;;  %v5016_v61 = vld [vmem:[#allocation21_spill] sm:$0xff] }
 0x1a0   : > { %1427 = vperm.xlu0 %2377, %v2850_v56  }
 0x1a1   : > { %1767 = vperm.xlu1 %2378, %v2781_v39   ;;  %v4961_v39 = vmov 2  }
 0x1a2   : > { %v3246_v1 = vpop.permute.xlu1 %1007  ;;  %v3248_v63 = vpop.permute.xlu0 %1011 }
 0x1a3   : > { %4955 = vst [vmem:[#allocation121_spill] sm:$0xff] %v3246_v1  ;;  %4956 = vst [vmem:[#allocation122_spill] sm:$0xff] %v3248_v63 }
 0x1a4   : > { %1435 = vperm.xlu0 %2377, %v4902_v58  }
 0x1a5   : > { %1609 = vperm.xlu1 %2378, %v2661_v9  }
 0x1a6   : > { %v3252_v37 = vpop.permute.xlu1 %1015  ;;  %v3254_v53 = vpop.permute.xlu0 %1019 }
 0x1a7   : > { %4957 = vst [vmem:[#allocation123_spill] sm:$0xff] %v3252_v37  ;;  %4958 = vst [vmem:[#allocation124_spill] sm:$0xff] %v3254_v53 }
 0x1a8   : > { %1443 = vperm.xlu0 %2377, %v4906_v60   ;;  %v4965_v60 = vmov 3  }
 0x1a9   : > { %1775 = vperm.xlu1 %2378, %v2789_v41  }
 0x1aa   : > { %v3258_v7 = vpop.permute.xlu1 %1023  ;;  %v3260_v56 = vpop.permute.xlu0 %1027 }
 0x1ab   : > { %4959 = vst [vmem:[#allocation125_spill] sm:$0xff] %v3258_v7  ;;  %4960 = vst [vmem:[#allocation126_spill] sm:$0xff] %v3260_v56 }
 0x1ac   : > { %1451 = vperm.xlu0 %2377, %v4910_v62  }
 0x1ad   : > { %2379 = vset.pattern.permute.xlu1 %v4961_v39 }
 0x1ae   : > { %v3264_v63 = vpop.permute.xlu1 %1031  ;;  %1367 = vperm.xlu1 %2379, %v2797_v43   ;;  %v3267_v9 = vpop.permute.xlu0 %1035 }
 0x1af   : > { %4962 = vst [vmem:[#allocation127_spill] sm:$0xff] %v3264_v63  ;;  %4963 = vst [vmem:[#allocation128_spill] sm:$0xff] %v3267_v9 }
 0x1b0   : > { %1459 = vperm.xlu0 %2377, %v4913_v0  }
 0x1b2   : > { %v3270_v58 = vpop.permute.xlu1 %1039  ;;  %2380 = vset.pattern.permute.xlu1 %v4965_v60  ;;  %v3273_v41 = vpop.permute.xlu0 %1043 }
 0x1b3   : > { %4964 = vst [vmem:[#allocation129_spill] sm:$0xff] %v3270_v58  ;;  %4966 = vst [vmem:[#allocation130_spill] sm:$0xff] %v3273_v41  ;;  %1615 = vperm.xlu1 %2380, %v2669_v11  }
 0x1b4   : > { %2402 = vset.pattern.permute.xlu0 %v4965_v60 }
 0x1b5   : > { %1591 = vperm.xlu0 %2402, %v2637_v2  }
 0x1b7   : > { %1618 = vperm.xlu1 %2380, %v2666_v10   ;;  %v3279_v62 = vpop.permute.xlu1 %1175  ;;  %v3281_v63 = vpop.permute.xlu0 %1178 }
 0x1b9   : > { %1755 = vperm.xlu0 %2402, %v2762_v34  }
 0x1bb   : > { %1787 = vperm.xlu1 %2380, %v2794_v42   ;;  %v3285_v0 = vpop.permute.xlu1 %1181  ;;  %v3287_v58 = vpop.permute.xlu0 %1187 }
 0x1bc   : > { %4967 = vst [vmem:[#allocation131_spill] sm:$0xff] %v3285_v0  ;;  %4968 = vst [vmem:[#allocation132_spill] sm:$0xff] %v3287_v58 }
 0x1bd   : > { %1600 = vperm.xlu0 %2402, %v2642_v4  }
 0x1bf   : > { %2381 = vset.pattern.permute.xlu1 %v4961_v39  ;;  %v3291_v11 = vpop.permute.xlu1 %1184  ;;  %v3293_v2 = vpop.permute.xlu0 %1193 }
 0x1c0   : > { %4969 = vst [vmem:[#allocation133_spill] sm:$0xff] %v3291_v11  ;;  %1375 = vperm.xlu1 %2381, %v2805_v45  }
 0x1c1   : > { %1763 = vperm.xlu0 %2402, %v2770_v36  }
 0x1c3   : > { %v3297_v10 = vpop.permute.xlu1 %1190  ;;  %v3299_v34 = vpop.permute.xlu0 %1199 }
 0x1c4   : > { %4970 = vst [vmem:[#allocation134_spill] sm:$0xff] %v3297_v10  ;;  %4971 = vst [vmem:[#allocation135_spill] sm:$0xff] %v3299_v34  ;;  %2382 = vset.pattern.permute.xlu1 %v4965_v60 }
 0x1c5   : > { %1621 = vperm.xlu1 %2382, %v2677_v13   ;;  %1606 = vperm.xlu0 %2402, %v2650_v6  }
 0x1c7   : > { %v3304_v4 = vpop.permute.xlu1 %1196  ;;  %v3306_v42 = vpop.permute.xlu0 %1205 }
 0x1c8   : > { %4972 = vst [vmem:[#allocation136_spill] sm:$0xff] %v3304_v4  ;;  %4973 = vst [vmem:[#allocation137_spill] sm:$0xff] %v3306_v42 }
 0x1c9   : > { %1624 = vperm.xlu1 %2382, %v2674_v12   ;;  %1771 = vperm.xlu0 %2402, %v2778_v38  }
 0x1cb   : > { %v3310_v41 = vpop.permute.xlu1 %1202  ;;  %v3312_v36 = vpop.permute.xlu0 %1211 }
 0x1cc   : > { %4974 = vst [vmem:[#allocation138_spill] sm:$0xff] %v3310_v41  ;;  %4975 = vst [vmem:[#allocation139_spill] sm:$0xff] %v3312_v36 }
 0x1cd   : > { %1795 = vperm.xlu1 %2382, %v2802_v44   ;;  %1612 = vperm.xlu0 %2402, %v2658_v8  }
 0x1cf   : > { %v3316_v9 = vpop.permute.xlu1 %1208  ;;  %v3318_v13 = vpop.permute.xlu0 %1217 }
 0x1d0   : > { %4976 = vst [vmem:[#allocation140_spill] sm:$0xff] %v3316_v9  ;;  %4977 = vst [vmem:[#allocation141_spill] sm:$0xff] %v3318_v13  ;;  %v5032_v13 = vld [vmem:[#allocation33_spill] sm:$0xff] }
 0x1d1   : > { %2383 = vset.pattern.permute.xlu1 %v4961_v39  ;;  %1779 = vperm.xlu0 %2402, %v2786_v40   ;;  %v5050_v9 = vld [vmem:[#allocation61_spill] sm:$0xff] }
 0x1d2   : > { %1383 = vperm.xlu1 %2383, %v2813_v47  }
 0x1d3   : > { %v3323_v6 = vpop.permute.xlu1 %1214  ;;  %v3325_v12 = vpop.permute.xlu0 %1223 }
 0x1d4   : > { %4978 = vst [vmem:[#allocation142_spill] sm:$0xff] %v3323_v6  ;;  %4979 = vst [vmem:[#allocation143_spill] sm:$0xff] %v3325_v12 }
 0x1d5   : > { %1783 = vperm.xlu0 %2402, %v2797_v43  }
 0x1d6   : > { %2384 = vset.pattern.permute.xlu1 %v4965_v60 }
 0x1d7   : > { %1627 = vperm.xlu1 %2384, %v2685_v15   ;;  %v3330_v8 = vpop.permute.xlu1 %1220  ;;  %v3332_v38 = vpop.permute.xlu0 %1229  ;;  %v4986_v15 = vld [vmem:[#allocation9_spill] sm:$0xff] }
 0x1d8   : > { %4980 = vst [vmem:[#allocation144_spill] sm:$0xff] %v3330_v8  ;;  %4981 = vst [vmem:[#allocation145_spill] sm:$0xff] %v3332_v38  ;;  %v5022_v38 = vld [vmem:[#allocation25_spill] sm:$0xff]  ;;  %v5030_v8 = vld [vmem:[#allocation31_spill] sm:$0xff] }
 0x1d9   : > { %1791 = vperm.xlu0 %2402, %v2805_v45  }
 0x1db   : > { %1630 = vperm.xlu1 %2384, %v2682_v14   ;;  %v3336_v40 = vpop.permute.xlu1 %1226  ;;  %v3338_v44 = vpop.permute.xlu0 %1235  ;;  %v4989_v14 = vld [vmem:[#allocation10_spill] sm:$0xff] }
 0x1dc   : > { %4982 = vst [vmem:[#allocation146_spill] sm:$0xff] %v3336_v40  ;;  %4983 = vst [vmem:[#allocation147_spill] sm:$0xff] %v3338_v44  ;;  %v5026_v40 = vld [vmem:[#allocation29_spill] sm:$0xff] }
 0x1dd   : > { %1799 = vperm.xlu0 %2402, %v2813_v47  }
 0x1df   : > { %1803 = vperm.xlu1 %2384, %v2810_v46   ;;  %v3342_v43 = vpop.permute.xlu1 %1232  ;;  %v3344_v56 = vpop.permute.xlu0 %1241  ;;  %v4992_v46 = vld [vmem:[#allocation11_spill] sm:$0xff] }
 0x1e0   : > { %4984 = vst [vmem:[#allocation148_spill] sm:$0xff] %v3342_v43  ;;  %4985 = vst [vmem:[#allocation149_spill] sm:$0xff] %v3344_v56  ;;  %v5019_v43 = vld [vmem:[#allocation22_spill] sm:$0xff] }
 0x1e1   : > { %1807 = vperm.xlu0 %2402, %v4986_v15  }
 0x1e3   : > { %2385 = vset.pattern.permute.xlu1 %v4961_v39  ;;  %v3348_v7 = vpop.permute.xlu1 %1238  ;;  %v3350_v45 = vpop.permute.xlu0 %1247 }
 0x1e4   : > { %4987 = vst [vmem:[#allocation9_spill] sm:$0xff] %v3348_v7  ;;  %4988 = vst [vmem:[#allocation150_spill] sm:$0xff] %v3350_v45  ;;  %1391 = vperm.xlu1 %2385, %v4986_v15   ;;  %v4995_v45 = vld [vmem:[#allocation12_spill] sm:$0xff] }
 0x1e5   : > { %1815 = vperm.xlu0 %2402, %v4989_v14  }
 0x1e7   : > { %v3354_v53 = vpop.permute.xlu1 %1244  ;;  %v3356_v47 = vpop.permute.xlu0 %1253 }
 0x1e8   : > { %4990 = vst [vmem:[#allocation10_spill] sm:$0xff] %v3354_v53  ;;  %4991 = vst [vmem:[#allocation151_spill] sm:$0xff] %v3356_v47  ;;  %2386 = vset.pattern.permute.xlu1 %v4965_v60  ;;  %v4998_v47 = vld [vmem:[#allocation13_spill] sm:$0xff] }
 0x1e9   : > { %1633 = vperm.xlu1 %2386, %v2693_v17   ;;  %1823 = vperm.xlu0 %2402, %v4992_v46   ;;  %v304_v17 = vlaneseq }
 0x1eb   : > { %v3361_v37 = vpop.permute.xlu1 %1250  ;;  %v3363_v56 = vpop.permute.xlu0 %1259 }
 0x1ec   : > { %4993 = vst [vmem:[#allocation11_spill] sm:$0xff] %v3361_v37  ;;  %4994 = vst [vmem:[#allocation152_spill] sm:$0xff] %v3363_v56 }
 0x1ed   : > { %1636 = vperm.xlu1 %2386, %v2690_v16   ;;  %1831 = vperm.xlu0 %2402, %v4995_v45   ;;  %v5000_v16 = vld [vmem:[#allocation15_spill] sm:$0xff] }
 0x1ef   : > { %v3367_v15 = vpop.permute.xlu1 %1256  ;;  %v3369_v1 = vpop.permute.xlu0 %1265 }
 0x1f0   : > { %4996 = vst [vmem:[#allocation12_spill] sm:$0xff] %v3367_v15  ;;  %4997 = vst [vmem:[#allocation153_spill] sm:$0xff] %v3369_v1  ;;  %v3382_v15 = vand.u32 127, %v304_v17 }
 0x1f1   : > { %1811 = vperm.xlu1 %2386, %v2818_v48   ;;  %1839 = vperm.xlu0 %2402, %v4998_v47   ;;  %v5003_v48 = vld [vmem:[#allocation17_spill] sm:$0xff] }
 0x1f2   : > { %v3392_v37 = vadd.s32 128, %v3382_v15  ;;  %vm1282_vm0 = vcmp.eq.s32.totalorder %v3382_v15, %v3293_v2  ;;  %vm474_vm2 = vcmp.eq.s32.totalorder %v3382_v15, %v5016_v61  ;;  %vm470_vm4 = vcmp.eq.s32.totalorder %v3382_v15, %v5019_v43 }
 0x1f3   : > { %v3373_v53 = vpop.permute.xlu1 %1262  ;;  %v3375_v7 = vpop.permute.xlu0 %1335  ;;  %vm480_vm10 = vcmp.eq.s32.totalorder %v3382_v15, %v5022_v38  ;;  %vm478_vm12 = vcmp.eq.s32.totalorder %v3382_v15, %v5023_v5  ;;  %vm496_vm14 = vcmp.eq.s32.totalorder %v3382_v15, %v5032_v13 }
 0x1f4   : > { %4999 = vst [vmem:[#allocation13_spill] sm:$0xff] %v3373_v53  ;;  %vm1283_vm1 = vcmp.eq.s32.totalorder %v3392_v37, %v3293_v2  ;;  %vm475_vm3 = vcmp.eq.s32.totalorder %v3392_v37, %v5016_v61  ;;  %vm471_vm5 = vcmp.eq.s32.totalorder %v3392_v37, %v5019_v43  ;;  %vm497_vm15 = vcmp.eq.s32.totalorder %v3392_v37, %v5032_v13  ;;  %v5068_v13 = vld [vmem:[#allocation20_spill] sm:$0xff] }
 0x1f5   : > { %2387 = vset.pattern.permute.xlu1 %v4961_v39  ;;  %1847 = vperm.xlu0 %2402, %v5000_v16   ;;  %vm495_vm11 = vcmp.eq.s32.totalorder %v3392_v37, %v5033_v57 }
 0x1f6   : > { %1399 = vperm.xlu1 %2387, %v4989_v14  }
 0x1f7   : > { %v3380_v56 = vpop.permute.xlu1 %1268  ;;  %v3384_v1 = vpop.permute.xlu0 %1343 }
 0x1f8   : > { %5001 = vst [vmem:[#allocation15_spill] sm:$0xff] %v3380_v56  ;;  %5002 = vst [vmem:[#allocation154_spill] sm:$0xff] %v3384_v1  ;;  %v5076_v1 = vld [vmem:[#allocation86_spill] sm:$0xff] }
 0x1f9   : > { %1855 = vperm.xlu0 %2402, %v5003_v48  }
 0x1fa   : > { %2388 = vset.pattern.permute.xlu1 %v4965_v60 }
 0x1fb   : > { %1639 = vperm.xlu1 %2388, %v2701_v19   ;;  %v3389_v53 = vpop.permute.xlu1 %1339  ;;  %v3394_v14 = vpop.permute.xlu0 %1351 }
 0x1fc   : > { %5004 = vst [vmem:[#allocation17_spill] sm:$0xff] %v3394_v14  ;;  %v5056_v14 = vld [vmem:[#allocation63_spill] sm:$0xff] }
 0x1fd   : > { %1863 = vperm.xlu0 %2402, %v4909_v51  }
 0x1ff   : > { %1642 = vperm.xlu1 %2388, %v2698_v18   ;;  %v3402_v17 = vpop.permute.xlu1 %1347  ;;  %v1360_v19 = vpop.permute.xlu0 %1359 }
 0x200   : > { %5005 = vst [vmem:[#allocation155_spill] sm:$0xff] %v3402_v17  ;;  %v3404_v16 = vsel %vm1282_vm0, %v1360_v19, 0.0  ;;  %v3406_v48 = vsel %vm1283_vm1, %v1360_v19, 0.0  ;;  %vm494_vm0 = vcmp.eq.s32.totalorder %v3382_v15, %v5033_v57  ;;  %v5070_v57 = vld [vmem:[#allocation82_spill] sm:$0xff]  ;;  %v5075_v17 = vld [vmem:[#allocation85_spill] sm:$0xff] }
 0x201   : > { %5006 = vst [vmem:[#allocation156_spill] sm:$0xff] %v3404_v16  ;;  %5007 = vst [vmem:[#allocation157_spill] sm:$0xff] %v3406_v48  ;;  %1871 = vperm.xlu0 %2402, %v2885_v3   ;;  %v5039_v16 = vld [vmem:[#allocation56_spill] sm:$0xff] }
 0x202   : > { %v3542_v43 = vsel %vm474_vm2, %v5039_v16, 0.0  ;;  %vm5043_vm2 = vcmp.eq.s32.totalorder %v3392_v37, %v5023_v5 }
 0x203   : > { %1819 = vperm.xlu1 %2388, %v2826_v50   ;;  %v3410_v56 = vpop.permute.xlu1 %1355  ;;  %v3412_v44 = vpop.permute.xlu0 %1371 }
 0x204   : > { %5008 = vst [vmem:[#allocation158_spill] sm:$0xff] %v3410_v56  ;;  %5009 = vst [vmem:[#allocation159_spill] sm:$0xff] %v3412_v44  ;;  %v5036_v44 = vld [vmem:[#allocation55_spill] sm:$0xff] }
 0x207   : > { %2389 = vset.pattern.permute.xlu1 %v4961_v39  ;;  %v3415_v51 = vpop.permute.xlu1 %1363  ;;  %v3417_v18 = vpop.permute.xlu0 %1379 }
 0x208   : > { %5010 = vst [vmem:[#allocation160_spill] sm:$0xff] %v3415_v51  ;;  %5011 = vst [vmem:[#allocation161_spill] sm:$0xff] %v3417_v18  ;;  %1407 = vperm.xlu1 %2389, %v4992_v46   ;;  %v5035_v18 = vld [vmem:[#allocation54_spill] sm:$0xff] }
 0x209   : > { %v3514_v42 = vsel %vm470_vm4, %v5035_v18, 0.0  ;;  %v3520_v51 = vsel %vm471_vm5, %v5035_v18, 0.0  ;;  %v3548_v18 = vsel %vm475_vm3, %v5039_v16, 0.0  ;;  %vm5041_vm4 = vcmp.eq.s32.totalorder %v3392_v37, %v5022_v38  ;;  %v5044_v16 = vld [vmem:[#allocation59_spill] sm:$0xff] }
 0x20b   : > { %v3420_v2 = vpop.permute.xlu0 %1387 }
 0x20c   : > { %5012 = vst [vmem:[#allocation162_spill] sm:$0xff] %v3420_v2  ;;  %2390 = vset.pattern.permute.xlu1 %v4965_v60  ;;  %v3423_v19 = vpop.permute.xlu1 %1594  ;;  %v5034_v2 = vld [vmem:[#allocation53_spill] sm:$0xff] }
 0x20d   : > { %5013 = vst [vmem:[#allocation163_spill] sm:$0xff] %v3423_v19  ;;  %1645 = vperm.xlu1 %2390, %v2709_v21   ;;  %v5020_v21 = vld [vmem:[#allocation23_spill] sm:$0xff] }
 0x20e   : > { %vm476_vm6 = vcmp.eq.s32.totalorder %v3382_v15, %v5020_v21  ;;  %vm477_vm7 = vcmp.eq.s32.totalorder %v3392_v37, %v5020_v21  ;;  %v5042_v21 = vld [vmem:[#allocation58_spill] sm:$0xff] }
 0x20f   : > { %v3426_v50 = vpop.permute.xlu0 %1395  ;;  %v3526_v48 = vsel %vm476_vm6, %v5036_v44, 0.0  ;;  %v3536_v6 = vsel %vm477_vm7, %v5036_v44, 0.0  ;;  %v3566_v34 = vsel %vm478_vm12, %v5042_v21, 0.0  ;;  %v3572_v61 = vsel %vm5043_vm2, %v5042_v21, 0.0 }
 0x210   : > { %5014 = vst [vmem:[#allocation164_spill] sm:$0xff] %v3426_v50  ;;  %v3428_v3 = vpop.permute.xlu1 %1751  ;;  %v5029_v50 = vld [vmem:[#allocation30_spill] sm:$0xff]  ;;  %vm5060_vm2 = vcmp.eq.s32.totalorder %v3392_v37, %v5030_v8 }
 0x211   : > { %5015 = vst [vmem:[#allocation165_spill] sm:$0xff] %v3428_v3  ;;  %1648 = vperm.xlu1 %2390, %v2706_v20   ;;  %v5021_v20 = vld [vmem:[#allocation24_spill] sm:$0xff]  ;;  %vm5055_vm12 = vcmp.eq.s32.totalorder %v3392_v37, %v5029_v50 }
 0x212   : > { %vm472_vm8 = vcmp.eq.s32.totalorder %v3382_v15, %v5021_v20  ;;  %vm473_vm9 = vcmp.eq.s32.totalorder %v3392_v37, %v5021_v20 }
 0x213   : > { %v3433_v35 = vpop.permute.xlu0 %1403  ;;  %v3502_v36 = vsel %vm472_vm8, %v5034_v2, 0.0  ;;  %vm5051_vm8 = vcmp.eq.s32.totalorder %v3382_v15, %v5026_v40 }
 0x214   : > { %5017 = vst [vmem:[#allocation21_spill] sm:$0xff] %v3433_v35  ;;  %v3435_v46 = vpop.permute.xlu1 %1597  ;;  %v5025_v35 = vld [vmem:[#allocation28_spill] sm:$0xff]  ;;  %v3603_v41 = vsel %vm5051_vm8, %v5050_v9, 0.0 }
 0x215   : > { %5018 = vst [vmem:[#allocation166_spill] sm:$0xff] %v3435_v46  ;;  %1827 = vperm.xlu1 %2390, %v2834_v52   ;;  %v5024_v52 = vld [vmem:[#allocation27_spill] sm:$0xff]  ;;  %vm5048_vm6 = vcmp.eq.s32.totalorder %v3382_v15, %v5025_v35  ;;  %vm5049_vm7 = vcmp.eq.s32.totalorder %v3392_v37, %v5025_v35 }
 0x216   : > { %vm5045_vm3 = vcmp.eq.s32.totalorder %v3382_v15, %v5024_v52  ;;  %vm5046_vm5 = vcmp.eq.s32.totalorder %v3392_v37, %v5024_v52 }
 0x217   : > { %v3470_v12 = vpop.permute.xlu0 %1411  ;;  %v3578_v56 = vsel %vm5045_vm3, %v5044_v16, 0.0  ;;  %v3585_v38 = vsel %vm5046_vm5, %v5044_v16, 0.0  ;;  %v5053_v16 = vld [vmem:[#allocation62_spill] sm:$0xff]  ;;  %vm860_vm3 = vcmp.eq.s32.totalorder %v3382_v15, %v5070_v57  ;;  %vm861_vm5 = vcmp.eq.s32.totalorder %v3392_v37, %v5070_v57 }
 0x218   : > { %5027 = vst [vmem:[#allocation22_spill] sm:$0xff] %v3470_v12  ;;  %v3472_v59 = vpop.permute.xlu1 %1759  ;;  %v5031_v12 = vld [vmem:[#allocation32_spill] sm:$0xff] }
 0x219   : > { %5028 = vst [vmem:[#allocation23_spill] sm:$0xff] %v3472_v59  ;;  %2391 = vset.pattern.permute.xlu1 %v4961_v39  ;;  %vm490_vm1 = vcmp.eq.s32.totalorder %v3382_v15, %v5031_v12  ;;  %vm491_vm13 = vcmp.eq.s32.totalorder %v3392_v37, %v5031_v12  ;;  %v3638_v59 = vsel %vm5060_vm2, %v5056_v14, 0.0  ;;  %vm869_vm2 = vcmp.eq.s32.totalorder %v3392_v37, %v5076_v1 }
 0x21a   : > { %1415 = vperm.xlu1 %2391, %v4995_v45   ;;  %v3508_v45 = vsel %vm473_vm9, %v5034_v2, 0.0  ;;  %vm5052_vm9 = vcmp.eq.s32.totalorder %v3392_v37, %v5026_v40 }
 0x21b   : > { %v3528_v2 = vpop.permute.xlu0 %1419  ;;  %v3610_v52 = vsel %vm5052_vm9, %v5050_v9, 0.0 }
 0x21c   : > { %5037 = vst [vmem:[#allocation24_spill] sm:$0xff] %v3528_v2  ;;  %v3530_v20 = vpop.permute.xlu1 %1603  ;;  %v5040_v2 = vld [vmem:[#allocation57_spill] sm:$0xff] }
 0x21d   : > { %5038 = vst [vmem:[#allocation25_spill] sm:$0xff] %v3530_v20  ;;  %v3554_v20 = vsel %vm480_vm10, %v5040_v2, 0.0  ;;  %v3560_v44 = vsel %vm5041_vm4, %v5040_v2, 0.0  ;;  %v5047_v2 = vld [vmem:[#allocation60_spill] sm:$0xff]  ;;  %vm5054_vm10 = vcmp.eq.s32.totalorder %v3382_v15, %v5029_v50  ;;  %vm5057_vm4 = vcmp.eq.s32.totalorder %v3382_v15, %v5030_v8 }
 0x21e   : > { %2392 = vset.pattern.permute.xlu1 %v4965_v60  ;;  %v3591_v5 = vsel %vm5048_vm6, %v5047_v2, 0.0  ;;  %v3597_v21 = vsel %vm5049_vm7, %v5047_v2, 0.0  ;;  %v3616_v35 = vsel %vm5054_vm10, %v5053_v16, 0.0  ;;  %v3622_v2 = vsel %vm5055_vm12, %v5053_v16, 0.0  ;;  %v5061_v50 = vld [vmem:[#allocation64_spill] sm:$0xff] }
 0x21f   : > { %1651 = vperm.xlu1 %2392, %v2717_v23   ;;  %v3628_v23 = vsel %vm5057_vm4, %v5056_v14, 0.0  ;;  %v3630_v9 = vpop.permute.xlu0 %1427  ;;  %v3644_v16 = vsel %vm490_vm1, %v5061_v50, 0.0  ;;  %v3650_v4 = vsel %vm491_vm13, %v5061_v50, 0.0  ;;  %v5065_v14 = vld [vmem:[#allocation66_spill] sm:$0xff]  ;;  %vm856_vm13 = vcmp.eq.s32.totalorder %v3382_v15, %v3081_v55  ;;  %v2405_v50 = vld [vmem:[%s2625_s25 + $0xa8] sm:$0xff] }
 0x220   : > { %5058 = vst [vmem:[#allocation26_spill] sm:$0xff] %v3630_v9  ;;  %v3632_v40 = vpop.permute.xlu1 %1767  ;;  %v5062_v9 = vld [vmem:[#allocation65_spill] sm:$0xff]  ;;  %v3668_v46 = vsel %vm494_vm0, %v5065_v14, 0.0  ;;  %v3674_v12 = vsel %vm495_vm11, %v5065_v14, 0.0  ;;  %vm855_vm1 = vcmp.eq.s32.totalorder %v3392_v37, %v5068_v13  ;;  %v5071_v14 = vld [vmem:[#allocation83_spill] sm:$0xff]  ;;  %vm867_vm12 = vcmp.eq.s32.totalorder %v3392_v37, %v5075_v17 }
 0x221   : > { %5059 = vst [vmem:[#allocation27_spill] sm:$0xff] %v3632_v40  ;;  %v3656_v40 = vsel %vm496_vm14, %v5062_v9, 0.0  ;;  %v3662_v8 = vsel %vm497_vm15, %v5062_v9, 0.0  ;;  %5066 = vst [vmem:[#allocation30_spill] sm:$0xff] %v3668_v46  ;;  %vm857_vm14 = vcmp.eq.s32.totalorder %v3392_v37, %v3081_v55  ;;  %vm854_vm15 = vcmp.eq.s32.totalorder %v3382_v15, %v5068_v13  ;;  %v5069_v9 = vld [vmem:[#allocation81_spill] sm:$0xff]  ;;  %v5082_v13 = vld [vmem:[#allocation90_spill] sm:$0xff] }
 0x222   : > { %5063 = vst [vmem:[#allocation28_spill] sm:$0xff] %v3656_v40  ;;  %5064 = vst [vmem:[#allocation29_spill] sm:$0xff] %v3662_v8  ;;  %vm858_vm0 = vcmp.eq.s32.totalorder %v3382_v15, %v5069_v9  ;;  %vm859_vm11 = vcmp.eq.s32.totalorder %v3392_v37, %v5069_v9  ;;  %vm862_vm6 = vcmp.eq.s32.totalorder %v3382_v15, %v5071_v14  ;;  %v1046_v10 = vsel %vm854_vm15, %v3179_v29, 0.0 }
 0x223   : > { %5067 = vst [vmem:[#allocation31_spill] sm:$0xff] %v3674_v12  ;;  %1654 = vperm.xlu1 %2392, %v2405_v50   ;;  %v3695_v8 = vpop.permute.xlu0 %1435  ;;  %v5074_v50 = vld [vmem:[#allocation84_spill] sm:$0xff]  ;;  %vm868_vm4 = vcmp.eq.s32.totalorder %v3382_v15, %v5076_v1  ;;  %v1047_v58 = vsel %vm855_vm1, %v3179_v29, 0.0  ;;  %v1048_v11 = vsel %vm856_vm13, %v3181_v26, 0.0  ;;  %v1049_v0 = vsel %vm857_vm14, %v3181_v26, 0.0  ;;  %v5081_v29 = vld [vmem:[#allocation89_spill] sm:$0xff] }
 0x224   : > { %5072 = vst [vmem:[#allocation32_spill] sm:$0xff] %v3695_v8  ;;  %v3697_v40 = vpop.permute.xlu1 %1609  ;;  %v5077_v8 = vld [vmem:[#allocation87_spill] sm:$0xff]  ;;  %vm874_vm15 = vcmp.eq.s32.totalorder %v3382_v15, %v5081_v29  ;;  %vm875_vm13 = vcmp.eq.s32.totalorder %v3392_v37, %v5081_v29  ;;  %v1051_v55 = vsel %vm859_vm11, %v3185_v31, 0.0  ;;  %v1052_v26 = vsel %vm860_vm3, %v3187_v28, 0.0 }
 0x225   : > { %5073 = vst [vmem:[#allocation33_spill] sm:$0xff] %v3697_v40  ;;  %vm870_vm7 = vcmp.eq.s32.totalorder %v3382_v15, %v5077_v8  ;;  %vm871_vm8 = vcmp.eq.s32.totalorder %v3392_v37, %v5077_v8  ;;  %v5078_v40 = vld [vmem:[#allocation88_spill] sm:$0xff]  ;;  %vm876_vm14 = vcmp.eq.s32.totalorder %v3382_v15, %v5082_v13  ;;  %vm877_vm1 = vcmp.eq.s32.totalorder %v3392_v37, %v5082_v13 }
 0x226   : > { %vm872_vm9 = vcmp.eq.s32.totalorder %v3382_v15, %v5078_v40  ;;  %vm873_vm10 = vcmp.eq.s32.totalorder %v3392_v37, %v5078_v40  ;;  %v1053_v9 = vsel %vm861_vm5, %v3187_v28, 0.0  ;;  %v3775_v3 = vadd.f32 %v1048_v11, %v3502_v36 }
 0x227   : > { %1835 = vperm.xlu1 %2392, %v2842_v54   ;;  %v1050_v54 = vsel %vm858_vm0, %v3185_v31, 0.0  ;;  %v3742_v12 = vpop.permute.xlu0 %1443  ;;  %v5083_v31 = vld [vmem:[#allocation91_spill] sm:$0xff]  ;;  %v3778_v46 = vadd.f32 %v1049_v0, %v3508_v45  ;;  %v3788_v28 = vadd.f32 %v1052_v26, %v3526_v48  ;;  %vm5084_vm11 = vcmp.eq.s32.totalorder %v3392_v37, %v5071_v14  ;;  %v2406_v14 = vld [vmem:[%s2625_s25 + $0xb0] sm:$0xff]  ;;  %v2407_v26 = vld [vmem:[%s2625_s25 + $0xb8] sm:$0xff] }
 0x228   : > { %5079 = vst [vmem:[#allocation34_spill] sm:$0xff] %v3742_v12  ;;  %v3744_v19 = vpop.permute.xlu1 %1775  ;;  %v3763_v12 = vadd.f32 %v1046_v10, %v3514_v42  ;;  %vm878_vm0 = vcmp.eq.s32.totalorder %v3382_v15, %v5083_v31  ;;  %v3781_v10 = vadd.f32 %v1050_v54, %v3542_v43  ;;  %v3785_v42 = vadd.f32 %v1051_v55, %v3548_v18 }
 0x229   : > { %5080 = vst [vmem:[#allocation53_spill] sm:$0xff] %v3744_v19  ;;  %v3772_v19 = vadd.f32 %v1047_v58, %v3520_v51  ;;  %v1054_v58 = vsel %vm862_vm6, %v3191_v33, 0.0  ;;  %v1055_v0 = vsel %vm5084_vm11, %v3191_v33, 0.0  ;;  %v3802_v36 = vadd.f32 %v1053_v9, %v3536_v6 }
 0x22a   : > { %vm5085_vm3 = vcmp.eq.s32.totalorder %v3382_v15, %v5074_v50  ;;  %vm5086_vm5 = vcmp.eq.s32.totalorder %v3392_v37, %v5074_v50  ;;  %vm5087_vm6 = vcmp.eq.s32.totalorder %v3382_v15, %v5075_v17  ;;  %vm879_vm11 = vcmp.eq.s32.totalorder %v3392_v37, %v5083_v31 }
 0x22b   : > { %2393 = vset.pattern.permute.xlu1 %v4961_v39  ;;  %v3798_v11 = vpop.permute.xlu0 %1451  ;;  %v1056_v48 = vsel %vm5085_vm3, %v3193_v30, 0.0  ;;  %v1057_v51 = vsel %vm5086_vm5, %v3193_v30, 0.0  ;;  %v1058_v33 = vsel %vm5087_vm6, %v3197_v27, 0.0  ;;  %v1059_v6 = vsel %vm867_vm12, %v3197_v27, 0.0 }
 0x22c   : > { %1423 = vperm.xlu1 %2393, %v4998_v47   ;;  %v1060_v30 = vsel %vm868_vm4, %v3199_v32, 0.0  ;;  %v1061_v47 = vsel %vm869_vm2, %v3199_v32, 0.0  ;;  %v1062_v43 = vsel %vm870_vm7, %v3203_v24, 0.0  ;;  %v3837_v18 = vadd.f32 %v1054_v58, %v3566_v34  ;;  %v5089_v58 = vld [vmem:[#allocation30_spill] sm:$0xff] }
 0x22d   : > { %v3816_v45 = vpop.permute.xlu1 %1367  ;;  %v3840_v27 = vadd.f32 %v1055_v0, %v3572_v61  ;;  %v1063_v17 = vsel %vm871_vm8, %v3203_v24, 0.0  ;;  %v1064_v32 = vsel %vm872_vm9, %v3205_v25, 0.0  ;;  %v3851_v1 = vadd.f32 %v1056_v48, %v3554_v20 }
 0x22e   : > { %v3854_v57 = vadd.f32 %v1057_v51, %v3560_v44  ;;  %v3857_v34 = vadd.f32 %v1058_v33, %v3591_v5  ;;  %v1065_v61 = vsel %vm873_vm10, %v3205_v25, 0.0  ;;  %v3867_v8 = vadd.f32 %v1059_v6, %v3597_v21  ;;  %v5090_v51 = vld [vmem:[#allocation165_spill] sm:$0xff] }
 0x22f   : > { %v3863_v24 = vpop.permute.xlu0 %1459  ;;  %v3870_v20 = vadd.f32 %v1060_v30, %v3578_v56  ;;  %v3873_v44 = vadd.f32 %v1061_v47, %v3585_v38  ;;  %v3876_v5 = vadd.f32 %v1062_v43, %v3616_v35  ;;  %v3880_v25 = vadd.f32 %v1063_v17, %v3622_v2  ;;  %v5088_v2 = vld [vmem:[#allocation111_spill] sm:$0xff] }
 0x230   : > { %2394 = vset.pattern.permute.xlu1 %v4965_v60  ;;  %v3883_v40 = vadd.f32 %v1064_v32, %v3603_v41  ;;  %v1066_v56 = vsel %vm874_vm15, %v3209_v22, 0.0  ;;  %v1067_v38 = vsel %vm875_vm13, %v3209_v22, 0.0  ;;  %v3896_v35 = vadd.f32 %v1065_v61, %v3610_v52  ;;  %v5091_v30 = vld [vmem:[#allocation163_spill] sm:$0xff] }
 0x231   : > { %1657 = vperm.xlu1 %2394, %v2406_v14   ;;  %v1068_v41 = vsel %vm876_vm14, %v5088_v2, 0.0  ;;  %vm1272_vm7 = vcmp.eq.s32.totalorder %v3382_v15, %v3281_v63  ;;  %vm1273_vm8 = vcmp.eq.s32.totalorder %v3392_v37, %v3281_v63  ;;  %v1069_v22 = vsel %vm877_vm1, %v5088_v2, 0.0  ;;  %v5095_v2 = vld [vmem:[#allocation133_spill] sm:$0xff] }
 0x232   : > { %v3893_v21 = vpop.permute.xlu1 %1615  ;;  %v1070_v52 = vsel %vm878_vm0, %v3216_v49, 0.0  ;;  %vm1270_vm9 = vcmp.eq.s32.totalorder %v3382_v15, %v3279_v62  ;;  %vm1271_vm10 = vcmp.eq.s32.totalorder %v3392_v37, %v3279_v62  ;;  %v3919_v50 = vadd.f32 %v1066_v56, %v3644_v16 }
 0x233   : > { %v3922_v63 = vadd.f32 %v1067_v38, %v3650_v4  ;;  %v1462_v54 = vsel %vm1270_vm9, %v3375_v7, 0.0  ;;  %v1463_v29 = vsel %vm1271_vm10, %v3375_v7, 0.0  ;;  %v1464_v13 = vsel %vm1272_vm7, %v3389_v53, 0.0  ;;  %v5094_v38 = vld [vmem:[#allocation92_spill] sm:$0xff] }
 0x234   : > { %v1592_v55 = vpop.permute.xlu0 %1591  ;;  %v1465_v9 = vsel %vm1273_vm8, %v3389_v53, 0.0  ;;  %v3934_v4 = vadd.f32 %v1068_v41, %v3628_v23  ;;  %v3937_v16 = vadd.f32 %v1069_v22, %v3638_v59  ;;  %v1071_v7 = vsel %vm879_vm11, %v3216_v49, 0.0  ;;  %v2408_v49 = vld [vmem:[%s2630_s30 + $0xb8] sm:$0xff]  ;;  %v5097_v41 = vld [vmem:[#allocation134_spill] sm:$0xff] }
 0x235   : > { %1660 = vperm.xlu1 %2394, %v2407_v26   ;;  %vm1686_vm12 = vcmp.eq.s32.totalorder %v3382_v15, %v1592_v55  ;;  %vm1687_vm4 = vcmp.eq.s32.totalorder %v3392_v37, %v1592_v55  ;;  %v3944_v53 = vadd.f32 %v1070_v52, %v5089_v58  ;;  %v1526_v0 = vadd.f32 %v1462_v54, %v3763_v12  ;;  %v5092_v12 = vld [vmem:[#allocation31_spill] sm:$0xff]  ;;  %v2409_v58 = vld [vmem:[%s2630_s30 + $0xc0] sm:$0xff] }
 0x236   : > { %v3931_v62 = vpop.permute.xlu1 %1618  ;;  %v1527_v48 = vadd.f32 %v1463_v29, %v3772_v19  ;;  %v1878_v33 = vsel %vm1686_vm12, %v5090_v51, 0.0  ;;  %v1879_v23 = vsel %vm1687_vm4, %v5090_v51, 0.0  ;;  %v1528_v6 = vadd.f32 %v1464_v13, %v3775_v3  ;;  %v5093_v19 = vld [vmem:[#allocation131_spill] sm:$0xff]  ;;  %v5098_v29 = vld [vmem:[#allocation154_spill] sm:$0xff]  ;;  %v5101_v51 = vld [vmem:[#allocation136_spill] sm:$0xff] }
 0x237   : > { %vm1688_vm2 = vcmp.eq.s32.totalorder %v3382_v15, %v5091_v30  ;;  %vm1689_vm15 = vcmp.eq.s32.totalorder %v3392_v37, %v5091_v30  ;;  %v1529_v31 = vadd.f32 %v1465_v9, %v3778_v46  ;;  %v3958_v47 = vadd.f32 %v1071_v7, %v5092_v12  ;;  %v5096_v46 = vld [vmem:[#allocation132_spill] sm:$0xff]  ;;  %v5099_v13 = vld [vmem:[#allocation155_spill] sm:$0xff] }
 0x238   : > { %v1756_v59 = vpop.permute.xlu0 %1755  ;;  %vm1274_vm13 = vcmp.eq.s32.totalorder %v3382_v15, %v5093_v19  ;;  %v1943_v61 = vadd.f32 %v1879_v23, %v1527_v48  ;;  %v1942_v56 = vadd.f32 %v1878_v33, %v1526_v0  ;;  %vm880_vm14 = vcmp.eq.s32.totalorder %v3382_v15, %v5094_v38  ;;  %v5100_v0 = vld [vmem:[#allocation166_spill] sm:$0xff]  ;;  %v5102_v33 = vld [vmem:[#allocation23_spill] sm:$0xff] }
 0x239   : > { %1843 = vperm.xlu1 %2394, %v2408_v49   ;;  %v1880_v43 = vsel %vm1688_vm2, %v1756_v59, 0.0  ;;  %v1881_v17 = vsel %vm1689_vm15, %v1756_v59, 0.0  ;;  %vm1276_vm1 = vcmp.eq.s32.totalorder %v3382_v15, %v5095_v2  ;;  %vm1275_vm0 = vcmp.eq.s32.totalorder %v3392_v37, %v5093_v19  ;;  %v5103_v19 = vld [vmem:[#allocation17_spill] sm:$0xff] }
 0x23a   : > { %v3962_v3 = vpop.permute.xlu1 %1787  ;;  %v1944_v32 = vadd.f32 %v1880_v43, %v1528_v6  ;;  %v1945_v14 = vadd.f32 %v1881_v17, %v1529_v31  ;;  %vm1278_vm3 = vcmp.eq.s32.totalorder %v3382_v15, %v5096_v46  ;;  %vm1279_vm5 = vcmp.eq.s32.totalorder %v3392_v37, %v5096_v46 }
 0x23b   : > { %vm1277_vm6 = vcmp.eq.s32.totalorder %v3392_v37, %v5095_v2  ;;  %vm1280_vm11 = vcmp.eq.s32.totalorder %v3382_v15, %v5097_v41  ;;  %v1466_v55 = vsel %vm1274_vm13, %v5098_v29, 0.0  ;;  %v1467_v26 = vsel %vm1275_vm0, %v5098_v29, 0.0  ;;  %v5105_v2 = vld [vmem:[#allocation140_spill] sm:$0xff] }
 0x23c   : > { %v1601_v22 = vpop.permute.xlu0 %1600  ;;  %v2247_v52 = vpack.c.bf16 %v1945_v14, %v1943_v61  ;;  %v2249_v54 = vpack.c.bf16 %v1944_v32, %v1942_v56  ;;  %v1468_v9 = vsel %vm1276_vm1, %v5099_v13, 0.0  ;;  %v1469_v7 = vsel %vm1277_vm6, %v5099_v13, 0.0  ;;  %v2410_v14 = vld [vmem:[%s2625_s25 + $0xc0] sm:$0xff]  ;;  %v5107_v13 = vld [vmem:[#allocation135_spill] sm:$0xff] }
 0x23d   : > { %2395 = vset.pattern.permute.xlu1 %v4961_v39  ;;  %vm1690_vm7 = vcmp.eq.s32.totalorder %v3382_v15, %v5100_v0  ;;  %vm1691_vm8 = vcmp.eq.s32.totalorder %v3392_v37, %v5100_v0  ;;  %vm1692_vm9 = vcmp.eq.s32.totalorder %v3382_v15, %v1601_v22  ;;  %vm1693_vm10 = vcmp.eq.s32.totalorder %v3392_v37, %v1601_v22  ;;  %v5104_v56 = vld [vmem:[#allocation138_spill] sm:$0xff]  ;;  %v5109_v0 = vld [vmem:[#allocation25_spill] sm:$0xff] }
 0x23e   : > { %1431 = vperm.xlu1 %2395, %v2409_v58   ;;  %2248 = vmatprep.subr.bf16.mxu0 %v2247_v52  ;;  %vm1281_vm12 = vcmp.eq.s32.totalorder %v3392_v37, %v5097_v41  ;;  %vm1284_vm4 = vcmp.eq.s32.totalorder %v3382_v15, %v5101_v51  ;;  %v1882_v23 = vsel %vm1690_vm7, %v5102_v33, 0.0  ;;  %v1883_v6 = vsel %vm1691_vm8, %v5102_v33, 0.0  ;;  %v5106_v52 = vld [vmem:[#allocation158_spill] sm:$0xff]  ;;  %v5110_v33 = vld [vmem:[#allocation112_spill] sm:$0xff] }
 0x23f   : > { %v3993_v48 = vpop.permute.xlu1 %1375  ;;  %2250 = vmatpush1.bf16.msra.mxu0 %v2249_v54  ;;  %vm1285_vm2 = vcmp.eq.s32.totalorder %v3392_v37, %v5101_v51  ;;  %v1530_v59 = vadd.f32 %v1466_v55, %v3781_v10  ;;  %v1531_v30 = vadd.f32 %v1467_v26, %v3785_v42  ;;  %v1532_v49 = vadd.f32 %v1468_v9, %v3788_v28 }
 0x240   : > { %v1533_v31 = vadd.f32 %v1469_v7, %v3802_v36  ;;  %v1764_v12 = vpop.permute.xlu0 %1763  ;;  %v1470_v43 = vsel %vm1278_vm3, %v5103_v19, 0.0  ;;  %v1471_v17 = vsel %vm1279_vm5, %v5103_v19, 0.0  ;;  %vm881_vm15 = vcmp.eq.s32.totalorder %v3392_v37, %v5094_v38  ;;  %v5108_v7 = vld [vmem:[#allocation156_spill] sm:$0xff] }
 0x241   : > { %v1884_v10 = vsel %vm1692_vm9, %v1764_v12, 0.0  ;;  %v1885_v42 = vsel %vm1693_vm10, %v1764_v12, 0.0  ;;  %v1946_v28 = vadd.f32 %v1882_v23, %v1530_v59  ;;  %v1947_v36 = vadd.f32 %v1883_v6, %v1531_v30  ;;  %v5111_v6 = vld [vmem:[#allocation142_spill] sm:$0xff]  ;;  %v5113_v30 = vld [vmem:[#allocation27_spill] sm:$0xff] }
 0x242   : > { %2396 = vset.pattern.permute.xlu1 %v4965_v60  ;;  %v1948_v32 = vadd.f32 %v1884_v10, %v1532_v49  ;;  %v1949_v61 = vadd.f32 %v1885_v42, %v1533_v31  ;;  %vm1288_vm13 = vcmp.eq.s32.totalorder %v3382_v15, %v5104_v56  ;;  %vm1289_vm1 = vcmp.eq.s32.totalorder %v3392_v37, %v5104_v56 }
 0x243   : > { %1663 = vperm.xlu1 %2396, %v2410_v14   ;;  %vm1292_vm0 = vcmp.eq.s32.totalorder %v3382_v15, %v5105_v2  ;;  %vm1293_vm3 = vcmp.eq.s32.totalorder %v3392_v37, %v5105_v2  ;;  %v1534_v22 = vadd.f32 %v1470_v43, %v3837_v18  ;;  %v1472_v54 = vsel %vm1280_vm11, %v5106_v52, 0.0  ;;  %v5114_v43 = vld [vmem:[#allocation159_spill] sm:$0xff] }
 0x244   : > { %v4031_v46 = vpop.permute.xlu1 %1621  ;;  %v1607_v29 = vpop.permute.xlu0 %1606  ;;  %v2251_v55 = vpack.c.bf16 %v1949_v61, %v1947_v36  ;;  %v2253_v26 = vpack.c.bf16 %v1948_v32, %v1946_v28  ;;  %vm1286_vm5 = vcmp.eq.s32.totalorder %v3382_v15, %v5107_v13  ;;  %vm1287_vm6 = vcmp.eq.s32.totalorder %v3392_v37, %v5107_v13  ;;  %v5116_v28 = vld [vmem:[#allocation137_spill] sm:$0xff] }
 0x245   : > { %v1535_v9 = vadd.f32 %v1471_v17, %v3840_v27  ;;  %v1538_v18 = vadd.f32 %v5108_v7, %v3857_v34  ;;  %v1473_v58 = vsel %vm1281_vm12, %v5106_v52, 0.0  ;;  %vm1694_vm11 = vcmp.eq.s32.totalorder %v3382_v15, %v5109_v0  ;;  %v2411_v27 = vld [vmem:[%s2625_s25 + $0xc8] sm:$0xff]  ;;  %v5112_v34 = vld [vmem:[#allocation157_spill] sm:$0xff] }
 0x246   : > { %v4055_v23 = vsel %vm880_vm14, %v5110_v33, 0.0  ;;  %vm1296_vm7 = vcmp.eq.s32.totalorder %v3382_v15, %v5111_v6  ;;  %vm1297_vm8 = vcmp.eq.s32.totalorder %v3392_v37, %v5111_v6  ;;  %vm1695_vm9 = vcmp.eq.s32.totalorder %v3392_v37, %v5109_v0  ;;  %2252 = vmatprep.subr.bf16.mxu0 %v2251_v55  ;;  %v5117_v36 = vld [vmem:[#allocation161_spill] sm:$0xff] }
 0x247   : > { %vm1696_vm10 = vcmp.eq.s32.totalorder %v3382_v15, %v1607_v29  ;;  %vm1697_vm12 = vcmp.eq.s32.totalorder %v3392_v37, %v1607_v29  ;;  %1666 = vperm.xlu1 %2396, %v2411_v27   ;;  %v1539_v41 = vadd.f32 %v5112_v34, %v3867_v8  ;;  %v1536_v59 = vadd.f32 %v1472_v54, %v3851_v1  ;;  %v5115_v8 = vld [vmem:[#allocation160_spill] sm:$0xff] }
 0x248   : > { %v1886_v49 = vsel %vm1694_vm11, %v5113_v30, 0.0  ;;  %v1887_v31 = vsel %vm1695_vm9, %v5113_v30, 0.0  ;;  %2254 = vmatpush1.bf16.msra.mxu0 %v2253_v26  ;;  %v4071_v12 = vpop.permute.xlu1 %1624  ;;  %v1537_v19 = vadd.f32 %v1473_v58, %v3854_v57  ;;  %v1480_v17 = vsel %vm1288_vm13, %v5114_v43, 0.0  ;;  %v1772_v42 = vpop.permute.xlu0 %1771  ;;  %v2412_v26 = vld [vmem:[%s2630_s30 + $0xc8] sm:$0xff]  ;;  %v5118_v58 = vld [vmem:[#allocation33_spill] sm:$0xff] }
 0x249   : > { %v1481_v1 = vsel %vm1289_vm1, %v5114_v43, 0.0  ;;  %v1476_v10 = vsel %vm1284_vm4, %v5115_v8, 0.0  ;;  %vm1290_vm14 = vcmp.eq.s32.totalorder %v3382_v15, %v5116_v28  ;;  %vm1291_vm11 = vcmp.eq.s32.totalorder %v3392_v37, %v5116_v28 }
 0x24a   : > { %v1477_v57 = vsel %vm1285_vm2, %v5115_v8, 0.0  ;;  %v1484_v32 = vsel %vm1292_vm0, %v5117_v36, 0.0  ;;  %v1888_v61 = vsel %vm1696_vm10, %v1772_v42, 0.0  ;;  %v1889_v14 = vsel %vm1697_vm12, %v1772_v42, 0.0 }
 0x24b   : > { %v1950_v56 = vadd.f32 %v1886_v49, %v1534_v22  ;;  %v1951_v52 = vadd.f32 %v1887_v31, %v1535_v9  ;;  %v1952_v54 = vadd.f32 %v1888_v61, %v1536_v59  ;;  %v1953_v55 = vadd.f32 %v1889_v14, %v1537_v19  ;;  %1851 = vperm.xlu1 %2396, %v2412_v26   ;;  %v5119_v22 = vld [vmem:[#allocation53_spill] sm:$0xff]  ;;  %v2414_v14 = vld [vmem:[%s2625_s25 + $0xd0] sm:$0xff] }
 0x24c   : > { %v1544_v51 = vadd.f32 %v1480_v17, %v3883_v40  ;;  %v1485_v7 = vsel %vm1293_vm3, %v5117_v36, 0.0  ;;  %vm1698_vm4 = vcmp.eq.s32.totalorder %v3382_v15, %v5118_v58  ;;  %vm1699_vm2 = vcmp.eq.s32.totalorder %v3392_v37, %v5118_v58  ;;  %v4112_v29 = vpop.permute.xlu1 %1795  ;;  %v1613_v27 = vpop.permute.xlu0 %1612 }
 0x24d   : > { %v1890_v9 = vsel %vm1698_vm4, %v5119_v22, 0.0  ;;  %v1891_v0 = vsel %vm1699_vm2, %v5119_v22, 0.0  ;;  %v2255_v34 = vpack.c.bf16 %v1953_v55, %v1951_v52  ;;  %v2257_v40 = vpack.c.bf16 %v1952_v54, %v1950_v56 }
 0x24e   : > { %v1545_v59 = vadd.f32 %v1481_v1, %v3896_v35  ;;  %v1540_v2 = vadd.f32 %v1476_v10, %v3870_v20  ;;  %v1541_v30 = vadd.f32 %v1477_v57, %v3873_v44  ;;  %v4120_v49 = vadd.f32 %v1484_v32, %v3934_v4  ;;  %v5120_v20 = vld [vmem:[#allocation139_spill] sm:$0xff]  ;;  %v5121_v44 = vld [vmem:[#allocation162_spill] sm:$0xff] }
 0x24f   : > { %v4126_v31 = vsel %vm881_vm15, %v5110_v33, 0.0  ;;  %v4129_v19 = vadd.f32 %v1485_v7, %v3937_v16  ;;  %vm1700_vm13 = vcmp.eq.s32.totalorder %v3382_v15, %v1613_v27  ;;  %vm1701_vm1 = vcmp.eq.s32.totalorder %v3392_v37, %v1613_v27  ;;  %2256 = vmatprep.subr.bf16.mxu0 %v2255_v34  ;;  %2397 = vset.pattern.permute.xlu1 %v4961_v39  ;;  %v2413_v33 = vld [vmem:[%s2630_s30 + $0xd0] sm:$0xff]  ;;  %v2415_v7 = vld [vmem:[%s2625_s25 + $0xd8] sm:$0xff] }
 0x250   : > { %vm1294_vm0 = vcmp.eq.s32.totalorder %v3382_v15, %v5120_v20  ;;  %vm1295_vm3 = vcmp.eq.s32.totalorder %v3392_v37, %v5120_v20  ;;  %v4142_v35 = vsel %vm1296_vm7, %v5121_v44, 0.0  ;;  %v4148_v4 = vsel %vm1297_vm8, %v5121_v44, 0.0  ;;  %2258 = vmatpush1.bf16.msra.mxu0 %v2257_v40  ;;  %1439 = vperm.xlu1 %2397, %v2413_v33  }
 0x251   : > { %v1954_v16 = vadd.f32 %v1890_v9, %v1538_v18  ;;  %v1955_v38 = vadd.f32 %v1891_v0, %v1539_v41  ;;  %v1478_v43 = vsel %vm1286_vm5, %v3816_v45, 0.0  ;;  %v1479_v17 = vsel %vm1287_vm6, %v3816_v45, 0.0  ;;  %v1780_v18 = vpop.permute.xlu0 %1779  ;;  %v1384_v6 = vpop.permute.xlu1 %1383  ;;  %v5122_v9 = vld [vmem:[#allocation28_spill] sm:$0xff]  ;;  %v5123_v0 = vld [vmem:[#allocation29_spill] sm:$0xff] }
 0x252   : > { %vm1704_vm15 = vcmp.eq.s32.totalorder %v3382_v15, %v3931_v62  ;;  %vm1705_vm7 = vcmp.eq.s32.totalorder %v3392_v37, %v3931_v62  ;;  %v1892_v8 = vsel %vm1700_vm13, %v1780_v18, 0.0  ;;  %v1893_v13 = vsel %vm1701_vm1, %v1780_v18, 0.0 }
 0x253   : > { %v1896_v41 = vsel %vm1704_vm15, %v3962_v3, 0.0  ;;  %v1897_v1 = vsel %vm1705_vm7, %v3962_v3, 0.0  ;;  %v1482_v45 = vsel %vm1290_vm14, %v3993_v48, 0.0  ;;  %v1483_v62 = vsel %vm1291_vm11, %v3993_v48, 0.0 }
 0x254   : > { %v1956_v10 = vadd.f32 %v1892_v8, %v1540_v2  ;;  %v1957_v42 = vadd.f32 %v1893_v13, %v1541_v30  ;;  %v1542_v3 = vadd.f32 %v1478_v43, %v3876_v5  ;;  %v1543_v57 = vadd.f32 %v1479_v17, %v3880_v25  ;;  %2398 = vset.pattern.permute.xlu1 %v4965_v60 }
 0x255   : > { %vm1702_vm5 = vcmp.eq.s32.totalorder %v3382_v15, %v3893_v21  ;;  %vm1703_vm6 = vcmp.eq.s32.totalorder %v3392_v37, %v3893_v21  ;;  %v1960_v36 = vadd.f32 %v1896_v41, %v1544_v51  ;;  %v1961_v32 = vadd.f32 %v1897_v1, %v1545_v59  ;;  %v1784_v61 = vpop.permute.xlu0 %1783  ;;  %1669 = vperm.xlu1 %2398, %v2414_v14   ;;  %v2417_v1 = vld [vmem:[%s2630_s30 + $0xe0] sm:$0xff]  ;;  %v5128_v14 = vld [vmem:[#allocation68_spill] sm:$0xff] }
 0x256   : > { %v2259_v48 = vpack.c.bf16 %v1957_v42, %v1955_v38  ;;  %v2261_v28 = vpack.c.bf16 %v1956_v10, %v1954_v16  ;;  %v1546_v56 = vadd.f32 %v1482_v45, %v3919_v50  ;;  %v1547_v5 = vadd.f32 %v1483_v62, %v3922_v63  ;;  %v1628_v54 = vpop.permute.xlu1 %1627  ;;  %v5124_v62 = vld [vmem:[#allocation36_spill] sm:$0xff]  ;;  %v5125_v10 = vld [vmem:[#allocation35_spill] sm:$0xff]  ;;  %v5126_v42 = vld [vmem:[#allocation94_spill] sm:$0xff] }
 0x257   : > { %v1894_v25 = vsel %vm1702_vm5, %v1784_v61, 0.0  ;;  %v1895_v52 = vsel %vm1703_vm6, %v1784_v61, 0.0  ;;  %vm1708_vm8 = vcmp.eq.s32.totalorder %v3382_v15, %v4071_v12  ;;  %vm1709_vm9 = vcmp.eq.s32.totalorder %v3392_v37, %v4071_v12 }
 0x258   : > { %v1958_v21 = vadd.f32 %v1894_v25, %v1542_v3  ;;  %v1959_v55 = vadd.f32 %v1895_v52, %v1543_v57  ;;  %2260 = vmatprep.subr.bf16.mxu0 %v2259_v48  ;;  %vm1706_vm10 = vcmp.eq.s32.totalorder %v3382_v15, %v4031_v46  ;;  %vm1707_vm12 = vcmp.eq.s32.totalorder %v3392_v37, %v4031_v46  ;;  %v2418_v3 = vld [vmem:[%s2625_s25 + $0xe0] sm:$0xff]  ;;  %v5127_v57 = vld [vmem:[#allocation67_spill] sm:$0xff] }
 0x259   : > { %v1900_v50 = vsel %vm1708_vm8, %v4112_v29, 0.0  ;;  %v1901_v63 = vsel %vm1709_vm9, %v4112_v29, 0.0  ;;  %2262 = vmatpush1.bf16.msra.mxu0 %v2261_v28  ;;  %v1486_v26 = vsel %vm1294_vm0, %v1384_v6, 0.0  ;;  %v1487_v12 = vsel %vm1295_vm3, %v1384_v6, 0.0  ;;  %v1792_v51 = vpop.permute.xlu0 %1791  ;;  %1672 = vperm.xlu1 %2398, %v2415_v7  }
 0x25a   : > { %v2263_v58 = vpack.c.bf16 %v1961_v32, %v1959_v55  ;;  %v2265_v22 = vpack.c.bf16 %v1960_v36, %v1958_v21  ;;  %v1136_v46 = vadd.f32 %v4055_v23, %v5122_v9  ;;  %v1137_v29 = vadd.f32 %v4126_v31, %v5123_v0  ;;  %v1631_v40 = vpop.permute.xlu1 %1630 }
 0x25b   : > { %v1898_v27 = vsel %vm1706_vm10, %v1792_v51, 0.0  ;;  %v1899_v34 = vsel %vm1707_vm12, %v1792_v51, 0.0  ;;  %v1964_v59 = vadd.f32 %v1900_v50, %v4120_v49  ;;  %v1965_v2 = vadd.f32 %v1901_v63, %v4129_v19  ;;  %v2416_v49 = vld [vmem:[%s2630_s30 + $0xd8] sm:$0xff]  ;;  %v5133_v63 = vld [vmem:[#allocation144_spill] sm:$0xff] }
 0x25c   : > { %v1962_v30 = vadd.f32 %v1898_v27, %v1546_v56  ;;  %v1963_v20 = vadd.f32 %v1899_v34, %v1547_v5  ;;  %2264 = vmatprep.subr.bf16.mxu0 %v2263_v58  ;;  %v1552_v44 = vadd.f32 %v4142_v35, %v1136_v46  ;;  %v1553_v16 = vadd.f32 %v4148_v4, %v1137_v29  ;;  %v5129_v56 = vld [vmem:[#allocation93_spill] sm:$0xff] }
 0x25d   : > { %v1550_v23 = vadd.f32 %v1486_v26, %v3944_v53  ;;  %v1551_v38 = vadd.f32 %v1487_v12, %v3958_v47  ;;  %2266 = vmatpush1.bf16.msra.mxu0 %v2265_v22  ;;  %vm1710_vm14 = vcmp.eq.s32.totalorder %v3382_v15, %v1628_v54  ;;  %vm1711_vm11 = vcmp.eq.s32.totalorder %v3392_v37, %v1628_v54  ;;  %v1800_v31 = vpop.permute.xlu0 %1799  ;;  %v5130_v5 = vld [vmem:[#allocation113_spill] sm:$0xff]  ;;  %v5131_v54 = vld [vmem:[#allocation114_spill] sm:$0xff]  ;;  %v2419_v26 = vld [vmem:[%s2625_s25 + $0xe8] sm:$0xff] }
 0x25e   : > { %1859 = vperm.xlu1 %2398, %v2416_v49   ;;  %v2267_v19 = vpack.c.bf16 %v1965_v2, %v1963_v20  ;;  %v2269_v33 = vpack.c.bf16 %v1964_v59, %v1962_v30  ;;  %vm1712_vm4 = vcmp.eq.s32.totalorder %v3382_v15, %v1631_v40  ;;  %vm1713_vm2 = vcmp.eq.s32.totalorder %v3392_v37, %v1631_v40  ;;  %v1804_v53 = vpop.permute.xlu1 %1803  ;;  %v5132_v50 = vld [vmem:[#allocation141_spill] sm:$0xff]  ;;  %v5134_v12 = vld [vmem:[#allocation164_spill] sm:$0xff]  ;;  %v2420_v20 = vld [vmem:[%s2630_s30 + $0xe8] sm:$0xff] }
 0x25f   : > { %v1902_v35 = vsel %vm1710_vm14, %v1800_v31, 0.0  ;;  %v1903_v4 = vsel %vm1711_vm11, %v1800_v31, 0.0  ;;  %v1904_v43 = vsel %vm1712_vm4, %v1804_v53, 0.0  ;;  %v1905_v47 = vsel %vm1713_vm2, %v1804_v53, 0.0 }
 0x260   : > { %2268 = vmatprep.subr.bf16.mxu0 %v2267_v19  ;;  %v1966_v17 = vadd.f32 %v1902_v35, %v1550_v23  ;;  %v1967_v18 = vadd.f32 %v1903_v4, %v1551_v38  ;;  %v1968_v6 = vadd.f32 %v1904_v43, %v1552_v44  ;;  %v1969_v41 = vadd.f32 %v1905_v47, %v1553_v16  ;;  %v2421_v4 = vld [vmem:[%s2630_s30 + $0xf0] sm:$0xff] }
 0x261   : > { %2270 = vmatpush1.bf16.msra.mxu0 %v2269_v33  ;;  %vm498_vm13 = vcmp.eq.s32.totalorder %v3382_v15, %v5124_v62  ;;  %vm499_vm1 = vcmp.eq.s32.totalorder %v3392_v37, %v5124_v62  ;;  %vm500_vm0 = vcmp.eq.s32.totalorder %v3382_v15, %v5125_v10  ;;  %vm501_vm3 = vcmp.eq.s32.totalorder %v3392_v37, %v5125_v10  ;;  %v1808_v58 = vpop.permute.xlu0 %1807  ;;  %v5140_v10 = vld [vmem:[#allocation95_spill] sm:$0xff] }
 0x262   : > { %2399 = vset.pattern.permute.xlu1 %v4961_v39  ;;  %v2271_v8 = vpack.c.bf16 %v1969_v41, %v1967_v18  ;;  %v2273_v13 = vpack.c.bf16 %v1968_v6, %v1966_v17  ;;  %vm884_vm15 = vcmp.eq.s32.totalorder %v3382_v15, %v5126_v42  ;;  %vm885_vm7 = vcmp.eq.s32.totalorder %v3392_v37, %v5126_v42  ;;  %v5135_v17 = vld [vmem:[#allocation38_spill] sm:$0xff]  ;;  %v5136_v18 = vld [vmem:[#allocation37_spill] sm:$0xff]  ;;  %v2422_v6 = vld [vmem:[%s2625_s25 + $0xf0] sm:$0xff] }
 0x263   : > { %1447 = vperm.xlu1 %2399, %v2417_v1   ;;  %v1392_v45 = vpop.permute.xlu1 %1391  ;;  %v724_v36 = vsel %vm500_vm0, %v5127_v57, 0.0  ;;  %v725_v32 = vsel %vm501_vm3, %v5127_v57, 0.0  ;;  %v722_v48 = vsel %vm498_vm13, %v5128_v14, 0.0  ;;  %v723_v28 = vsel %vm499_vm1, %v5128_v14, 0.0  ;;  %v5138_v41 = vld [vmem:[#allocation69_spill] sm:$0xff]  ;;  %v5141_v42 = vld [vmem:[#allocation115_spill] sm:$0xff] }
 0x264   : > { %2272 = vmatprep.subr.bf16.mxu0 %v2271_v8  ;;  %vm882_vm5 = vcmp.eq.s32.totalorder %v3382_v15, %v5129_v56  ;;  %vm883_vm6 = vcmp.eq.s32.totalorder %v3392_v37, %v5129_v56  ;;  %v1076_v21 = vsel %vm884_vm15, %v5131_v54, 0.0  ;;  %v1077_v55 = vsel %vm885_vm7, %v5131_v54, 0.0  ;;  %v5143_v14 = vld [vmem:[#allocation143_spill] sm:$0xff]  ;;  %v5145_v56 = vld [vmem:[#allocation21_spill] sm:$0xff] }
 0x265   : > { %2274 = vmatpush1.bf16.msra.mxu0 %v2273_v13  ;;  %v1074_v25 = vsel %vm882_vm5, %v5130_v5, 0.0  ;;  %v1075_v52 = vsel %vm883_vm6, %v5130_v5, 0.0  ;;  %vm1298_vm8 = vcmp.eq.s32.totalorder %v3382_v15, %v5132_v50  ;;  %vm1299_vm9 = vcmp.eq.s32.totalorder %v3392_v37, %v5132_v50  ;;  %v5139_v13 = vld [vmem:[#allocation70_spill] sm:$0xff] }
 0x266   : > { %vm1300_vm10 = vcmp.eq.s32.totalorder %v3382_v15, %v5133_v63  ;;  %vm1301_vm12 = vcmp.eq.s32.totalorder %v3392_v37, %v5133_v63  ;;  %v1140_v9 = vadd.f32 %v1076_v21, %v724_v36  ;;  %v1141_v46 = vadd.f32 %v1077_v55, %v725_v32  ;;  %v5142_v36 = vld [vmem:[#allocation116_spill] sm:$0xff] }
 0x267   : > { %2400 = vset.pattern.permute.xlu1 %v4965_v60  ;;  %v1492_v51 = vsel %vm1300_vm10, %v5134_v12, 0.0  ;;  %v1493_v7 = vsel %vm1301_vm12, %v5134_v12, 0.0  ;;  %v1490_v0 = vsel %vm1298_vm8, %v1392_v45, 0.0  ;;  %v1491_v29 = vsel %vm1299_vm9, %v1392_v45, 0.0 }
 0x268   : > { %1675 = vperm.xlu1 %2400, %v2418_v3   ;;  %v1634_v61 = vpop.permute.xlu1 %1633  ;;  %v1138_v27 = vadd.f32 %v1074_v25, %v722_v48  ;;  %v1139_v34 = vadd.f32 %v1075_v52, %v723_v28  ;;  %v1556_v40 = vadd.f32 %v1492_v51, %v1140_v9  ;;  %v1557_v59 = vadd.f32 %v1493_v7, %v1141_v46  ;;  %v5144_v48 = vld [vmem:[#allocation146_spill] sm:$0xff]  ;;  %v2423_v28 = vld [vmem:[%s2625_s25 + $0xf8] sm:$0xff]  ;;  %v1816_v52 = vpop.permute.xlu0 %1815 }
 0x269   : > { %vm1714_vm14 = vcmp.eq.s32.totalorder %v3382_v15, %v1634_v61  ;;  %vm1715_vm11 = vcmp.eq.s32.totalorder %v3392_v37, %v1634_v61  ;;  %vm502_vm13 = vcmp.eq.s32.totalorder %v3382_v15, %v5135_v17  ;;  %vm503_vm1 = vcmp.eq.s32.totalorder %v3392_v37, %v5135_v17  ;;  %v2424_v9 = vld [vmem:[%s2630_s30 + $0xf8] sm:$0xff] }
 0x26a   : > { %v1906_v2 = vsel %vm1714_vm14, %v1808_v58, 0.0  ;;  %v1907_v30 = vsel %vm1715_vm11, %v1808_v58, 0.0  ;;  %v1554_v44 = vadd.f32 %v1490_v0, %v1138_v27  ;;  %v1555_v16 = vadd.f32 %v1491_v29, %v1139_v34 }
 0x26b   : > { %vm504_vm0 = vcmp.eq.s32.totalorder %v3382_v15, %v5136_v18  ;;  %vm505_vm3 = vcmp.eq.s32.totalorder %v3392_v37, %v5136_v18  ;;  %v726_v45 = vsel %vm502_vm13, %v5139_v13, 0.0  ;;  %v727_v62 = vsel %vm503_vm1, %v5139_v13, 0.0  ;;  %v5151_v18 = vld [vmem:[#allocation97_spill] sm:$0xff] }
 0x26c   : > { %1678 = vperm.xlu1 %2400, %v2419_v26   ;;  %v1637_v22 = vpop.permute.xlu1 %1636  ;;  %v1970_v49 = vadd.f32 %v1906_v2, %v1554_v44  ;;  %v1971_v19 = vadd.f32 %v1907_v30, %v1555_v16  ;;  %v728_v1 = vsel %vm504_vm0, %v5138_v41, 0.0  ;;  %v729_v8 = vsel %vm505_vm3, %v5138_v41, 0.0  ;;  %v5154_v13 = vld [vmem:[#allocation145_spill] sm:$0xff] }
 0x26d   : > { %vm1716_vm4 = vcmp.eq.s32.totalorder %v3382_v15, %v1637_v22  ;;  %vm1717_vm2 = vcmp.eq.s32.totalorder %v3392_v37, %v1637_v22  ;;  %vm886_vm5 = vcmp.eq.s32.totalorder %v3382_v15, %v5140_v10  ;;  %vm887_vm6 = vcmp.eq.s32.totalorder %v3392_v37, %v5140_v10 }
 0x26e   : > { %v1078_v3 = vsel %vm886_vm5, %v5141_v42, 0.0  ;;  %v1079_v57 = vsel %vm887_vm6, %v5141_v42, 0.0  ;;  %vm1302_vm8 = vcmp.eq.s32.totalorder %v3382_v15, %v5143_v14  ;;  %vm1303_vm9 = vcmp.eq.s32.totalorder %v3392_v37, %v5143_v14 }
 0x26f   : > { %vm1304_vm10 = vcmp.eq.s32.totalorder %v3382_v15, %v5144_v48  ;;  %vm1305_vm12 = vcmp.eq.s32.totalorder %v3392_v37, %v5144_v48  ;;  %v1142_v26 = vadd.f32 %v1078_v3, %v726_v45  ;;  %v1143_v12 = vadd.f32 %v1079_v57, %v727_v62  ;;  %v5155_v45 = vld [vmem:[#allocation148_spill] sm:$0xff]  ;;  %v5156_v62 = vld [vmem:[#allocation22_spill] sm:$0xff]  ;;  %v1824_v3 = vpop.permute.xlu0 %1823 }
 0x270   : > { %1867 = vperm.xlu1 %2400, %v2420_v20   ;;  %v1812_v23 = vpop.permute.xlu1 %1811  ;;  %v1496_v5 = vsel %vm1304_vm10, %v5145_v56, 0.0  ;;  %v1497_v25 = vsel %vm1305_vm12, %v5145_v56, 0.0  ;;  %vm890_vm5 = vcmp.eq.s32.totalorder %v3382_v15, %v5151_v18  ;;  %vm891_vm6 = vcmp.eq.s32.totalorder %v3392_v37, %v5151_v18 }
 0x271   : > { %v1908_v38 = vsel %vm1716_vm4, %v1812_v23, 0.0  ;;  %v1909_v31 = vsel %vm1717_vm2, %v1812_v23, 0.0  ;;  %v4308_v23 = vld [vmem:[%s2620_s17] sm:$0xff]  ;;  %vm1308_vm10 = vcmp.eq.s32.totalorder %v3382_v15, %v5155_v45  ;;  %vm1309_vm12 = vcmp.eq.s32.totalorder %v3392_v37, %v5155_v45 }
 0x272   : > { %v1972_v33 = vadd.f32 %v1908_v38, %v1556_v40  ;;  %v1973_v35 = vadd.f32 %v1909_v31, %v1557_v59  ;;  %v2009_v38 = vcombine.high %v4308_v23, %v4308_v23  ;;  %v5146_v31 = vld [vmem:[#allocation40_spill] sm:$0xff]  ;;  %v1500_v10 = vsel %vm1308_vm10, %v5156_v62, 0.0 }
 0x273   : > { %vm506_vm13 = vcmp.eq.s32.totalorder %v3382_v15, %v5146_v31  ;;  %vm507_vm1 = vcmp.eq.s32.totalorder %v3392_v37, %v5146_v31  ;;  %v1501_v42 = vsel %vm1309_vm12, %v5156_v62, 0.0 }
 0x274   : > { %2401 = vset.pattern.permute.xlu1 %v4961_v39  ;;  %v2275_v53 = vpack.c.bf16 %v1973_v35, %v1971_v19  ;;  %v2277_v43 = vpack.c.bf16 %v1972_v33, %v1970_v49  ;;  %v5137_v39 = vld [vmem:[#allocation96_spill] sm:$0xff]  ;;  %2075 = vmatprep.mubr.f32.mxu0 %v2009_v38  ;;  %v5147_v49 = vld [vmem:[#allocation39_spill] sm:$0xff]  ;;  %v5148_v19 = vld [vmem:[#allocation98_spill] sm:$0xff] }
 0x275   : > { %1455 = vperm.xlu1 %2401, %v2421_v4   ;;  %v1400_v47 = vpop.permute.xlu1 %1399  ;;  %vm888_vm15 = vcmp.eq.s32.totalorder %v3382_v15, %v5137_v39  ;;  %vm889_vm7 = vcmp.eq.s32.totalorder %v3392_v37, %v5137_v39  ;;  %vm508_vm0 = vcmp.eq.s32.totalorder %v3382_v15, %v5147_v49  ;;  %vm509_vm3 = vcmp.eq.s32.totalorder %v3392_v37, %v5147_v49  ;;  %v5149_v33 = vld [vmem:[#allocation71_spill] sm:$0xff]  ;;  %v5152_v39 = vld [vmem:[#allocation117_spill] sm:$0xff]  ;;  %v5164_v49 = vld [vmem:[#allocation120_spill] sm:$0xff] }
 0x276   : > { %2276 = vmatprep.subr.bf16.mxu0 %v2275_v53  ;;  %v1080_v32 = vsel %vm888_vm15, %v5142_v36, 0.0  ;;  %v1081_v61 = vsel %vm889_vm7, %v5142_v36, 0.0  ;;  %v1494_v50 = vsel %vm1302_vm8, %v1400_v47, 0.0  ;;  %v1495_v63 = vsel %vm1303_vm9, %v1400_v47, 0.0 }
 0x277   : > { %2278 = vmatpush1.bf16.msra.mxu0 %v2277_v43  ;;  %v1144_v21 = vadd.f32 %v1080_v32, %v728_v1  ;;  %v1145_v55 = vadd.f32 %v1081_v61, %v729_v8  ;;  %v1558_v46 = vadd.f32 %v1494_v50, %v1142_v26  ;;  %v1559_v0 = vadd.f32 %v1495_v63, %v1143_v12  ;;  %v5150_v43 = vld [vmem:[#allocation72_spill] sm:$0xff]  ;;  %v5153_v1 = vld [vmem:[#allocation118_spill] sm:$0xff] }
 0x278   : > { %vm892_vm15 = vcmp.eq.s32.totalorder %v3382_v15, %v5148_v19  ;;  %vm893_vm7 = vcmp.eq.s32.totalorder %v3392_v37, %v5148_v19  ;;  %v732_v35 = vsel %vm508_vm0, %v5149_v33, 0.0  ;;  %v733_v4 = vsel %vm509_vm3, %v5149_v33, 0.0 }
 0x279   : > { %2403 = vset.pattern.permute.xlu1 %v4965_v60  ;;  %v1560_v51 = vadd.f32 %v1496_v5, %v1144_v21  ;;  %v1561_v7 = vadd.f32 %v1497_v25, %v1145_v55  ;;  %v730_v47 = vsel %vm506_vm13, %v5150_v43, 0.0  ;;  %v731_v17 = vsel %vm507_vm1, %v5150_v43, 0.0 }
 0x27a   : > { %1681 = vperm.xlu1 %2403, %v2422_v6   ;;  %v1640_v60 = vpop.permute.xlu1 %1639  ;;  %v1082_v6 = vsel %vm890_vm5, %v5152_v39, 0.0  ;;  %v1083_v41 = vsel %vm891_vm6, %v5152_v39, 0.0  ;;  %v1084_v8 = vsel %vm892_vm15, %v5153_v1, 0.0  ;;  %vm1306_vm8 = vcmp.eq.s32.totalorder %v3382_v15, %v5154_v13 }
 0x27b   : > { %vm1718_vm14 = vcmp.eq.s32.totalorder %v3382_v15, %v1640_v60  ;;  %vm1719_vm11 = vcmp.eq.s32.totalorder %v3392_v37, %v1640_v60  ;;  %v1085_v60 = vsel %vm893_vm7, %v5153_v1, 0.0  ;;  %vm1307_vm9 = vcmp.eq.s32.totalorder %v3392_v37, %v5154_v13 }
 0x27c   : > { %v1910_v58 = vsel %vm1718_vm14, %v1816_v52, 0.0  ;;  %v1911_v22 = vsel %vm1719_vm11, %v1816_v52, 0.0  ;;  %v1148_v36 = vadd.f32 %v1084_v8, %v732_v35  ;;  %v1149_v32 = vadd.f32 %v1085_v60, %v733_v4  ;;  %v5165_v35 = vld [vmem:[#allocation147_spill] sm:$0xff]  ;;  %v5166_v4 = vld [vmem:[#allocation9_spill] sm:$0xff] }
 0x27d   : > { %v1974_v40 = vadd.f32 %v1910_v58, %v1558_v46  ;;  %v1975_v59 = vadd.f32 %v1911_v22, %v1559_v0  ;;  %v1146_v48 = vadd.f32 %v1082_v6, %v730_v47  ;;  %v5157_v46 = vld [vmem:[#allocation42_spill] sm:$0xff]  ;;  %v5158_v0 = vld [vmem:[#allocation41_spill] sm:$0xff]  ;;  %vm1312_vm10 = vcmp.eq.s32.totalorder %v3382_v15, %v5166_v4 }
 0x27e   : > { %1684 = vperm.xlu1 %2403, %v2423_v28   ;;  %v1643_v54 = vpop.permute.xlu1 %1642  ;;  %v1147_v28 = vadd.f32 %v1083_v41, %v731_v17  ;;  %v1564_v56 = vadd.f32 %v1500_v10, %v1148_v36  ;;  %v1565_v5 = vadd.f32 %v1501_v42, %v1149_v32  ;;  %vm510_vm13 = vcmp.eq.s32.totalorder %v3382_v15, %v5157_v46  ;;  %v1832_v17 = vpop.permute.xlu0 %1831 }
 0x27f   : > { %vm1720_vm4 = vcmp.eq.s32.totalorder %v3382_v15, %v1643_v54  ;;  %vm1721_vm2 = vcmp.eq.s32.totalorder %v3392_v37, %v1643_v54  ;;  %vm511_vm1 = vcmp.eq.s32.totalorder %v3392_v37, %v5157_v46  ;;  %vm512_vm0 = vcmp.eq.s32.totalorder %v3382_v15, %v5158_v0 }
 0x280   : > { %vm513_vm3 = vcmp.eq.s32.totalorder %v3392_v37, %v5158_v0  ;;  %vm1313_vm12 = vcmp.eq.s32.totalorder %v3392_v37, %v5166_v4  ;;  %v5175_v0 = vld [vmem:[#allocation122_spill] sm:$0xff] }
 0x282   : > { %1875 = vperm.xlu1 %2403, %v2424_v9   ;;  %v1820_v29 = vpop.permute.xlu1 %1819 }
 0x283   : > { %v1912_v27 = vsel %vm1720_vm4, %v1820_v29, 0.0  ;;  %v1913_v34 = vsel %vm1721_vm2, %v1820_v29, 0.0  ;;  %v5159_v29 = vld [vmem:[#allocation100_spill] sm:$0xff] }
 0x284   : > { %v1976_v2 = vadd.f32 %v1912_v27, %v1560_v51  ;;  %v1977_v30 = vadd.f32 %v1913_v34, %v1561_v7  ;;  %vm896_vm15 = vcmp.eq.s32.totalorder %v3382_v15, %v5159_v29  ;;  %vm897_vm7 = vcmp.eq.s32.totalorder %v3392_v37, %v5159_v29  ;;  %v5160_v27 = vld [vmem:[#allocation73_spill] sm:$0xff] }
 0x285   : > { %v736_v34 = vsel %vm512_vm0, %v5160_v27, 0.0  ;;  %v1088_v19 = vsel %vm896_vm15, %v5164_v49, 0.0  ;;  %v1089_v33 = vsel %vm897_vm7, %v5164_v49, 0.0 }
 0x286   : > { %v2279_v20 = vpack.c.bf16 %v1977_v30, %v1975_v59  ;;  %v2281_v44 = vpack.c.bf16 %v1976_v2, %v1974_v40  ;;  %v737_v40 = vsel %vm513_vm3, %v5160_v27, 0.0  ;;  %v5161_v2 = vld [vmem:[#allocation74_spill] sm:$0xff]  ;;  %v1152_v39 = vadd.f32 %v1088_v19, %v736_v34  ;;  %v5176_v34 = vld [vmem:[#allocation149_spill] sm:$0xff] }
 0x287   : > { %v1408_v16 = vpop.permute.xlu1 %1407  ;;  %v734_v30 = vsel %vm510_vm13, %v5161_v2, 0.0  ;;  %v1153_v6 = vadd.f32 %v1089_v33, %v737_v40  ;;  %v5177_v40 = vld [vmem:[#allocation10_spill] sm:$0xff]  ;;  %v1840_v33 = vpop.permute.xlu0 %1839 }
 0x288   : > { %2280 = vmatprep.subr.bf16.mxu0 %v2279_v20  ;;  %v1498_v61 = vsel %vm1306_vm8, %v1408_v16, 0.0  ;;  %v1499_v14 = vsel %vm1307_vm9, %v1408_v16, 0.0  ;;  %v735_v20 = vsel %vm511_vm1, %v5161_v2, 0.0  ;;  %v5163_v16 = vld [vmem:[#allocation119_spill] sm:$0xff]  ;;  %vm1310_vm8 = vcmp.eq.s32.totalorder %v3382_v15, %v5165_v35 }
 0x289   : > { %2282 = vmatpush1.bf16.msra.mxu0 %v2281_v44  ;;  %v1562_v54 = vadd.f32 %v1498_v61, %v1146_v48  ;;  %v1563_v21 = vadd.f32 %v1499_v14, %v1147_v28  ;;  %v5162_v44 = vld [vmem:[#allocation99_spill] sm:$0xff]  ;;  %vm1311_vm9 = vcmp.eq.s32.totalorder %v3392_v37, %v5165_v35 }
 0x28a   : > { %vm894_vm5 = vcmp.eq.s32.totalorder %v3382_v15, %v5162_v44  ;;  %vm895_vm6 = vcmp.eq.s32.totalorder %v3392_v37, %v5162_v44 }
 0x28b   : > { %v1086_v38 = vsel %vm894_vm5, %v5163_v16, 0.0  ;;  %v1087_v31 = vsel %vm895_vm6, %v5163_v16, 0.0 }
 0x28c   : > { %v1646_v53 = vpop.permute.xlu1 %1645  ;;  %v1150_v8 = vadd.f32 %v1086_v38, %v734_v30  ;;  %v1151_v60 = vadd.f32 %v1087_v31, %v735_v20 }
 0x28d   : > { %vm1722_vm14 = vcmp.eq.s32.totalorder %v3382_v15, %v1646_v53  ;;  %vm1723_vm11 = vcmp.eq.s32.totalorder %v3392_v37, %v1646_v53  ;;  %v5167_v53 = vld [vmem:[#allocation24_spill] sm:$0xff] }
 0x28e   : > { %v1914_v25 = vsel %vm1722_vm14, %v1824_v3, 0.0  ;;  %v1915_v52 = vsel %vm1723_vm11, %v1824_v3, 0.0  ;;  %v1504_v43 = vsel %vm1312_vm10, %v5167_v53, 0.0  ;;  %v1505_v47 = vsel %vm1313_vm12, %v5167_v53, 0.0 }
 0x28f   : > { %v1978_v26 = vadd.f32 %v1914_v25, %v1562_v54  ;;  %v1979_v12 = vadd.f32 %v1915_v52, %v1563_v21  ;;  %v1568_v13 = vadd.f32 %v1504_v43, %v1152_v39  ;;  %v1569_v45 = vadd.f32 %v1505_v47, %v1153_v6  ;;  %v5168_v52 = vld [vmem:[#allocation44_spill] sm:$0xff]  ;;  %v5169_v54 = vld [vmem:[#allocation43_spill] sm:$0xff]  ;;  %v5170_v21 = vld [vmem:[#allocation102_spill] sm:$0xff] }
 0x290   : > { %v1649_v57 = vpop.permute.xlu1 %1648  ;;  %vm514_vm13 = vcmp.eq.s32.totalorder %v3382_v15, %v5168_v52  ;;  %vm515_vm1 = vcmp.eq.s32.totalorder %v3392_v37, %v5168_v52  ;;  %vm516_vm0 = vcmp.eq.s32.totalorder %v3382_v15, %v5169_v54  ;;  %vm517_vm3 = vcmp.eq.s32.totalorder %v3392_v37, %v5169_v54  ;;  %v5186_v54 = vld [vmem:[#allocation124_spill] sm:$0xff] }
 0x291   : > { %vm1724_vm4 = vcmp.eq.s32.totalorder %v3382_v15, %v1649_v57  ;;  %vm1725_vm2 = vcmp.eq.s32.totalorder %v3392_v37, %v1649_v57  ;;  %vm900_vm15 = vcmp.eq.s32.totalorder %v3382_v15, %v5170_v21  ;;  %vm901_vm7 = vcmp.eq.s32.totalorder %v3392_v37, %v5170_v21 }
 0x292   : > { %v1092_v29 = vsel %vm900_vm15, %v5175_v0, 0.0  ;;  %v1093_v27 = vsel %vm901_vm7, %v5175_v0, 0.0  ;;  %vm1316_vm10 = vcmp.eq.s32.totalorder %v3382_v15, %v5177_v40  ;;  %vm1317_vm12 = vcmp.eq.s32.totalorder %v3392_v37, %v5177_v40 }
 0x294   : > { %v1828_v55 = vpop.permute.xlu1 %1827 }
 0x295   : > { %v1916_v50 = vsel %vm1724_vm4, %v1828_v55, 0.0  ;;  %v1917_v63 = vsel %vm1725_vm2, %v1828_v55, 0.0  ;;  %v5171_v55 = vld [vmem:[#allocation75_spill] sm:$0xff] }
 0x296   : > { %v1980_v51 = vadd.f32 %v1916_v50, %v1564_v56  ;;  %v1981_v7 = vadd.f32 %v1917_v63, %v1565_v5  ;;  %v740_v50 = vsel %vm516_vm0, %v5171_v55, 0.0  ;;  %v741_v63 = vsel %vm517_vm3, %v5171_v55, 0.0 }
 0x297   : > { %v1156_v44 = vadd.f32 %v1092_v29, %v740_v50  ;;  %v1157_v16 = vadd.f32 %v1093_v27, %v741_v63  ;;  %v5187_v50 = vld [vmem:[#allocation150_spill] sm:$0xff]  ;;  %v5188_v63 = vld [vmem:[#allocation11_spill] sm:$0xff]  ;;  %v1848_v27 = vpop.permute.xlu0 %1847 }
 0x298   : > { %v2283_v58 = vpack.c.bf16 %v1981_v7, %v1979_v12  ;;  %v2285_v22 = vpack.c.bf16 %v1980_v51, %v1978_v26  ;;  %v5172_v12 = vld [vmem:[#allocation76_spill] sm:$0xff] }
 0x299   : > { %v1416_v9 = vpop.permute.xlu1 %1415  ;;  %v738_v51 = vsel %vm514_vm13, %v5172_v12, 0.0  ;;  %v739_v7 = vsel %vm515_vm1, %v5172_v12, 0.0 }
 0x29a   : > { %2284 = vmatprep.subr.bf16.mxu0 %v2283_v58  ;;  %v1502_v41 = vsel %vm1310_vm8, %v1416_v9, 0.0  ;;  %v1503_v1 = vsel %vm1311_vm9, %v1416_v9, 0.0  ;;  %v5173_v58 = vld [vmem:[#allocation101_spill] sm:$0xff]  ;;  %vm1314_vm8 = vcmp.eq.s32.totalorder %v3382_v15, %v5176_v34  ;;  %vm1315_vm9 = vcmp.eq.s32.totalorder %v3392_v37, %v5176_v34 }
 0x29b   : > { %2286 = vmatpush1.bf16.msra.mxu0 %v2285_v22  ;;  %v1566_v42 = vadd.f32 %v1502_v41, %v1150_v8  ;;  %v1567_v3 = vadd.f32 %v1503_v1, %v1151_v60  ;;  %vm898_vm5 = vcmp.eq.s32.totalorder %v3382_v15, %v5173_v58  ;;  %vm899_vm6 = vcmp.eq.s32.totalorder %v3392_v37, %v5173_v58  ;;  %v5174_v22 = vld [vmem:[#allocation121_spill] sm:$0xff] }
 0x29c   : > { %v1090_v9 = vsel %vm898_vm5, %v5174_v22, 0.0  ;;  %v1091_v46 = vsel %vm899_vm6, %v5174_v22, 0.0 }
 0x29d   : > { %v1154_v49 = vadd.f32 %v1090_v9, %v738_v51  ;;  %v1155_v19 = vadd.f32 %v1091_v46, %v739_v7 }
 0x29e   : > { %v1652_v59 = vpop.permute.xlu1 %1651 }
 0x29f   : > { %vm1726_vm14 = vcmp.eq.s32.totalorder %v3382_v15, %v1652_v59  ;;  %vm1727_vm11 = vcmp.eq.s32.totalorder %v3392_v37, %v1652_v59  ;;  %v5178_v59 = vld [vmem:[#allocation26_spill] sm:$0xff] }
 0x2a0   : > { %v1918_v62 = vsel %vm1726_vm14, %v1832_v17, 0.0  ;;  %v1919_v10 = vsel %vm1727_vm11, %v1832_v17, 0.0  ;;  %v1508_v2 = vsel %vm1316_vm10, %v5178_v59, 0.0  ;;  %v1509_v30 = vsel %vm1317_vm12, %v5178_v59, 0.0 }
 0x2a1   : > { %v1982_v61 = vadd.f32 %v1918_v62, %v1566_v42  ;;  %v1983_v14 = vadd.f32 %v1919_v10, %v1567_v3  ;;  %v1572_v35 = vadd.f32 %v1508_v2, %v1156_v44  ;;  %v1573_v4 = vadd.f32 %v1509_v30, %v1157_v16  ;;  %v5179_v10 = vld [vmem:[#allocation46_spill] sm:$0xff]  ;;  %v5180_v42 = vld [vmem:[#allocation45_spill] sm:$0xff]  ;;  %v5181_v3 = vld [vmem:[#allocation104_spill] sm:$0xff] }
 0x2a2   : > { %v1655_v18 = vpop.permute.xlu1 %1654  ;;  %vm518_vm13 = vcmp.eq.s32.totalorder %v3382_v15, %v5179_v10  ;;  %vm519_vm1 = vcmp.eq.s32.totalorder %v3392_v37, %v5179_v10  ;;  %vm520_vm0 = vcmp.eq.s32.totalorder %v3382_v15, %v5180_v42  ;;  %vm521_vm3 = vcmp.eq.s32.totalorder %v3392_v37, %v5180_v42  ;;  %v5197_v42 = vld [vmem:[#allocation126_spill] sm:$0xff] }
 0x2a3   : > { %vm1728_vm4 = vcmp.eq.s32.totalorder %v3382_v15, %v1655_v18  ;;  %vm1729_vm2 = vcmp.eq.s32.totalorder %v3392_v37, %v1655_v18  ;;  %vm904_vm15 = vcmp.eq.s32.totalorder %v3382_v15, %v5181_v3  ;;  %vm905_vm7 = vcmp.eq.s32.totalorder %v3392_v37, %v5181_v3 }
 0x2a4   : > { %v1096_v21 = vsel %vm904_vm15, %v5186_v54, 0.0  ;;  %v1097_v55 = vsel %vm905_vm7, %v5186_v54, 0.0  ;;  %vm1320_vm10 = vcmp.eq.s32.totalorder %v3382_v15, %v5188_v63  ;;  %vm1321_vm12 = vcmp.eq.s32.totalorder %v3392_v37, %v5188_v63 }
 0x2a6   : > { %v1836_v57 = vpop.permute.xlu1 %1835 }
 0x2a7   : > { %v1920_v36 = vsel %vm1728_vm4, %v1836_v57, 0.0  ;;  %v1921_v32 = vsel %vm1729_vm2, %v1836_v57, 0.0  ;;  %v5182_v57 = vld [vmem:[#allocation77_spill] sm:$0xff] }
 0x2a8   : > { %v1984_v48 = vadd.f32 %v1920_v36, %v1568_v13  ;;  %v1985_v28 = vadd.f32 %v1921_v32, %v1569_v45  ;;  %v744_v36 = vsel %vm520_vm0, %v5182_v57, 0.0  ;;  %v745_v32 = vsel %vm521_vm3, %v5182_v57, 0.0 }
 0x2a9   : > { %v1160_v58 = vadd.f32 %v1096_v21, %v744_v36  ;;  %v1161_v22 = vadd.f32 %v1097_v55, %v745_v32  ;;  %v5198_v36 = vld [vmem:[#allocation151_spill] sm:$0xff]  ;;  %v5199_v32 = vld [vmem:[#allocation12_spill] sm:$0xff]  ;;  %v1856_v55 = vpop.permute.xlu0 %1855 }
 0x2aa   : > { %v2287_v56 = vpack.c.bf16 %v1985_v28, %v1983_v14  ;;  %v2289_v5 = vpack.c.bf16 %v1984_v48, %v1982_v61  ;;  %v5183_v14 = vld [vmem:[#allocation78_spill] sm:$0xff] }
 0x2ab   : > { %v1424_v25 = vpop.permute.xlu1 %1423  ;;  %v742_v48 = vsel %vm518_vm13, %v5183_v14, 0.0  ;;  %v743_v28 = vsel %vm519_vm1, %v5183_v14, 0.0 }
 0x2ac   : > { %2288 = vmatprep.subr.bf16.mxu0 %v2287_v56  ;;  %v1506_v38 = vsel %vm1314_vm8, %v1424_v25, 0.0  ;;  %v1507_v31 = vsel %vm1315_vm9, %v1424_v25, 0.0  ;;  %v5184_v56 = vld [vmem:[#allocation103_spill] sm:$0xff]  ;;  %vm1318_vm8 = vcmp.eq.s32.totalorder %v3382_v15, %v5187_v50  ;;  %vm1319_vm9 = vcmp.eq.s32.totalorder %v3392_v37, %v5187_v50 }
 0x2ad   : > { %2290 = vmatpush1.bf16.msra.mxu0 %v2289_v5  ;;  %v1570_v47 = vadd.f32 %v1506_v38, %v1154_v49  ;;  %v1571_v17 = vadd.f32 %v1507_v31, %v1155_v19  ;;  %vm902_vm5 = vcmp.eq.s32.totalorder %v3382_v15, %v5184_v56  ;;  %vm903_vm6 = vcmp.eq.s32.totalorder %v3392_v37, %v5184_v56  ;;  %v5185_v5 = vld [vmem:[#allocation123_spill] sm:$0xff] }
 0x2ae   : > { %v1094_v25 = vsel %vm902_vm5, %v5185_v5, 0.0  ;;  %v1095_v52 = vsel %vm903_vm6, %v5185_v5, 0.0 }
 0x2af   : > { %v1158_v0 = vadd.f32 %v1094_v25, %v742_v48  ;;  %v1159_v29 = vadd.f32 %v1095_v52, %v743_v28 }
 0x2b0   : > { %v1658_v26 = vpop.permute.xlu1 %1657 }
 0x2b1   : > { %vm1730_vm14 = vcmp.eq.s32.totalorder %v3382_v15, %v1658_v26  ;;  %vm1731_vm11 = vcmp.eq.s32.totalorder %v3392_v37, %v1658_v26  ;;  %v5189_v26 = vld [vmem:[#allocation32_spill] sm:$0xff] }
 0x2b2   : > { %v1922_v53 = vsel %vm1730_vm14, %v1840_v33, 0.0  ;;  %v1923_v43 = vsel %vm1731_vm11, %v1840_v33, 0.0  ;;  %v1512_v12 = vsel %vm1320_vm10, %v5189_v26, 0.0  ;;  %v1513_v51 = vsel %vm1321_vm12, %v5189_v26, 0.0 }
 0x2b3   : > { %v1986_v41 = vadd.f32 %v1922_v53, %v1570_v47  ;;  %v1987_v1 = vadd.f32 %v1923_v43, %v1571_v17  ;;  %v1576_v34 = vadd.f32 %v1512_v12, %v1160_v58  ;;  %v1577_v40 = vadd.f32 %v1513_v51, %v1161_v22  ;;  %v5190_v43 = vld [vmem:[#allocation48_spill] sm:$0xff]  ;;  %v5191_v47 = vld [vmem:[#allocation47_spill] sm:$0xff]  ;;  %v5192_v17 = vld [vmem:[#allocation106_spill] sm:$0xff] }
 0x2b4   : > { %v1661_v20 = vpop.permute.xlu1 %1660  ;;  %vm522_vm13 = vcmp.eq.s32.totalorder %v3382_v15, %v5190_v43  ;;  %vm523_vm1 = vcmp.eq.s32.totalorder %v3392_v37, %v5190_v43  ;;  %vm524_vm0 = vcmp.eq.s32.totalorder %v3382_v15, %v5191_v47  ;;  %vm525_vm3 = vcmp.eq.s32.totalorder %v3392_v37, %v5191_v47  ;;  %v5208_v47 = vld [vmem:[#allocation128_spill] sm:$0xff] }
 0x2b5   : > { %vm1732_vm4 = vcmp.eq.s32.totalorder %v3382_v15, %v1661_v20  ;;  %vm1733_vm2 = vcmp.eq.s32.totalorder %v3392_v37, %v1661_v20  ;;  %vm908_vm15 = vcmp.eq.s32.totalorder %v3382_v15, %v5192_v17  ;;  %vm909_vm7 = vcmp.eq.s32.totalorder %v3392_v37, %v5192_v17 }
 0x2b6   : > { %v1100_v3 = vsel %vm908_vm15, %v5197_v42, 0.0  ;;  %v1101_v57 = vsel %vm909_vm7, %v5197_v42, 0.0  ;;  %vm1324_vm10 = vcmp.eq.s32.totalorder %v3382_v15, %v5199_v32  ;;  %vm1325_vm12 = vcmp.eq.s32.totalorder %v3392_v37, %v5199_v32 }
 0x2b8   : > { %v1844_v18 = vpop.permute.xlu1 %1843 }
 0x2b9   : > { %v1924_v39 = vsel %vm1732_vm4, %v1844_v18, 0.0  ;;  %v1925_v6 = vsel %vm1733_vm2, %v1844_v18, 0.0  ;;  %v5193_v18 = vld [vmem:[#allocation14_spill] sm:$0xff] }
 0x2ba   : > { %v1988_v8 = vadd.f32 %v1924_v39, %v1572_v35  ;;  %v1989_v60 = vadd.f32 %v1925_v6, %v1573_v4  ;;  %v748_v39 = vsel %vm524_vm0, %v5193_v18, 0.0  ;;  %v749_v6 = vsel %vm525_vm3, %v5193_v18, 0.0 }
 0x2bb   : > { %v1164_v56 = vadd.f32 %v1100_v3, %v748_v39  ;;  %v1165_v5 = vadd.f32 %v1101_v57, %v749_v6  ;;  %v5209_v39 = vld [vmem:[#allocation152_spill] sm:$0xff]  ;;  %v5210_v6 = vld [vmem:[#allocation13_spill] sm:$0xff]  ;;  %v1864_v3 = vpop.permute.xlu0 %1863 }
 0x2bc   : > { %v2291_v13 = vpack.c.bf16 %v1989_v60, %v1987_v1  ;;  %v2293_v45 = vpack.c.bf16 %v1988_v8, %v1986_v41  ;;  %v5194_v1 = vld [vmem:[#allocation79_spill] sm:$0xff] }
 0x2bd   : > { %v1432_v62 = vpop.permute.xlu1 %1431  ;;  %v746_v8 = vsel %vm522_vm13, %v5194_v1, 0.0  ;;  %v747_v60 = vsel %vm523_vm1, %v5194_v1, 0.0 }
 0x2be   : > { %2292 = vmatprep.subr.bf16.mxu0 %v2291_v13  ;;  %v1510_v9 = vsel %vm1318_vm8, %v1432_v62, 0.0  ;;  %v1511_v46 = vsel %vm1319_vm9, %v1432_v62, 0.0  ;;  %v5195_v13 = vld [vmem:[#allocation105_spill] sm:$0xff]  ;;  %vm1322_vm8 = vcmp.eq.s32.totalorder %v3382_v15, %v5198_v36  ;;  %vm1323_vm9 = vcmp.eq.s32.totalorder %v3392_v37, %v5198_v36 }
 0x2bf   : > { %2294 = vmatpush1.bf16.msra.mxu0 %v2293_v45  ;;  %v1574_v30 = vadd.f32 %v1510_v9, %v1158_v0  ;;  %v1575_v20 = vadd.f32 %v1511_v46, %v1159_v29  ;;  %vm906_vm5 = vcmp.eq.s32.totalorder %v3382_v15, %v5195_v13  ;;  %vm907_vm6 = vcmp.eq.s32.totalorder %v3392_v37, %v5195_v13  ;;  %v5196_v45 = vld [vmem:[#allocation125_spill] sm:$0xff] }
 0x2c0   : > { %v1098_v62 = vsel %vm906_vm5, %v5196_v45, 0.0  ;;  %v1099_v10 = vsel %vm907_vm6, %v5196_v45, 0.0 }
 0x2c1   : > { %v1162_v54 = vadd.f32 %v1098_v62, %v746_v8  ;;  %v1163_v21 = vadd.f32 %v1099_v10, %v747_v60 }
 0x2c2   : > { %v1664_v61 = vpop.permute.xlu1 %1663 }
 0x2c3   : > { %vm1734_vm14 = vcmp.eq.s32.totalorder %v3382_v15, %v1664_v61  ;;  %vm1735_vm11 = vcmp.eq.s32.totalorder %v3392_v37, %v1664_v61  ;;  %v5200_v61 = vld [vmem:[#allocation34_spill] sm:$0xff] }
 0x2c4   : > { %v1926_v59 = vsel %vm1734_vm14, %v1848_v27, 0.0  ;;  %v1927_v2 = vsel %vm1735_vm11, %v1848_v27, 0.0  ;;  %v1516_v14 = vsel %vm1324_vm10, %v5200_v61, 0.0  ;;  %v1517_v48 = vsel %vm1325_vm12, %v5200_v61, 0.0 }
 0x2c5   : > { %v1990_v31 = vadd.f32 %v1926_v59, %v1574_v30  ;;  %v1991_v49 = vadd.f32 %v1927_v2, %v1575_v20  ;;  %v1580_v50 = vadd.f32 %v1516_v14, %v1164_v56  ;;  %v1581_v63 = vadd.f32 %v1517_v48, %v1165_v5  ;;  %v5201_v2 = vld [vmem:[#allocation50_spill] sm:$0xff]  ;;  %v5202_v30 = vld [vmem:[#allocation49_spill] sm:$0xff]  ;;  %v5203_v20 = vld [vmem:[#allocation108_spill] sm:$0xff] }
 0x2c6   : > { %v1667_v7 = vpop.permute.xlu1 %1666  ;;  %vm526_vm13 = vcmp.eq.s32.totalorder %v3382_v15, %v5201_v2  ;;  %vm527_vm1 = vcmp.eq.s32.totalorder %v3392_v37, %v5201_v2  ;;  %vm528_vm0 = vcmp.eq.s32.totalorder %v3382_v15, %v5202_v30  ;;  %vm529_vm3 = vcmp.eq.s32.totalorder %v3392_v37, %v5202_v30 }
 0x2c7   : > { %vm1736_vm4 = vcmp.eq.s32.totalorder %v3382_v15, %v1667_v7  ;;  %vm1737_vm2 = vcmp.eq.s32.totalorder %v3392_v37, %v1667_v7  ;;  %vm912_vm15 = vcmp.eq.s32.totalorder %v3382_v15, %v5203_v20  ;;  %vm913_vm7 = vcmp.eq.s32.totalorder %v3392_v37, %v5203_v20  ;;  %v5219_v20 = vld [vmem:[#allocation153_spill] sm:$0xff] }
 0x2c8   : > { %v1104_v17 = vsel %vm912_vm15, %v5208_v47, 0.0  ;;  %v1105_v18 = vsel %vm913_vm7, %v5208_v47, 0.0  ;;  %vm1328_vm10 = vcmp.eq.s32.totalorder %v3382_v15, %v5210_v6  ;;  %vm1329_vm12 = vcmp.eq.s32.totalorder %v3392_v37, %v5210_v6 }
 0x2c9   : > { %v1521_v1 = vsel %vm1329_vm12, %v3798_v11, 0.0 }
 0x2ca   : > { %v1852_v44 = vpop.permute.xlu1 %1851 }
 0x2cb   : > { %v1928_v16 = vsel %vm1736_vm4, %v1852_v44, 0.0  ;;  %v1929_v38 = vsel %vm1737_vm2, %v1852_v44, 0.0  ;;  %v5204_v44 = vld [vmem:[#allocation16_spill] sm:$0xff] }
 0x2cc   : > { %v1992_v19 = vadd.f32 %v1928_v16, %v1576_v34  ;;  %v1993_v33 = vadd.f32 %v1929_v38, %v1577_v40  ;;  %v752_v16 = vsel %vm528_vm0, %v5204_v44, 0.0  ;;  %v753_v38 = vsel %vm529_vm3, %v5204_v44, 0.0  ;;  %v5220_v44 = vld [vmem:[#allocation15_spill] sm:$0xff] }
 0x2cd   : > { %v1168_v60 = vadd.f32 %v1104_v17, %v752_v16  ;;  %v1169_v13 = vadd.f32 %v1105_v18, %v753_v38  ;;  %vm1333_vm12 = vcmp.eq.s32.totalorder %v3392_v37, %v5220_v44 }
 0x2ce   : > { %v2295_v35 = vpack.c.bf16 %v1993_v33, %v1991_v49  ;;  %v2297_v4 = vpack.c.bf16 %v1992_v19, %v1990_v31  ;;  %v5205_v49 = vld [vmem:[#allocation80_spill] sm:$0xff]  ;;  %v1525_v38 = vsel %vm1333_vm12, %v3863_v24, 0.0 }
 0x2cf   : > { %v1440_v53 = vpop.permute.xlu1 %1439  ;;  %v750_v19 = vsel %vm526_vm13, %v5205_v49, 0.0  ;;  %v751_v33 = vsel %vm527_vm1, %v5205_v49, 0.0  ;;  %v1585_v36 = vadd.f32 %v1521_v1, %v1169_v13 }
 0x2d0   : > { %2296 = vmatprep.subr.bf16.mxu0 %v2295_v35  ;;  %v1514_v25 = vsel %vm1322_vm8, %v1440_v53, 0.0  ;;  %v1515_v52 = vsel %vm1323_vm9, %v1440_v53, 0.0  ;;  %v5206_v35 = vld [vmem:[#allocation107_spill] sm:$0xff]  ;;  %vm1326_vm8 = vcmp.eq.s32.totalorder %v3382_v15, %v5209_v39  ;;  %vm1327_vm9 = vcmp.eq.s32.totalorder %v3392_v37, %v5209_v39 }
 0x2d1   : > { %2298 = vmatpush1.bf16.msra.mxu0 %v2297_v4  ;;  %v1578_v51 = vadd.f32 %v1514_v25, %v1162_v54  ;;  %v1579_v7 = vadd.f32 %v1515_v52, %v1163_v21  ;;  %vm910_vm5 = vcmp.eq.s32.totalorder %v3382_v15, %v5206_v35  ;;  %vm911_vm6 = vcmp.eq.s32.totalorder %v3392_v37, %v5206_v35  ;;  %v5207_v4 = vld [vmem:[#allocation127_spill] sm:$0xff] }
 0x2d2   : > { %v1102_v53 = vsel %vm910_vm5, %v5207_v4, 0.0  ;;  %v1103_v43 = vsel %vm911_vm6, %v5207_v4, 0.0 }
 0x2d3   : > { %v1166_v10 = vadd.f32 %v1102_v53, %v750_v19  ;;  %v1167_v42 = vadd.f32 %v1103_v43, %v751_v33  ;;  %v1872_v43 = vpop.permute.xlu0 %1871 }
 0x2d4   : > { %v1670_v41 = vpop.permute.xlu1 %1669 }
 0x2d5   : > { %vm1738_vm14 = vcmp.eq.s32.totalorder %v3382_v15, %v1670_v41  ;;  %vm1739_vm11 = vcmp.eq.s32.totalorder %v3392_v37, %v1670_v41  ;;  %v1520_v41 = vsel %vm1328_vm10, %v3798_v11, 0.0  ;;  %vm1332_vm10 = vcmp.eq.s32.totalorder %v3382_v15, %v5220_v44 }
 0x2d6   : > { %v1930_v26 = vsel %vm1738_vm14, %v1856_v55, 0.0  ;;  %v1931_v12 = vsel %vm1739_vm11, %v1856_v55, 0.0  ;;  %v1584_v57 = vadd.f32 %v1520_v41, %v1168_v60  ;;  %v1524_v16 = vsel %vm1332_vm10, %v3863_v24, 0.0 }
 0x2d7   : > { %v1994_v46 = vadd.f32 %v1930_v26, %v1578_v51  ;;  %v1995_v0 = vadd.f32 %v1931_v12, %v1579_v7  ;;  %v5212_v26 = vld [vmem:[#allocation51_spill] sm:$0xff]  ;;  %v5213_v12 = vld [vmem:[#allocation110_spill] sm:$0xff] }
 0x2d8   : > { %v1673_v28 = vpop.permute.xlu1 %1672  ;;  %vm532_vm0 = vcmp.eq.s32.totalorder %v3382_v15, %v5212_v26  ;;  %vm533_vm3 = vcmp.eq.s32.totalorder %v3392_v37, %v5212_v26  ;;  %vm916_vm15 = vcmp.eq.s32.totalorder %v3382_v15, %v5213_v12  ;;  %vm917_vm7 = vcmp.eq.s32.totalorder %v3392_v37, %v5213_v12  ;;  %v5214_v51 = vld [vmem:[#allocation19_spill] sm:$0xff] }
 0x2d9   : > { %vm1740_vm4 = vcmp.eq.s32.totalorder %v3382_v15, %v1673_v28  ;;  %vm1741_vm2 = vcmp.eq.s32.totalorder %v3392_v37, %v1673_v28  ;;  %v756_v7 = vsel %vm532_vm0, %v5214_v51, 0.0 }
 0x2dd   : > { %v1860_v58 = vpop.permute.xlu1 %1859 }
 0x2de   : > { %v1932_v22 = vsel %vm1740_vm4, %v1860_v58, 0.0  ;;  %v1933_v9 = vsel %vm1741_vm2, %v1860_v58, 0.0  ;;  %v757_v58 = vsel %vm533_vm3, %v5214_v51, 0.0 }
 0x2df   : > { %v1996_v29 = vadd.f32 %v1932_v22, %v1580_v50  ;;  %v1997_v27 = vadd.f32 %v1933_v9, %v1581_v63  ;;  %v5211_v63 = vld [vmem:[#allocation52_spill] sm:$0xff]  ;;  %v5215_v9 = vld [vmem:[#allocation18_spill] sm:$0xff] }
 0x2e0   : > { %vm530_vm13 = vcmp.eq.s32.totalorder %v3382_v15, %v5211_v63  ;;  %vm531_vm1 = vcmp.eq.s32.totalorder %v3392_v37, %v5211_v63 }
 0x2e1   : > { %v2299_v34 = vpack.c.bf16 %v1997_v27, %v1995_v0  ;;  %v2301_v40 = vpack.c.bf16 %v1996_v29, %v1994_v46  ;;  %v754_v46 = vsel %vm530_vm13, %v5215_v9, 0.0  ;;  %v755_v0 = vsel %vm531_vm1, %v5215_v9, 0.0  ;;  %v5216_v29 = vld [vmem:[#allocation109_spill] sm:$0xff] }
 0x2e2   : > { %v1448_v59 = vpop.permute.xlu1 %1447  ;;  %vm914_vm5 = vcmp.eq.s32.totalorder %v3382_v15, %v5216_v29  ;;  %vm915_vm6 = vcmp.eq.s32.totalorder %v3392_v37, %v5216_v29  ;;  %v5217_v27 = vld [vmem:[#allocation129_spill] sm:$0xff] }
 0x2e3   : > { %2300 = vmatprep.subr.bf16.mxu0 %v2299_v34  ;;  %v1518_v45 = vsel %vm1326_vm8, %v1448_v59, 0.0  ;;  %v1519_v62 = vsel %vm1327_vm9, %v1448_v59, 0.0  ;;  %v1106_v34 = vsel %vm914_vm5, %v5217_v27, 0.0  ;;  %v5218_v59 = vld [vmem:[#allocation130_spill] sm:$0xff]  ;;  %vm1330_vm8 = vcmp.eq.s32.totalorder %v3382_v15, %v5219_v20 }
 0x2e4   : > { %2302 = vmatpush1.bf16.msra.mxu0 %v2301_v40  ;;  %v1582_v14 = vadd.f32 %v1518_v45, %v1166_v10  ;;  %v1583_v48 = vadd.f32 %v1519_v62, %v1167_v42  ;;  %v1107_v40 = vsel %vm915_vm6, %v5217_v27, 0.0  ;;  %v1108_v2 = vsel %vm916_vm15, %v5218_v59, 0.0 }
 0x2e5   : > { %v1109_v30 = vsel %vm917_vm7, %v5218_v59, 0.0  ;;  %vm1331_vm9 = vcmp.eq.s32.totalorder %v3392_v37, %v5219_v20  ;;  %v1172_v49 = vadd.f32 %v1108_v2, %v756_v7  ;;  %v1170_v4 = vadd.f32 %v1106_v34, %v754_v46 }
 0x2e6   : > { %v1173_v19 = vadd.f32 %v1109_v30, %v757_v58  ;;  %v1171_v53 = vadd.f32 %v1107_v40, %v755_v0 }
 0x2e7   : > { %v1676_v31 = vpop.permute.xlu1 %1675  ;;  %v1588_v47 = vadd.f32 %v1524_v16, %v1172_v49 }
 0x2e8   : > { %vm1742_vm14 = vcmp.eq.s32.totalorder %v3382_v15, %v1676_v31  ;;  %vm1743_vm11 = vcmp.eq.s32.totalorder %v3392_v37, %v1676_v31  ;;  %v1589_v17 = vadd.f32 %v1525_v38, %v1173_v19 }
 0x2e9   : > { %v1934_v32 = vsel %vm1742_vm14, %v1864_v3, 0.0  ;;  %v1935_v61 = vsel %vm1743_vm11, %v1864_v3, 0.0 }
 0x2ea   : > { %v1998_v5 = vadd.f32 %v1934_v32, %v1582_v14  ;;  %v1999_v25 = vadd.f32 %v1935_v61, %v1583_v48 }
 0x2eb   : > { %v1679_v8 = vpop.permute.xlu1 %1678 }
 0x2ec   : > { %vm1744_vm4 = vcmp.eq.s32.totalorder %v3382_v15, %v1679_v8  ;;  %vm1745_vm2 = vcmp.eq.s32.totalorder %v3392_v37, %v1679_v8 }
 0x2ef   : > { %v1868_v11 = vpop.permute.xlu1 %1867 }
 0x2f0   : > { %v1936_v28 = vsel %vm1744_vm4, %v1868_v11, 0.0  ;;  %v1937_v56 = vsel %vm1745_vm2, %v1868_v11, 0.0 }
 0x2f1   : > { %v2000_v52 = vadd.f32 %v1936_v28, %v1584_v57  ;;  %v2001_v54 = vadd.f32 %v1937_v56, %v1585_v36  ;;  %v2006_v57 = vld [vmem:[#allocation2] sm:$0xff] }
 0x2f3   : > { %v2303_v21 = vpack.c.bf16 %v2001_v54, %v1999_v25  ;;  %v2305_v55 = vpack.c.bf16 %v2000_v52, %v1998_v5 }
 0x2f4   : > { %v1456_v50 = vpop.permute.xlu1 %1455 }
 0x2f5   : > { %2304 = vmatprep.subr.bf16.mxu0 %v2303_v21  ;;  %v1522_v33 = vsel %vm1330_vm8, %v1456_v50, 0.0  ;;  %v1523_v35 = vsel %vm1331_vm9, %v1456_v50, 0.0 }
 0x2f6   : > { %2306 = vmatpush1.bf16.msra.mxu0 %v2305_v55  ;;  %v1586_v6 = vadd.f32 %v1522_v33, %v1170_v4  ;;  %v1587_v41 = vadd.f32 %v1523_v35, %v1171_v53 }
 0x2f9   : > { %v1682_v22 = vpop.permute.xlu1 %1681 }
 0x2fa   : > { %vm1746_vm14 = vcmp.eq.s32.totalorder %v3382_v15, %v1682_v22  ;;  %vm1747_vm11 = vcmp.eq.s32.totalorder %v3392_v37, %v1682_v22 }
 0x2fb   : > { %v1938_v18 = vsel %vm1746_vm14, %v1872_v43, 0.0  ;;  %v1939_v39 = vsel %vm1747_vm11, %v1872_v43, 0.0 }
 0x2fc   : > { %v2002_v60 = vadd.f32 %v1938_v18, %v1586_v6  ;;  %v2003_v13 = vadd.f32 %v1939_v39, %v1587_v41 }
 0x2fd   : > { %v1685_v31 = vpop.permute.xlu1 %1684 }
 0x2fe   : > { %vm1748_vm4 = vcmp.eq.s32.totalorder %v3382_v15, %v1685_v31  ;;  %vm1749_vm2 = vcmp.eq.s32.totalorder %v3392_v37, %v1685_v31 }
 0x301   : > { %v1876_v1 = vpop.permute.xlu1 %1875 }
 0x302   : > { %v1940_v24 = vsel %vm1748_vm4, %v1876_v1, 0.0  ;;  %v1941_v8 = vsel %vm1749_vm2, %v1876_v1, 0.0 }
 0x303   : > { %v2004_v45 = vadd.f32 %v1940_v24, %v1588_v47  ;;  %v2005_v62 = vadd.f32 %v1941_v8, %v1589_v17 }
 0x305   : > { %v2307_v10 = vpack.c.bf16 %v2005_v62, %v2003_v13  ;;  %v2309_v42 = vpack.c.bf16 %v2004_v45, %v2002_v60 }
 0x307   : > { %2308 = vmatprep.subr.bf16.mxu0 %v2307_v10 }
 0x308   : > { %2310 = vmatpush1.bf16.msra.mxu0 %v2309_v42 }
 0x30b   : > { %2076 = vmatmul.mubr.f32.vlgmr.msra.gmra.mrb[0].mxu0 %v4308_v23 }
 0x3de   : > { %v2077_v3 = vpop.f32.mrb[0].mxu0 }
 0x3df   : > { %v2079_v36 = vpop.f32.mrb[1].mxu0 }
 0x3e0   : > { %v2084_v32 = vcombine.low %v2077_v3, %v2079_v36 }
 0x3e2   : > { %v2086_v61 = vadd.f32 %v2084_v32, %v2006_v57 }
 0x3e4   : > { %2087 = vst [vmem:[#allocation2] sm:$0xff] %v2086_v61 }
 0x3e5 PF: > { %s2246_s7 = sshll.u32 %s2509_s22, 7  ;;  %s2110_s13 = sshll.u32 %s254_s9, 4  ;;  %s2111_s13 = int_to_ptr.vmem [resolvable:$true] %s2110_s13 }
 0x3e6   : > { %s4585_s12 = scalar_lea.hbm %s4634_s4, %s2246_s7  ;;  %s5221_s14 = sand.u32 1, %s2501_s21  }
 0x3e7   : > { %s2094_s15 = scalar_lea.sflag [#allocation6], %s5221_s14  ;;  %s2437_s16 = scalar_lea.vmem %s2111_s13, 128 }
 0x3e8   : > { %p2438_p6 = scmp.ne.s32.totalorder %s2111_s13, %s2437_s16  ;;  %s2525_s17 = smov [#allocation5]  }
 0x3e9   : > { %s2441_s18 = sshll.u32 %s2525_s17, 4  ;;  %s2442_s18 = int_to_ptr.vmem [resolvable:$false] %s2441_s18 }
 0x3ea   : > { %p2439_p7 = pnand %p2438_p6, %p2594_p9  ;;  %s2443_s22 = scalar_lea.vmem %s2442_s18, 256 }
 0x3eb   : > { %v2091_v37 = vld [vmem:[#allocation2] sm:$0xff]  ;;  %p2444_p10 = scmp.lt.s32.totalorder %s2111_s13, %s2442_s18  ;;  %p2445_p11 = scmp.lt.s32.totalorder %s2443_s22, %s2437_s16 }
 0x3ec   : > { %2092 = vst [vmem:[%s254_s9] sm:$0xff] %v2091_v37  ;;  %p2440_p8 = pneg %p2439_p7 }
 0x3ed   : > { %p2446_p12 = por %p2445_p11, %p2444_p10 }
 0x3ef   : > { %p2447_p0 = pnand %p2446_p12, %p2440_p8 }
 0x3f1   : > { %2450 = shalt.err (!%p2447_p0)
}
 0x3f2   : > { %s2451_s8 = scalar_lea.hbm %s4585_s12, 128  ;;  %s2455_s26 = scalar_lea.hbm %s4634_s4, 256 }
 0x3f3   : > { %p2452_p1 = scmp.ne.s32.totalorder %s4585_s12, %s2451_s8  ;;  %p2456_p4 = scmp.lt.u32.totalorder %s4585_s12, %s4634_s4 }
 0x3f4   : > { %p2457_p5 = scmp.lt.u32.totalorder %s2455_s26, %s2451_s8  ;;  %p2459_p7 = scmp.lt.u32.totalorder %s2451_s8, %s4585_s12 }
 0x3f5   : > { %p2453_p2 = pnand %p2452_p1, %p2594_p9 }
 0x3f6   : > { %p2458_p6 = por %p2457_p5, %p2456_p4 }
 0x3f7   : > { %p2454_p3 = pneg %p2453_p2 }
 0x3f8   : > { %p2460_p8 = por %p2459_p7, %p2458_p6 }
 0x3fa   : > { %p2461_p10 = pnand %p2460_p8, %p2454_p3 }
 0x3fc   : > { %2464 = shalt.err (!%p2461_p10)
}
 0x3fd   : > { %2311 = dma.vmem_to_hbm [thread:$0]  (%p2594_p9), %s2111_s13, 128, %s4585_s12, %s2094_s15  }
 0x3fe PF: > { %p2317_p11 = scmp.ge.s32.totalorder %s2517_s24, 2  ;;  %s2122_s9 = sand.u32 1, %s2497_s20  }
 0x3ff   : > { %s2123_s7 = scalar_lea.sflag [#allocation6], %s2122_s9 }
 0x400   : > { %p2314_p12 = pnand %p2317_p11, %p2601_p13 }
 0x402   : > { %2492 = dma.done.wait (!%p2314_p12), %s2123_s7, 128  }
 0x403   : > { %2494 = vsyncadd (!%p2314_p12), %s2123_s7, 4294967168  ;;  %s23_s24 = sadd.s32 1, %s2517_s24   ;;  %s5222_s20 = smov %s2501_s21 }
 0x404   : > { %p20_p0 = scmp.ge.s32.totalorder %s23_s24, 4   ;;  %s5223_s21 = smov %s2505_s0 }
 0x405   : > { %s5224_s0 = smov %s2607_s6  ;;  %s5225_s22 = smov %s2513_s23 }
 0x406   : > { %s5226_s23 = smov %s5228_s27  ;;  %22 = sbr.rel (!%p20_p0) target bundleno = 19 (0x13), region = 85 }
 0x40d   :  { %2128 = vsyncpa [#allocation6], 1 }
 0x40e   :  { %2130 = vsyncpa [#allocation6 + $0x1], 1 }

</bundles_post_ra>
